<compile_context>
chip_gen: v5e
topology: v5e:2x2
jax: 0.10.0
libtpu: 0.0.40
codegen_flags: <defaults>
</compile_context>

<pallas_src>
import jax
import jax.numpy as jnp
import numpy as np
from jax.experimental import pallas as pl
from jax.experimental.pallas import tpu as pltpu

NUM_CLASSES = 4
OUT_PAD = 128                      # fc5 output padded to a lane-dense 128-wide block
_POOL_POS = ((0, 0), (0, 1), (1, 0), (1, 1))


# ------------------------------ fused Pallas kernel ------------------------------

def _net_kernel(patches_ref, weff_ref, cbias_ref,
                w1, b1, w2, b2, w3, b3, w4, b4, w5, b5, out_ref):
    """One grid step = one (image n, pooled row yp) block.

    patches_ref: (1, 16, Wp)   4x4 input patch per pooled column xp
    weff_ref:    (4, 20, 16)   effective conv weights per 2x2 pool-window position
    cbias_ref:   (20, 1)       conv1 bias
    w*/b*:       fc weights (bf16, (in,out)) / biases (f32, (1,out)); fc5 padded to 128
    out_ref:     (1, 20, OUT_PAD)  fc5 outputs for samples (n, channel, yp)
    """
    pat = patches_ref[0]                                              # (16, Wp) f32

    # conv1 + bias + relu + 2x2 max-pool: one small MXU matmul per pool position.
    c0 = jnp.dot(weff_ref[0], pat, preferred_element_type=jnp.float32)
    c1 = jnp.dot(weff_ref[1], pat, preferred_element_type=jnp.float32)
    c2 = jnp.dot(weff_ref[2], pat, preferred_element_type=jnp.float32)
    c3 = jnp.dot(weff_ref[3], pat, preferred_element_type=jnp.float32)
    v = jnp.maximum(jnp.maximum(c0, c1), jnp.maximum(c2, c3))         # (20, Wp)
    h = jnp.maximum(v + cbias_ref[...], 0.0)                          # bias once after max; relu in f32

    def fc(hh, w_ref, b_ref, relu):
        y = jnp.dot(hh.astype(jnp.bfloat16), w_ref[...],
                    preferred_element_type=jnp.float32) + b_ref[...]
        return jnp.maximum(y, 0.0) if relu else y

    h = fc(h, w1, b1, True)                                           # (20, 1024)
    h = fc(h, w2, b2, True)                                           # (20, 512)
    h = fc(h, w3, b3, True)                                           # (20, 256)
    h = fc(h, w4, b4, True)                                           # (20, 128)
    y = fc(h, w5, b5, False)                                          # (20, OUT_PAD)
    out_ref[...] = y[None]                                            # (1, 20, OUT_PAD)


# ------------------------------ host-side setup (one-time) ------------------------------

def _patch_feature_order():
    """Empirically determine conv_general_dilated_patches' feature ordering (C=1)."""
    probe = jnp.arange(16, dtype=jnp.float32).reshape(1, 1, 4, 4)
    got = jax.lax.conv_general_dilated_patches(
        probe, (4, 4), (1, 1), "VALID", precision=jax.lax.Precision.HIGHEST)
    return np.asarray(got).reshape(16).astype(np.int32)   # order[k] = a*4 + b


def _conv_scatter():
    """(4, 16, 9) constant 0/1 tensor: conv1 3x3 weights -> per-pool-position 16-tap weights."""
    order = _patch_feature_order()
    inv = {int(v): k for k, v in enumerate(order)}
    S = np.zeros((4, 16, 9), np.float32)
    for p, (py, px) in enumerate(_POOL_POS):
        for dy in range(3):
            for dx in range(3):
                S[p, inv[(py + dy) * 4 + (px + dx)], dy * 3 + dx] = 1.0
    return S


def prepare_kernel_params(params):
    """One-time packing: weff via a single einsum, fc weights to bf16, fc5 padded to 128 lanes."""
    conv_w, conv_b, fcs = params
    S = jnp.asarray(_conv_scatter())
    weff = jnp.einsum("pkj,oj->pok", S, conv_w.reshape(20, 9),
                      precision=jax.lax.Precision.HIGHEST)            # (4, 20, 16) f32
    cbias = conv_b.reshape(20, 1).astype(jnp.float32)
    kfcs = []
    n_fc = len(fcs)
    for i, (w, b) in enumerate(fcs):
        wq = w.astype(jnp.bfloat16)
        bb = b.reshape(1, -1).astype(jnp.float32)
        if i == n_fc - 1:                                             # pad fc5 -> lane-dense 128
            wq = jnp.zeros((w.shape[0], OUT_PAD), jnp.bfloat16).at[:, :w.shape[1]].set(wq)
            bb = jnp.zeros((1, OUT_PAD), jnp.float32).at[:, :b.shape[0]].set(b)
        kfcs.append((wq, bb))
    return weff, cbias, tuple(kfcs)


# ------------------------------ forward wrapper ------------------------------

def _resident(shape):
    nd = len(shape)
    return pl.BlockSpec(shape, lambda i, _nd=nd: (0,) * _nd)


def net_forward(x, kparams):
    """x: (N, 1, H, W) NCHW -> (N, 20, (H-2)//2, NUM_CLASSES)."""
    weff, cbias, kfcs = kparams
    N, _, H, W = x.shape
    Hp, Wp = (H - 2) // 2, (W - 2) // 2
    B = N * Hp

    # Single XLA patches op: 4x4 input patch (all taps of one 2x2 pool window), stride 2.
    patches = jax.lax.conv_general_dilated_patches(
        x, (4, 4), (2, 2), "VALID",
        precision=jax.lax.Precision.HIGHEST)                          # (N, 16, Hp, Wp)
    patches = patches.transpose(0, 2, 1, 3).reshape(B, 16, Wp)        # (B, 16, Wp)

    args = [patches, weff, cbias]
    for w, b in kfcs:
        args += [w, b]

    out = pl.pallas_call(
        _net_kernel,
        out_shape=jax.ShapeDtypeStruct((B, 20, OUT_PAD), jnp.float32),
        grid=(B,),
        in_specs=[pl.BlockSpec((1, 16, Wp), lambda i: (i, 0, 0))]
                 + [_resident(a.shape) for a in args[1:]],
        out_specs=pl.BlockSpec((1, 20, OUT_PAD), lambda i: (i, 0, 0)),
        compiler_params=pltpu.CompilerParams(dimension_semantics=("parallel",)),
    )(*args)

    # (B, 20, OUT_PAD); block i = (n, yp), rows = conv channels  ->  (N, 20, Hp, NUM_CLASSES)
    out = out[:, :, :NUM_CLASSES].reshape(N, Hp, 20, NUM_CLASSES)
    return out.transpose(0, 2, 1, 3)


# ------------------------------ params / reference ------------------------------

def init_params(key):
    ks = jax.random.split(key, 12)

    def uni(k, shape, fan_in):
        bound = 1.0 / np.sqrt(fan_in)
        return jax.random.uniform(k, shape, jnp.float32, -bound, bound)

    conv_w = uni(ks[0], (20, 1, 3, 3), 9)       # (out, in, kh, kw) like PyTorch
    conv_b = uni(ks[1], (20,), 9)
    dims = [(39, 1024), (1024, 512), (512, 256), (256, 128), (128, NUM_CLASSES)]
    fcs = []
    for i, (din, dout) in enumerate(dims):
        w = uni(ks[2 + 2 * i], (din, dout), din)  # stored as (in, out) = PyTorch W.T
        b = uni(ks[3 + 2 * i], (dout,), din)
        fcs.append((w, b))
    return conv_w, conv_b, tuple(fcs)


def reference_forward(x, params):
    conv_w, conv_b, fcs = params
    y = jax.lax.conv_general_dilated(
        x, conv_w, (1, 1), "VALID", dimension_numbers=("NCHW", "OIHW", "NCHW"),
        precision=jax.lax.Precision.HIGHEST)
    y = jnp.maximum(y + conv_b[None, :, None, None], 0.0)
    y = jax.lax.reduce_window(y, -jnp.inf, jax.lax.max, (1, 1, 2, 2), (1, 1, 2, 2), "VALID")
    for i, (w, b) in enumerate(fcs):
        y = jnp.dot(y, w, precision=jax.lax.Precision.HIGHEST) + b
        if i < len(fcs) - 1:
            y = jnp.maximum(y, 0.0)
    return y


if __name__ == "__main__":
    key = jax.random.PRNGKey(0)
    kx, kp = jax.random.split(key)
    # W must be 80 so the pooled width is 39 (= fc1 in_features); H kept small.
    x = jax.random.normal(kx, (2, 1, 8, 80), jnp.float32)
    params = init_params(kp)
    kparams = prepare_kernel_params(params)

    fwd = jax.jit(net_forward)
    out = jax.block_until_ready(fwd(x, kparams))
    ref = jax.block_until_ready(reference_forward(x, params))

    assert out.shape == (2, 20, 3, NUM_CLASSES), out.shape
    # bf16 matmul operands (f32 accumulation) => compare to the f32 reference loosely.
    np.testing.assert_allclose(np.asarray(out), np.asarray(ref), rtol=2e-2, atol=2e-2)
    print("KERNEL_OK")
</pallas_src>

<mosaic_0001>
module attributes {stable_mosaic.version = 11 : i64} {
  func.func @_net_kernel(%arg0: i32, %arg1: memref<1x16x39xf32, #tpu.memory_space<vmem>>, %arg2: memref<4x20x16xf32, #tpu.memory_space<vmem>>, %arg3: memref<20x1xf32, #tpu.memory_space<vmem>>, %arg4: memref<39x1024xbf16, #tpu.memory_space<vmem>>, %arg5: memref<1x1024xf32, #tpu.memory_space<vmem>>, %arg6: memref<1024x512xbf16, #tpu.memory_space<vmem>>, %arg7: memref<1x512xf32, #tpu.memory_space<vmem>>, %arg8: memref<512x256xbf16, #tpu.memory_space<vmem>>, %arg9: memref<1x256xf32, #tpu.memory_space<vmem>>, %arg10: memref<256x128xbf16, #tpu.memory_space<vmem>>, %arg11: memref<1x128xf32, #tpu.memory_space<vmem>>, %arg12: memref<128x128xbf16, #tpu.memory_space<vmem>>, %arg13: memref<1x128xf32, #tpu.memory_space<vmem>>, %arg14: memref<1x20x128xf32, #tpu.memory_space<vmem>>) attributes {dimension_semantics = [#tpu.dimension_semantics<parallel>], iteration_bounds = array<i64: 6>, scalar_prefetch = 0 : i64, scratch_operands = 0 : i64, tpu.core_type = #tpu.core_type<tc>, window_params = [{transform_indices = @transform_0, window_bounds = array<i64: 1, 16, 39>}, {pipeline_mode = #tpu.pipeline_mode<synchronous>, transform_indices = @transform_1, window_bounds = array<i64: 4, 20, 16>}, {pipeline_mode = #tpu.pipeline_mode<synchronous>, transform_indices = @transform_2, window_bounds = array<i64: 20, 1>}, {pipeline_mode = #tpu.pipeline_mode<synchronous>, transform_indices = @transform_3, window_bounds = array<i64: 39, 1024>}, {pipeline_mode = #tpu.pipeline_mode<synchronous>, transform_indices = @transform_4, window_bounds = array<i64: 1, 1024>}, {pipeline_mode = #tpu.pipeline_mode<synchronous>, transform_indices = @transform_5, window_bounds = array<i64: 1024, 512>}, {pipeline_mode = #tpu.pipeline_mode<synchronous>, transform_indices = @transform_6, window_bounds = array<i64: 1, 512>}, {pipeline_mode = #tpu.pipeline_mode<synchronous>, transform_indices = @transform_7, window_bounds = array<i64: 512, 256>}, {pipeline_mode = #tpu.pipeline_mode<synchronous>, transform_indices = @transform_8, window_bounds = array<i64: 1, 256>}, {pipeline_mode = #tpu.pipeline_mode<synchronous>, transform_indices = @transform_9, window_bounds = array<i64: 256, 128>}, {pipeline_mode = #tpu.pipeline_mode<synchronous>, transform_indices = @transform_10, window_bounds = array<i64: 1, 128>}, {pipeline_mode = #tpu.pipeline_mode<synchronous>, transform_indices = @transform_11, window_bounds = array<i64: 128, 128>}, {pipeline_mode = #tpu.pipeline_mode<synchronous>, transform_indices = @transform_12, window_bounds = array<i64: 1, 128>}, {transform_indices = @transform_13, window_bounds = array<i64: 1, 20, 128>}]} {
    %c0 = arith.constant 0 : index
    %c0_0 = arith.constant 0 : index
    %c0_1 = arith.constant 0 : index
    %0 = vector.load %arg1[%c0, %c0_0, %c0_1] : memref<1x16x39xf32, #tpu.memory_space<vmem>>, vector<1x16x39xf32>
    %1 = vector.shape_cast %0 : vector<1x16x39xf32> to vector<16x39xf32>
    %c0_2 = arith.constant 0 : index
    %c0_3 = arith.constant 0 : index
    %c0_4 = arith.constant 0 : index
    %2 = vector.load %arg2[%c0_2, %c0_3, %c0_4] : memref<4x20x16xf32, #tpu.memory_space<vmem>>, vector<1x20x16xf32>
    %3 = vector.shape_cast %2 : vector<1x20x16xf32> to vector<20x16xf32>
    %cst = arith.constant dense<0.000000e+00> : vector<20x39xf32>
    %4 = tpu.matmul %3, %1, %cst {dimension_numbers = #tpu.dot_dimension_numbers<[1], [0], [0], [1], [0, 0, 1, 1], [], []>} : vector<20x16xf32>, vector<16x39xf32>, vector<20x39xf32> -> vector<20x39xf32>
    %c1 = arith.constant 1 : index
    %c0_5 = arith.constant 0 : index
    %c0_6 = arith.constant 0 : index
    %5 = vector.load %arg2[%c1, %c0_5, %c0_6] : memref<4x20x16xf32, #tpu.memory_space<vmem>>, vector<1x20x16xf32>
    %6 = vector.shape_cast %5 : vector<1x20x16xf32> to vector<20x16xf32>
    %cst_7 = arith.constant dense<0.000000e+00> : vector<20x39xf32>
    %7 = tpu.matmul %6, %1, %cst_7 {dimension_numbers = #tpu.dot_dimension_numbers<[1], [0], [0], [1], [0, 0, 1, 1], [], []>} : vector<20x16xf32>, vector<16x39xf32>, vector<20x39xf32> -> vector<20x39xf32>
    %c2 = arith.constant 2 : index
    %c0_8 = arith.constant 0 : index
    %c0_9 = arith.constant 0 : index
    %8 = vector.load %arg2[%c2, %c0_8, %c0_9] : memref<4x20x16xf32, #tpu.memory_space<vmem>>, vector<1x20x16xf32>
    %9 = vector.shape_cast %8 : vector<1x20x16xf32> to vector<20x16xf32>
    %cst_10 = arith.constant dense<0.000000e+00> : vector<20x39xf32>
    %10 = tpu.matmul %9, %1, %cst_10 {dimension_numbers = #tpu.dot_dimension_numbers<[1], [0], [0], [1], [0, 0, 1, 1], [], []>} : vector<20x16xf32>, vector<16x39xf32>, vector<20x39xf32> -> vector<20x39xf32>
    %c3 = arith.constant 3 : index
    %c0_11 = arith.constant 0 : index
    %c0_12 = arith.constant 0 : index
    %11 = vector.load %arg2[%c3, %c0_11, %c0_12] : memref<4x20x16xf32, #tpu.memory_space<vmem>>, vector<1x20x16xf32>
    %12 = vector.shape_cast %11 : vector<1x20x16xf32> to vector<20x16xf32>
    %cst_13 = arith.constant dense<0.000000e+00> : vector<20x39xf32>
    %13 = tpu.matmul %12, %1, %cst_13 {dimension_numbers = #tpu.dot_dimension_numbers<[1], [0], [0], [1], [0, 0, 1, 1], [], []>} : vector<20x16xf32>, vector<16x39xf32>, vector<20x39xf32> -> vector<20x39xf32>
    %14 = arith.maximumf %4, %7 : vector<20x39xf32>
    %15 = arith.maximumf %10, %13 : vector<20x39xf32>
    %16 = arith.maximumf %14, %15 : vector<20x39xf32>
    %c0_14 = arith.constant 0 : index
    %c0_15 = arith.constant 0 : index
    %17 = vector.load %arg3[%c0_14, %c0_15] : memref<20x1xf32, #tpu.memory_space<vmem>>, vector<20x1xf32>
    %18 = vector.broadcast %17 : vector<20x1xf32> to vector<20x39xf32>
    %19 = arith.addf %16, %18 : vector<20x39xf32>
    %cst_16 = arith.constant 0.000000e+00 : f32
    %20 = vector.broadcast %cst_16 : f32 to vector<20x39xf32>
    %21 = arith.maximumf %19, %20 : vector<20x39xf32>
    %22 = arith.truncf %21 : vector<20x39xf32> to vector<20x39xbf16>
    %c0_17 = arith.constant 0 : index
    %c0_18 = arith.constant 0 : index
    %23 = vector.load %arg4[%c0_17, %c0_18] : memref<39x1024xbf16, #tpu.memory_space<vmem>>, vector<39x1024xbf16>
    %cst_19 = arith.constant dense<0.000000e+00> : vector<20x1024xf32>
    %24 = tpu.matmul %22, %23, %cst_19 {dimension_numbers = #tpu.dot_dimension_numbers<[1], [0], [0], [1], [0, 0, 1, 1], [], []>} : vector<20x39xbf16>, vector<39x1024xbf16>, vector<20x1024xf32> -> vector<20x1024xf32>
    %c0_20 = arith.constant 0 : index
    %c0_21 = arith.constant 0 : index
    %25 = vector.load %arg5[%c0_20, %c0_21] : memref<1x1024xf32, #tpu.memory_space<vmem>>, vector<1x1024xf32>
    %26 = vector.broadcast %25 : vector<1x1024xf32> to vector<20x1024xf32>
    %27 = arith.addf %24, %26 : vector<20x1024xf32>
    %cst_22 = arith.constant 0.000000e+00 : f32
    %28 = vector.broadcast %cst_22 : f32 to vector<20x1024xf32>
    %29 = arith.maximumf %27, %28 : vector<20x1024xf32>
    %30 = arith.truncf %29 : vector<20x1024xf32> to vector<20x1024xbf16>
    %c0_23 = arith.constant 0 : index
    %c0_24 = arith.constant 0 : index
    %31 = vector.load %arg6[%c0_23, %c0_24] : memref<1024x512xbf16, #tpu.memory_space<vmem>>, vector<1024x512xbf16>
    %cst_25 = arith.constant dense<0.000000e+00> : vector<20x512xf32>
    %32 = tpu.matmul %30, %31, %cst_25 {dimension_numbers = #tpu.dot_dimension_numbers<[1], [0], [0], [1], [0, 0, 1, 1], [], []>} : vector<20x1024xbf16>, vector<1024x512xbf16>, vector<20x512xf32> -> vector<20x512xf32>
    %c0_26 = arith.constant 0 : index
    %c0_27 = arith.constant 0 : index
    %33 = vector.load %arg7[%c0_26, %c0_27] : memref<1x512xf32, #tpu.memory_space<vmem>>, vector<1x512xf32>
    %34 = vector.broadcast %33 : vector<1x512xf32> to vector<20x512xf32>
    %35 = arith.addf %32, %34 : vector<20x512xf32>
    %cst_28 = arith.constant 0.000000e+00 : f32
    %36 = vector.broadcast %cst_28 : f32 to vector<20x512xf32>
    %37 = arith.maximumf %35, %36 : vector<20x512xf32>
    %38 = arith.truncf %37 : vector<20x512xf32> to vector<20x512xbf16>
    %c0_29 = arith.constant 0 : index
    %c0_30 = arith.constant 0 : index
    %39 = vector.load %arg8[%c0_29, %c0_30] : memref<512x256xbf16, #tpu.memory_space<vmem>>, vector<512x256xbf16>
    %cst_31 = arith.constant dense<0.000000e+00> : vector<20x256xf32>
    %40 = tpu.matmul %38, %39, %cst_31 {dimension_numbers = #tpu.dot_dimension_numbers<[1], [0], [0], [1], [0, 0, 1, 1], [], []>} : vector<20x512xbf16>, vector<512x256xbf16>, vector<20x256xf32> -> vector<20x256xf32>
    %c0_32 = arith.constant 0 : index
    %c0_33 = arith.constant 0 : index
    %41 = vector.load %arg9[%c0_32, %c0_33] : memref<1x256xf32, #tpu.memory_space<vmem>>, vector<1x256xf32>
    %42 = vector.broadcast %41 : vector<1x256xf32> to vector<20x256xf32>
    %43 = arith.addf %40, %42 : vector<20x256xf32>
    %cst_34 = arith.constant 0.000000e+00 : f32
    %44 = vector.broadcast %cst_34 : f32 to vector<20x256xf32>
    %45 = arith.maximumf %43, %44 : vector<20x256xf32>
    %46 = arith.truncf %45 : vector<20x256xf32> to vector<20x256xbf16>
    %c0_35 = arith.constant 0 : index
    %c0_36 = arith.constant 0 : index
    %47 = vector.load %arg10[%c0_35, %c0_36] : memref<256x128xbf16, #tpu.memory_space<vmem>>, vector<256x128xbf16>
    %cst_37 = arith.constant dense<0.000000e+00> : vector<20x128xf32>
    %48 = tpu.matmul %46, %47, %cst_37 {dimension_numbers = #tpu.dot_dimension_numbers<[1], [0], [0], [1], [0, 0, 1, 1], [], []>} : vector<20x256xbf16>, vector<256x128xbf16>, vector<20x128xf32> -> vector<20x128xf32>
    %c0_38 = arith.constant 0 : index
    %c0_39 = arith.constant 0 : index
    %49 = vector.load %arg11[%c0_38, %c0_39] : memref<1x128xf32, #tpu.memory_space<vmem>>, vector<1x128xf32>
    %50 = vector.broadcast %49 : vector<1x128xf32> to vector<20x128xf32>
    %51 = arith.addf %48, %50 : vector<20x128xf32>
    %cst_40 = arith.constant 0.000000e+00 : f32
    %52 = vector.broadcast %cst_40 : f32 to vector<20x128xf32>
    %53 = arith.maximumf %51, %52 : vector<20x128xf32>
    %54 = arith.truncf %53 : vector<20x128xf32> to vector<20x128xbf16>
    %c0_41 = arith.constant 0 : index
    %c0_42 = arith.constant 0 : index
    %55 = vector.load %arg12[%c0_41, %c0_42] : memref<128x128xbf16, #tpu.memory_space<vmem>>, vector<128x128xbf16>
    %cst_43 = arith.constant dense<0.000000e+00> : vector<20x128xf32>
    %56 = tpu.matmul %54, %55, %cst_43 {dimension_numbers = #tpu.dot_dimension_numbers<[1], [0], [0], [1], [0, 0, 1, 1], [], []>} : vector<20x128xbf16>, vector<128x128xbf16>, vector<20x128xf32> -> vector<20x128xf32>
    %c0_44 = arith.constant 0 : index
    %c0_45 = arith.constant 0 : index
    %57 = vector.load %arg13[%c0_44, %c0_45] : memref<1x128xf32, #tpu.memory_space<vmem>>, vector<1x128xf32>
    %58 = vector.broadcast %57 : vector<1x128xf32> to vector<20x128xf32>
    %59 = arith.addf %56, %58 : vector<20x128xf32>
    %60 = vector.shape_cast %59 : vector<20x128xf32> to vector<1x20x128xf32>
    %c0_46 = arith.constant 0 : index
    %c0_47 = arith.constant 0 : index
    %c0_48 = arith.constant 0 : index
    %61 = vector.load %arg14[%c0_46, %c0_47, %c0_48] : memref<1x20x128xf32, #tpu.memory_space<vmem>>, vector<1x20x128xf32>
    tpu.vector_store %arg14[%c0_46, %c0_47, %c0_48], %60 {strides = array<i32>} : memref<1x20x128xf32, #tpu.memory_space<vmem>>, vector<1x20x128xf32>,
    return
  }
  func.func @transform_0(%arg0: i32) -> (i32, i32, i32) {
    %c0_i32 = arith.constant 0 : i32
    %c0_i32_0 = arith.constant 0 : i32
    %c0_i32_1 = arith.constant 0 : i32
    return %arg0, %c0_i32, %c0_i32_0 : i32, i32, i32
  }
  func.func @transform_1(%arg0: i32) -> (i32, i32, i32) {
    %c0_i32 = arith.constant 0 : i32
    %c0_i32_0 = arith.constant 0 : i32
    %c0_i32_1 = arith.constant 0 : i32
    %c0_i32_2 = arith.constant 0 : i32
    return %c0_i32, %c0_i32_0, %c0_i32_1 : i32, i32, i32
  }
  func.func @transform_2(%arg0: i32) -> (i32, i32) {
    %c0_i32 = arith.constant 0 : i32
    %c0_i32_0 = arith.constant 0 : i32
    %c0_i32_1 = arith.constant 0 : i32
    return %c0_i32, %c0_i32_0 : i32, i32
  }
  func.func @transform_3(%arg0: i32) -> (i32, i32) {
    %c0_i32 = arith.constant 0 : i32
    %c0_i32_0 = arith.constant 0 : i32
    %c0_i32_1 = arith.constant 0 : i32
    return %c0_i32, %c0_i32_0 : i32, i32
  }
  func.func @transform_4(%arg0: i32) -> (i32, i32) {
    %c0_i32 = arith.constant 0 : i32
    %c0_i32_0 = arith.constant 0 : i32
    %c0_i32_1 = arith.constant 0 : i32
    return %c0_i32, %c0_i32_0 : i32, i32
  }
  func.func @transform_5(%arg0: i32) -> (i32, i32) {
    %c0_i32 = arith.constant 0 : i32
    %c0_i32_0 = arith.constant 0 : i32
    %c0_i32_1 = arith.constant 0 : i32
    return %c0_i32, %c0_i32_0 : i32, i32
  }
  func.func @transform_6(%arg0: i32) -> (i32, i32) {
    %c0_i32 = arith.constant 0 : i32
    %c0_i32_0 = arith.constant 0 : i32
    %c0_i32_1 = arith.constant 0 : i32
    return %c0_i32, %c0_i32_0 : i32, i32
  }
  func.func @transform_7(%arg0: i32) -> (i32, i32) {
    %c0_i32 = arith.constant 0 : i32
    %c0_i32_0 = arith.constant 0 : i32
    %c0_i32_1 = arith.constant 0 : i32
    return %c0_i32, %c0_i32_0 : i32, i32
  }
  func.func @transform_8(%arg0: i32) -> (i32, i32) {
    %c0_i32 = arith.constant 0 : i32
    %c0_i32_0 = arith.constant 0 : i32
    %c0_i32_1 = arith.constant 0 : i32
    return %c0_i32, %c0_i32_0 : i32, i32
  }
  func.func @transform_9(%arg0: i32) -> (i32, i32) {
    %c0_i32 = arith.constant 0 : i32
    %c0_i32_0 = arith.constant 0 : i32
    %c0_i32_1 = arith.constant 0 : i32
    return %c0_i32, %c0_i32_0 : i32, i32
  }
  func.func @transform_10(%arg0: i32) -> (i32, i32) {
    %c0_i32 = arith.constant 0 : i32
    %c0_i32_0 = arith.constant 0 : i32
    %c0_i32_1 = arith.constant 0 : i32
    return %c0_i32, %c0_i32_0 : i32, i32
  }
  func.func @transform_11(%arg0: i32) -> (i32, i32) {
    %c0_i32 = arith.constant 0 : i32
    %c0_i32_0 = arith.constant 0 : i32
    %c0_i32_1 = arith.constant 0 : i32
    return %c0_i32, %c0_i32_0 : i32, i32
  }
  func.func @transform_12(%arg0: i32) -> (i32, i32) {
    %c0_i32 = arith.constant 0 : i32
    %c0_i32_0 = arith.constant 0 : i32
    %c0_i32_1 = arith.constant 0 : i32
    return %c0_i32, %c0_i32_0 : i32, i32
  }
  func.func @transform_13(%arg0: i32) -> (i32, i32, i32) {
    %c0_i32 = arith.constant 0 : i32
    %c0_i32_0 = arith.constant 0 : i32
    %c0_i32_1 = arith.constant 0 : i32
    return %arg0, %c0_i32, %c0_i32_0 : i32, i32, i32
  }
}

</mosaic_0001>

<bundles_post_ra>
// kernel: net_forward.1
= control target key start
LH: loop header
LB: loop body
LE: loop exit
PB: predicated region body
PF: predicated region fallthrough
CT: control target
= control target key end

     0   :  { %s5946_s25 = smov 0   ;;  %s8546_s0 = inlined_call_operand.vmem [shape: f32[6,16,39], index: 0, kind: input, shape index: {}]   ;;  %s8547_s1 = inlined_call_operand.vmem [shape: f32[4,20,16], index: 1, kind: input, shape index: {}]   ;;  %s8548_s2 = inlined_call_operand.vmem [shape: f32[20,1], index: 2, kind: input, shape index: {}]   ;;  %s8549_s3 = inlined_call_operand.vmem [shape: bf16[39,1024], index: 3, kind: input, shape index: {}]   ;;  %s8550_s4 = inlined_call_operand.vmem [shape: f32[1,1024], index: 4, kind: input, shape index: {}]   ;;  %s8551_s5 = inlined_call_operand.vmem [shape: bf16[1024,512], index: 5, kind: input, shape index: {}]   ;;  %s8552_s6 = inlined_call_operand.vmem [shape: f32[1,512], index: 6, kind: input, shape index: {}]   ;;  %s8553_s7 = inlined_call_operand.vmem [shape: bf16[512,256], index: 7, kind: input, shape index: {}]   ;;  %s8554_s8 = inlined_call_operand.vmem [shape: f32[1,256], index: 8, kind: input, shape index: {}]   ;;  %s8555_s9 = inlined_call_operand.vmem [shape: bf16[256,128], index: 9, kind: input, shape index: {}]   ;;  %s8556_s10 = inlined_call_operand.vmem [shape: f32[1,128], index: 10, kind: input, shape index: {}]   ;;  %s8557_s11 = inlined_call_operand.vmem [shape: bf16[128,128], index: 11, kind: input, shape index: {}]   ;;  %s8558_s12 = inlined_call_operand.vmem [shape: f32[1,128], index: 12, kind: input, shape index: {}]   ;;  %s8559_s13 = inlined_call_operand.vmem [shape: f32[6,20,128], index: 13, kind: output, shape index: {}]  }
   0x1 LB: > { %s3995_s26 = sadd.s32 4294967295, %s5872_s25   ;;  %p3999_p0 = scmp.ge.s32.totalorder %s5872_s25, 1  ;;  %s5872_s25 = sphi %s5946_s25, %s23_s25  }
   0x2   : > { %p387_p1 = scmp.lt.s32.totalorder %s5872_s25, 7 }
   0x4   : > { %p388_p2 = pnand %p3999_p0, %p387_p1 }
   0x5   : > { %p431_p3 = scmp.lt.s32.totalorder (!%p388_p2), %s3995_s26, 5 }
   0x6   : > { %391 = sbr.rel (%p388_p2) target bundleno = 1190 (0x4a6), region = 72 }
   0xb   : > { %s8561_s26 = smov (!%p431_p3, %s3995_s26), 5  ;;  %v5874_v0 = vmov 0   ;;  %v611_v1 = vld [vmem:[%s8548_s2 + $0x10] sm:$0xf]  ;;  %v610_v2 = vld [vmem:[%s8548_s2 + $0x8] sm:$0xff]  ;;  %v444_v5 = vld [vmem:[%s8547_s1] sm:$0xff] }
   0xc   : > { %5861 = vset.pattern.permute.xlu0 %v5874_v0  ;;  %5862 = vset.pattern.permute.xlu1 %v5874_v0  ;;  %s5482_s27 = sshll.u32 %s8561_s26, 4  ;;  %vm447_vm0 = vcmask 130048   ;;  %v4014_v6 = vld [vmem:[%s8547_s1 + $0x40] sm:$0xf]  ;;  %v4012_v7 = vld [vmem:[%s8547_s1 + $0x30] sm:$0xff]  ;;  %v445_v10 = vld [vmem:[%s8547_s1 + $0x8] sm:$0xff] }
   0xd   : > { %s435_s17 = scalar_lea.vmem %s8546_s0, %s5482_s27  ;;  %624 = vperm.xlu0 %5861, %v611_v1   ;;  %619 = vperm.xlu1 %5862, %v610_v2   ;;  %v4007_v8 = vld [vmem:[%s8547_s1 + $0x20] sm:$0xff]  ;;  %v4018_v11 = vld [vmem:[%s8547_s1 + $0x48] sm:$0xff]  ;;  %v4013_v12 = vld [vmem:[%s8547_s1 + $0x38] sm:$0xff]  ;;  %vm780_vm1 = vcmask 1042432   ;;  %vm781_vm2 = vcmask 1043456   ;;  %v5875_v20 = vmov 65535  }
   0xe   : > { %v443_v3 = vld [vmem:[%s435_s17 + $0x8] sm:$0xff]  ;;  %v442_v4 = vld [vmem:[%s435_s17] sm:$0xff]  ;;  %v446_v14 = vld [vmem:[%s8547_s1 + $0x10] sm:$0xf]  ;;  %v782_v21 = vsel %vm780_vm1, 4294967295, %v5875_v20  ;;  %vm773_vm3 = vcmask 318464  }
   0xf   : > { %471 = vmatpush.msra.mxu0 %v443_v3  ;;  %5845 = vmatpush.msra.mxu3 %v443_v3  ;;  %v609_v9 = vld [vmem:[%s8548_s2] sm:$0xff]  ;;  %v4008_v13 = vld [vmem:[%s8547_s1 + $0x28] sm:$0xf]  ;;  %v4019_v15 = vld [vmem:[%s8547_s1 + $0x50] sm:$0xff]  ;;  %v6023_v23 = vsel %vm781_vm2, %v782_v21, 0  ;;  %s5850_s14 = smul.u32 24, %s8561_s26 }
  0x10   : > { %549 = vmatpush.msra.mxu2 %v443_v3  ;;  %5843 = vmatpush.msra.mxu1 %v443_v3  ;;  %v4006_v16 = vld [vmem:[%s8547_s1 + $0x18] sm:$0xff]  ;;  %v651_v18 = vld [vmem:[%s8549_s3 + $0x80] sm:$0xff]  ;;  %v652_v22 = vld [vmem:[%s8549_s3 + $0x88] sm:$0xff] }
  0x11   : > { %472 = vmatpush.msra.mxu0 %v442_v4  ;;  %5846 = vmatpush.msra.mxu3 %v442_v4  ;;  %v4020_v17 = vld [vmem:[%s8547_s1 + $0x58] sm:$0xf]  ;;  %v725_v19 = vunpack.c.l.b16 %v651_v18  ;;  %v726_v24 = vunpack.c.h.b16 %v651_v18  ;;  %v727_v25 = vunpack.c.l.b16 %v652_v22  ;;  %v4058_v32 = vld [vmem:[%s8549_s3 + $0x40] sm:$0xf]  ;;  %v5491_v34 = vld [vmem:[%s8549_s3 + $0x44] sm:$0xf]  ;;  %v728_v51 = vunpack.c.h.b16 %v652_v22  ;;  %s440_s19 = scalar_lea.vmem %s8559_s13, %s5850_s14 }
  0x12   : > { %4003 = vmatmul.msk.f32.vlgmr.msra.gmra.mxu0 %vm447_vm0, %v444_v5  ;;  %4017 = vmatmul.msk.f32.vlgmr.msra.gmra.mxu3 %vm447_vm0, %v4014_v6  ;;  %v5495_v33 = vld [vmem:[%s8549_s3 + $0x5c] sm:$0xf0]  ;;  %v4060_v36 = vld [vmem:[%s8549_s3 + $0x60] sm:$0xf0]  ;;  %v4066_v37 = vld [vmem:[%s8549_s3 + $0x48] sm:$0xf] }
  0x13   : > { %588 = vmatpush.msrb.mxu3 %v443_v3  ;;  %550 = vmatpush.msra.mxu2 %v442_v4  ;;  %v749_v26 = vpack.c.b16 %v725_v19, %v725_v19  ;;  %v750_v27 = vpack.c.b16 %v726_v24, %v726_v24  ;;  %v751_v28 = vpack.c.b16 %v727_v25, %v727_v25  ;;  %v5496_v38 = vld [vmem:[%s8549_s3 + $0x64] sm:$0xf0]  ;;  %v4026_v41 = vld [vmem:[%s8549_s3] sm:$0xf]  ;;  %v5483_v43 = vld [vmem:[%s8549_s3 + $0x4] sm:$0xf] }
  0x14   : > { %4015 = vmatmul.msk.f32.vlgmr.msra.gmra.mxu2 %vm447_vm0, %v4012_v7  ;;  %510 = vmatpush.msrb.mxu0 %v443_v3  ;;  %v4059_v35 = vor.u32 %v5495_v33, %v4058_v32  ;;  %v4063_v39 = vor.u32 %v5491_v34, %v4060_v36  ;;  %v4067_v40 = vor.u32 %v5496_v38, %v4066_v37  ;;  %v5487_v42 = vld [vmem:[%s8549_s3 + $0x1c] sm:$0xf0]  ;;  %v4028_v45 = vld [vmem:[%s8549_s3 + $0x20] sm:$0xf0]  ;;  %v4034_v46 = vld [vmem:[%s8549_s3 + $0x8] sm:$0xf] }
  0x15   : > { %589 = vmatpush.msrb.mxu3 %v442_v4  ;;  %5844 = vmatpush.msra.mxu1 %v442_v4  ;;  %v785_v29 = vand.u32 %v6023_v23, %v749_v26  ;;  %v788_v30 = vand.u32 %v6023_v23, %v750_v27  ;;  %v791_v31 = vand.u32 %v6023_v23, %v751_v28  ;;  %v5488_v47 = vld [vmem:[%s8549_s3 + $0x24] sm:$0xf0]  ;;  %v653_v52 = vld [vmem:[%s8549_s3 + $0x90] sm:$0xff]  ;;  %v5492_v62 = vld [vmem:[%s8549_s3 + $0x4c] sm:$0xf] }
  0x16   : > { %4010 = vmatmul.msk.f32.vlgmr.msra.gmra.mxu1 %vm447_vm0, %v4007_v8  ;;  %511 = vmatpush.msrb.mxu0 %v442_v4  ;;  %v4027_v44 = vor.u32 %v5487_v42, %v4026_v41  ;;  %v4031_v48 = vor.u32 %v5483_v43, %v4028_v45  ;;  %v4035_v49 = vor.u32 %v5488_v47, %v4034_v46  ;;  %v729_v53 = vunpack.c.l.b16 %v653_v52  ;;  %v4074_v60 = vld [vmem:[%s8549_s3 + $0x50] sm:$0xf]  ;;  %v4068_v1 = vld [vmem:[%s8549_s3 + $0x68] sm:$0xf0]  ;;  %v4076_v32 = vld [vmem:[%s8549_s3 + $0x70] sm:$0xf0] }
  0x17   : > { %614 = vperm.xlu0 %5861, %v609_v9   ;;  %5847 = vmatpush.bf16.msra.mxu3 %v785_v29  ;;  %v752_v54 = vpack.c.b16 %v728_v51, %v728_v51  ;;  %v5497_v61 = vld [vmem:[%s8549_s3 + $0x6c] sm:$0xf0]  ;;  %v4071_v4 = vor.u32 %v5492_v62, %v4068_v1  ;;  %v4082_v33 = vld [vmem:[%s8549_s3 + $0x58] sm:$0xf]  ;;  %v5485_v37 = vld [vmem:[%s8549_s3 + $0x14] sm:$0xf] }
  0x18   : > { %813 = vmatpush.bf16.msra.mxu0 %v785_v29  ;;  %831 = vmatpush.bf16.msrb.mxu1 %v788_v30  ;;  %v753_v55 = vpack.c.b16 %v729_v53, %v729_v53  ;;  %v4075_v0 = vor.u32 %v5497_v61, %v4074_v60  ;;  %v4042_v2 = vld [vmem:[%s8549_s3 + $0x10] sm:$0xf]  ;;  %v5498_v36 = vld [vmem:[%s8549_s3 + $0x74] sm:$0xf0]  ;;  %v4044_v38 = vld [vmem:[%s8549_s3 + $0x30] sm:$0xf0] }
  0x19   : > { %849 = vmatpush.bf16.msrb.mxu2 %v791_v31  ;;  %v794_v59 = vand.u32 %v6023_v23, %v752_v54  ;;  %v5489_v3 = vld [vmem:[%s8549_s3 + $0x2c] sm:$0xf0]  ;;  %v5493_v31 = vld [vmem:[%s8549_s3 + $0x54] sm:$0xf]  ;;  %v4083_v41 = vor.u32 %v5498_v36, %v4082_v33  ;;  %v4050_v42 = vld [vmem:[%s8549_s3 + $0x18] sm:$0xf]  ;;  %v4047_v46 = vor.u32 %v5485_v37, %v4044_v38 }
  0x1a   : > { %4004 = vmatmul.msk.f32.gmra.mxu0 %vm447_vm0, %v445_v10  ;;  %4021 = vmatmul.msk.f32.vlgmr.msrb.gmra.mxu3 %vm447_vm0, %v4018_v11  ;;  %v797_v57 = vand.u32 %v6023_v23, %v753_v55  ;;  %v4043_v5 = vor.u32 %v5489_v3, %v4042_v2  ;;  %v654_v10 = vld [vmem:[%s8549_s3 + $0x98] sm:$0xff]  ;;  %v4218_v1 = vld [vmem:[%s8551_s5 + $0xe0] sm:$0xf]  ;;  %v5529_v2 = vld [vmem:[%s8551_s5 + $0xec] sm:$0xf0] }
  0x1b   : > { %5848 = vmatpush.bf16.msra.mxu3 %v4059_v35  ;;  %v731_v11 = vunpack.c.l.b16 %v654_v10  ;;  %v5490_v43 = vld [vmem:[%s8549_s3 + $0x34] sm:$0xf0]  ;;  %v5494_v60 = vld [vmem:[%s8549_s3 + $0x5c] sm:$0xf]  ;;  %v4346_v3 = vld [vmem:[%s8551_s5 + $0x1e0] sm:$0xf] }
  0x1c   : > { %4016 = vmatmul.msk.f32.gmra.mxu2 %vm447_vm0, %v4013_v12  ;;  %814 = vmatpush.bf16.msra.mxu0 %v4059_v35  ;;  %v730_v12 = vunpack.c.h.b16 %v653_v52  ;;  %v4079_v35 = vor.u32 %v5493_v31, %v4076_v32  ;;  %v4051_v47 = vor.u32 %v5490_v43, %v4050_v42  ;;  %v4084_v61 = vld [vmem:[%s8549_s3 + $0x78] sm:$0xf0]  ;;  %v5549_v31 = vld [vmem:[%s8551_s5 + $0x18c] sm:$0xf0]  ;;  %v4282_v37 = vld [vmem:[%s8551_s5 + $0x160] sm:$0xf] }
  0x1d   : > { %832 = vmatpush.bf16.msrb.mxu1 %v4063_v39  ;;  %850 = vmatpush.bf16.msrb.mxu2 %v4067_v40  ;;  %v755_v18 = vpack.c.b16 %v731_v11, %v731_v11  ;;  %v4087_v62 = vor.u32 %v5494_v60, %v4084_v61  ;;  %v4474_v11 = vld [vmem:[%s8551_s5 + $0x2e0] sm:$0xf]  ;;  %v5513_v36 = vld [vmem:[%s8551_s5 + $0x6c] sm:$0xf0] }
  0x1e   : > { %4011 = vmatmul.msk.f32.gmra.mxu1 %vm447_vm0, %v4008_v13  ;;  %v754_v19 = vpack.c.b16 %v730_v12, %v730_v12  ;;  %v5581_v42 = vld [vmem:[%s8551_s5 + $0x28c] sm:$0xf0] }
  0x1f   : > { %5849 = vmatpush.bf16.msra.mxu3 %v4027_v44  ;;  %v803_v22 = vand.u32 %v6023_v23, %v755_v18  ;;  %v4458_v18 = vld [vmem:[%s8551_s5 + $0x2c0] sm:$0xf]  ;;  %v5573_v60 = vld [vmem:[%s8551_s5 + $0x24c] sm:$0xf0] }
  0x20   : > { %815 = vmatpush.bf16.msra.mxu0 %v4027_v44  ;;  %v800_v24 = vand.u32 %v6023_v23, %v754_v19  ;;  %v4314_v19 = vld [vmem:[%s8551_s5 + $0x1a0] sm:$0xf] }
  0x21   : > { %833 = vmatpush.bf16.msrb.mxu1 %v4031_v48  ;;  %851 = vmatpush.bf16.msrb.mxu2 %v4035_v49  ;;  %v732_v49 = vunpack.c.h.b16 %v654_v10  ;;  %v5557_v10 = vld [vmem:[%s8551_s5 + $0x1cc] sm:$0xf0] }
  0x22   : > { %4005 = vmatmul.msk.f32.gmra.mxu0 %vm447_vm0, %v446_v14  ;;  %4022 = vmatmul.msk.f32.gmra.mxu3 %vm447_vm0, %v4019_v15  ;;  %v5484_v14 = vld [vmem:[%s8549_s3 + $0xc] sm:$0xf] }
  0x23   : > { %867 = vmatpush.bf16.msrb.mxu3 %v794_v59  ;;  %v4036_v15 = vld [vmem:[%s8549_s3 + $0x28] sm:$0xf0]  ;;  %v756_v55 = vpack.c.b16 %v732_v49, %v732_v49 }
  0x25   : > { %921 = vmatpush.bf16.msra.mxu2 %v803_v22  ;;  %903 = vmatpush.bf16.msra.mxu1 %v800_v24 }
  0x27   : > { %868 = vmatpush.bf16.msrb.mxu3 %v4071_v4  ;;  %v4219_v4 = vor.u32 %v5529_v2, %v4218_v1  ;;  %v5501_v1 = vld [vmem:[%s8551_s5 + $0xc] sm:$0xf0]  ;;  %v4234_v2 = vld [vmem:[%s8551_s5 + $0x100] sm:$0xf] }
  0x29   : > { %904 = vmatpush.bf16.msra.mxu1 %v4079_v35  ;;  %922 = vmatpush.bf16.msra.mxu2 %v4083_v41  ;;  %v4154_v35 = vld [vmem:[%s8551_s5 + $0x60] sm:$0xf] }
  0x2a   : > { %4009 = vmatmul.msk.f32.vlgmr.msrb.gmra.mxu0 %vm447_vm0, %v4006_v16  ;;  %4023 = vmatmul.msk.f32.gmra.mxu3 %vm447_vm0, %v4020_v17  ;;  %v4039_v17 = vor.u32 %v5484_v14, %v4036_v15  ;;  %v4155_v38 = vor.u32 %v5513_v36, %v4154_v35  ;;  %v4426_v41 = vld [vmem:[%s8551_s5 + $0x280] sm:$0xf]  ;;  %v5613_v35 = vld [vmem:[%s8551_s5 + $0x38c] sm:$0xf0] }
  0x2b   : > { %885 = vmatpush.bf16.msrb.mxu0 %v797_v57  ;;  %v4427_v43 = vor.u32 %v5581_v42, %v4426_v41  ;;  %v4698_v36 = vld [vmem:[%s8551_s5 + $0x4a0] sm:$0xf] }
  0x2c   : > { %869 = vmatpush.bf16.msrb.mxu3 %v4039_v17  ;;  %v5521_v17 = vld [vmem:[%s8551_s5 + $0xac] sm:$0xf0] }
  0x2d   : > { %905 = vmatpush.bf16.msra.mxu1 %v4047_v46  ;;  %923 = vmatpush.bf16.msra.mxu2 %v4051_v47  ;;  %v4266_v46 = vld [vmem:[%s8551_s5 + $0x140] sm:$0xf] }
  0x2f   : > { %886 = vmatpush.bf16.msrb.mxu0 %v4075_v0 }
  0x33   : > { %887 = vmatpush.bf16.msrb.mxu0 %v4043_v5  ;;  %v5561_v5 = vld [vmem:[%s8551_s5 + $0x1ec] sm:$0xf0] }
  0x7f   : > { %v625_v9 = vpop.permute.xlu0 %624  ;;  %v620_v26 = vpop.permute.xlu1 %619 }
  0x89   : > { %v615_v34 = vpop.permute.xlu0 %614 }
  0x8f   : > { %v6064_v50 = vpop.f32.mrf.mxu0 }
  0x93   : > { %v516_v7 = vpop.f32.mrf.mxu1 }
  0x95   : > { %v6069_v56 = vpop.f32.mrf.mxu3 }
  0x97   : > { %v477_v58 = vpop.f32.mrf.mxu0  ;;  %v552_v63 = vpop.f32.mrf.mxu2 }
  0x98   : > { %v601_v16 = vmax.f32 %v477_v58, %v516_v7  ;;  %v5525_v7 = vld [vmem:[%s8551_s5 + $0xcc] sm:$0xf0] }
  0x9b   : > { %v519_v30 = vpop.f32.mrf.mxu1 }
  0x9d   : > { %v591_v6 = vpop.f32.mrf.mxu3 }
  0x9e   : > { %v603_v27 = vmax.f32 %v552_v63, %v591_v6  ;;  %v5486_v63 = vld [vmem:[%s8549_s3 + $0x1c] sm:$0xf]  ;;  %v4202_v6 = vld [vmem:[%s8551_s5 + $0xc0] sm:$0xf] }
  0x9f   : > { %v480_v8 = vpop.f32.mrf.mxu0  ;;  %v555_v13 = vpop.f32.mrf.mxu2  ;;  %v4203_v12 = vor.u32 %v5525_v7, %v4202_v6  ;;  %v4378_v6 = vld [vmem:[%s8551_s5 + $0x220] sm:$0xf]  ;;  %v5569_v7 = vld [vmem:[%s8551_s5 + $0x22c] sm:$0xf0] }
  0xa0   : > { %v602_v44 = vmax.f32 %v480_v8, %v519_v30  ;;  %v4347_v8 = vor.u32 %v5561_v5, %v4346_v3  ;;  %v4298_v30 = vld [vmem:[%s8551_s5 + $0x180] sm:$0xf]  ;;  %v5533_v3 = vld [vmem:[%s8551_s5 + $0x10c] sm:$0xf0] }
  0xa1   : > { %v4235_v5 = vor.u32 %v5533_v3, %v4234_v2 }
  0xa5   : > { %v594_v20 = vpop.f32.mrf.mxu3 }
  0xa6   : > { %v604_v21 = vmax.f32 %v555_v13, %v594_v20  ;;  %v5593_v13 = vld [vmem:[%s8551_s5 + $0x2ec] sm:$0xf0] }
  0xa7   : > { %v513_v25 = vpop.f32.mrf.mxu0  ;;  %v4475_v15 = vor.u32 %v5593_v13, %v4474_v11  ;;  %v5553_v20 = vld [vmem:[%s8551_s5 + $0x1ac] sm:$0xf0]  ;;  %v4730_v11 = vld [vmem:[%s8551_s5 + $0x4e0] sm:$0xf] }
  0xa8   : > { %v600_v28 = vmax.f32 %v6064_v50, %v513_v25  ;;  %v607_v29 = vmax.f32 %v601_v16, %v604_v21  ;;  %v4186_v16 = vld [vmem:[%s8551_s5 + $0xa0] sm:$0xf]  ;;  %v5589_v21 = vld [vmem:[%s8551_s5 + $0x2cc] sm:$0xf0] }
  0xa9   : > { %v4459_v22 = vor.u32 %v5589_v21, %v4458_v18  ;;  %v4187_v24 = vor.u32 %v5521_v17, %v4186_v16  ;;  %v4442_v25 = vld [vmem:[%s8551_s5 + $0x2a0] sm:$0xf]  ;;  %v5657_v13 = vld [vmem:[%s8551_s5 + $0x4ec] sm:$0xf0] }
  0xaa   : > { %v628_v39 = vadd.f32 %v620_v26, %v607_v29  ;;  %v606_v40 = vmax.f32 %v600_v28, %v603_v27  ;;  %v5585_v26 = vld [vmem:[%s8551_s5 + $0x2ac] sm:$0xf0]  ;;  %v4315_v27 = vor.u32 %v5553_v20, %v4314_v19  ;;  %v4170_v28 = vld [vmem:[%s8551_s5 + $0x80] sm:$0xf]  ;;  %v4731_v16 = vor.u32 %v5657_v13, %v4730_v11 }
  0xab   : > { %v5517_v29 = vld [vmem:[%s8551_s5 + $0x8c] sm:$0xf0]  ;;  %v4443_v32 = vor.u32 %v5585_v26, %v4442_v25  ;;  %v4362_v18 = vld [vmem:[%s8551_s5 + $0x200] sm:$0xf] }
  0xac   : > { %v627_v45 = vadd.f32 %v615_v34, %v606_v40  ;;  %v631_v50 = vmax.f32 %v628_v39, 0.0  ;;  %v4171_v33 = vor.u32 %v5517_v29, %v4170_v28  ;;  %v4299_v34 = vor.u32 %v5549_v31, %v4298_v30  ;;  %v5545_v39 = vld [vmem:[%s8551_s5 + $0x16c] sm:$0xf0]  ;;  %v4570_v21 = vld [vmem:[%s8551_s5 + $0x3a0] sm:$0xf] }
  0xad   : > { %v597_v48 = vpop.f32.mrf.mxu3  ;;  %v4283_v40 = vor.u32 %v5545_v39, %v4282_v37  ;;  %v5565_v19 = vld [vmem:[%s8551_s5 + $0x20c] sm:$0xf0]  ;;  %v4986_v31 = vld [vmem:[%s8551_s5 + $0x6e0] sm:$0xf] }
  0xae   : > { %v630_v51 = vmax.f32 %v627_v45, 0.0  ;;  %v605_v52 = vmax.f32 %v6069_v56, %v597_v48  ;;  %v806_v56 = vand.u32 %v6023_v23, %v756_v55  ;;  %v4052_v23 = vld [vmem:[%s8549_s3 + $0x38] sm:$0xf0]  ;;  %v5509_v45 = vld [vmem:[%s8551_s5 + $0x4c] sm:$0xf0]  ;;  %v4363_v20 = vor.u32 %v5565_v19, %v4362_v18 }
  0xaf   : > { %v4055_v0 = vor.u32 %v5486_v63, %v4052_v23  ;;  %v5541_v48 = vld [vmem:[%s8551_s5 + $0x14c] sm:$0xf0]  ;;  %v4250_v55 = vld [vmem:[%s8551_s5 + $0x120] sm:$0xf] }
  0xb0   : > { %v6128_v53 = vpack.c.bf16 %v631_v50, %v630_v51  ;;  %v608_v54 = vmax.f32 %v602_v44, %v605_v52  ;;  %v4138_v44 = vld [vmem:[%s8551_s5 + $0x40] sm:$0xf]  ;;  %v4267_v49 = vor.u32 %v5541_v48, %v4266_v46  ;;  %v5577_v51 = vld [vmem:[%s8551_s5 + $0x26c] sm:$0xf0] }
  0xb1   : > { %v4139_v47 = vor.u32 %v5509_v45, %v4138_v44  ;;  %v4410_v50 = vld [vmem:[%s8551_s5 + $0x260] sm:$0xf]  ;;  %v5625_v63 = vld [vmem:[%s8551_s5 + $0x3ec] sm:$0xf0] }
  0xb2   : > { %v629_v57 = vadd.f32 %v625_v9, %v608_v54  ;;  %4088 = vmatmul.msk.bf16.vlgmr.msra.gmra.mxu0 %vm773_vm3, %v6128_v53  ;;  %4090 = vmatmul.msk.bf16.vlgmr.msrb.gmra.mxu1 %vm773_vm3, %v6128_v53  ;;  %v4330_v9 = vld [vmem:[%s8551_s5 + $0x1c0] sm:$0xf]  ;;  %v4411_v52 = vor.u32 %v5577_v51, %v4410_v50  ;;  %v5505_v54 = vld [vmem:[%s8551_s5 + $0x2c] sm:$0xf0] }
  0xb3   : > { %4092 = vmatmul.msk.bf16.vlgmr.msrb.gmra.mxu2 %vm773_vm3, %v6128_v53  ;;  %2538 = vmatpush.bf16.msra.mxu0 %v4219_v4  ;;  %v4331_v14 = vor.u32 %v5557_v10, %v4330_v9  ;;  %v4106_v23 = vld [vmem:[%s8551_s5] sm:$0xf]  ;;  %v5621_v10 = vld [vmem:[%s8551_s5 + $0x3cc] sm:$0xf0] }
  0xb4   : > { %v632_v58 = vmax.f32 %v629_v57, 0.0  ;;  %2556 = vmatpush.bf16.msrb.mxu1 %v4347_v8  ;;  %2574 = vmatpush.bf16.msrb.mxu2 %v4475_v15  ;;  %v4107_v4 = vor.u32 %v5501_v1, %v4106_v23  ;;  %v4379_v8 = vor.u32 %v5569_v7, %v4378_v6  ;;  %v4586_v9 = vld [vmem:[%s8551_s5 + $0x3c0] sm:$0xf]  ;;  %v5689_v15 = vld [vmem:[%s8551_s5 + $0x5ec] sm:$0xf0] }
  0xb5   : > { %v5653_v26 = vld [vmem:[%s8551_s5 + $0x4cc] sm:$0xf0]  ;;  %v4826_v39 = vld [vmem:[%s8551_s5 + $0x5a0] sm:$0xf] }
  0xb6   : > { %v6137_v59 = vpack.c.bf16 %v632_v58, %v632_v58  ;;  %v5537_v58 = vld [vmem:[%s8551_s5 + $0x12c] sm:$0xf0]  ;;  %v4538_v46 = vld [vmem:[%s8551_s5 + $0x360] sm:$0xf] }
  0xb7   : > { %2539 = vmatpush.bf16.msra.mxu0 %v4203_v12  ;;  %v4587_v12 = vor.u32 %v5621_v10, %v4586_v9  ;;  %v5685_v28 = vld [vmem:[%s8551_s5 + $0x5cc] sm:$0xf0]  ;;  %v4682_v48 = vld [vmem:[%s8551_s5 + $0x480] sm:$0xf] }
  0xb8   : > { %4089 = vmatmul.msk.bf16.vlgmr.msra.gmra.mxu3 %vm773_vm3, %v6137_v59  ;;  %2557 = vmatpush.bf16.msrb.mxu1 %v4331_v14  ;;  %v4858_v14 = vld [vmem:[%s8551_s5 + $0x5e0] sm:$0xf]  ;;  %v5717_v44 = vld [vmem:[%s8551_s5 + $0x6cc] sm:$0xf0] }
  0xb9   : > { %939 = vmatpush.bf16.msra.mxu3 %v806_v56  ;;  %2575 = vmatpush.bf16.msrb.mxu2 %v4459_v22  ;;  %v4251_v56 = vor.u32 %v5537_v58, %v4250_v55  ;;  %v4859_v17 = vor.u32 %v5689_v15, %v4858_v14  ;;  %v5617_v22 = vld [vmem:[%s8551_s5 + $0x3ac] sm:$0xf0]  ;;  %v4810_v51 = vld [vmem:[%s8551_s5 + $0x580] sm:$0xf] }
  0xba   : > { %v4571_v25 = vor.u32 %v5617_v22, %v4570_v21  ;;  %v5645_v50 = vld [vmem:[%s8551_s5 + $0x48c] sm:$0xf0]  ;;  %v4954_v55 = vld [vmem:[%s8551_s5 + $0x6a0] sm:$0xf] }
  0xbb   : > { %2540 = vmatpush.bf16.msra.mxu0 %v4187_v24  ;;  %v4714_v24 = vld [vmem:[%s8551_s5 + $0x4c0] sm:$0xf]  ;;  %v5709_v6 = vld [vmem:[%s8551_s5 + $0x68c] sm:$0xf0] }
  0xbc   : > { %2558 = vmatpush.bf16.msrb.mxu1 %v4315_v27  ;;  %v4842_v27 = vld [vmem:[%s8551_s5 + $0x5c0] sm:$0xf]  ;;  %v4715_v29 = vor.u32 %v5653_v26, %v4714_v24  ;;  %v5601_v11 = vld [vmem:[%s8551_s5 + $0x32c] sm:$0xf0] }
  0xbd   : > { %940 = vmatpush.bf16.msra.mxu3 %v4087_v62  ;;  %2576 = vmatpush.bf16.msrb.mxu2 %v4443_v32  ;;  %v4602_v62 = vld [vmem:[%s8551_s5 + $0x3e0] sm:$0xf]  ;;  %v4843_v30 = vor.u32 %v5685_v28, %v4842_v27  ;;  %v5721_v32 = vld [vmem:[%s8551_s5 + $0x6ec] sm:$0xf0] }
  0xbe   : > { %v6420_v58 = vld [vmem:[%s8550_s4] sm:$0xff]  ;;  %v5637_v14 = vld [vmem:[%s8551_s5 + $0x44c] sm:$0xf0] }
  0xbf   : > { %2541 = vmatpush.bf16.msra.mxu0 %v4171_v33  ;;  %v4987_v33 = vor.u32 %v5721_v32, %v4986_v31  ;;  %v4794_v23 = vld [vmem:[%s8551_s5 + $0x560] sm:$0xf]  ;;  %v6447_v7 = vperm.slane %v6420_v58, 0  ;;  %v5705_v19 = vld [vmem:[%s8551_s5 + $0x66c] sm:$0xf0] }
  0xc0   : > { %2559 = vmatpush.bf16.msrb.mxu1 %v4299_v34  ;;  %v4554_v34 = vld [vmem:[%s8551_s5 + $0x380] sm:$0xf]  ;;  %v5597_v27 = vld [vmem:[%s8551_s5 + $0x30c] sm:$0xf0] }
  0xc1   : > { %941 = vmatpush.bf16.msra.mxu3 %v4055_v0  ;;  %2577 = vmatpush.bf16.msrb.mxu2 %v4427_v43  ;;  %v4603_v0 = vor.u32 %v5625_v63, %v4602_v62  ;;  %v4555_v37 = vor.u32 %v5613_v35, %v4554_v34  ;;  %v4970_v43 = vld [vmem:[%s8551_s5 + $0x6c0] sm:$0xf]  ;;  %v5641_v63 = vld [vmem:[%s8551_s5 + $0x46c] sm:$0xf0] }
  0xc2   : > { %4091 = vmatmul.msk.bf16.gmra.mxu1 %vm773_vm3, %v6137_v59  ;;  %4096 = vmatmul.msk.bf16.vlgmr.msrb.gmra.mxu0 %vm773_vm3, %v6128_v53  ;;  %v4971_v45 = vor.u32 %v5717_v44, %v4970_v43  ;;  %v4506_v10 = vld [vmem:[%s8551_s5 + $0x320] sm:$0xf]  ;;  %v5633_v31 = vld [vmem:[%s8551_s5 + $0x42c] sm:$0xf0] }
  0xc3   : > { %4093 = vmatmul.msk.bf16.gmra.mxu2 %vm773_vm3, %v6137_v59  ;;  %2542 = vmatpush.bf16.msra.mxu0 %v4155_v38  ;;  %v5649_v38 = vld [vmem:[%s8551_s5 + $0x4ac] sm:$0xf0]  ;;  %v4507_v13 = vor.u32 %v5601_v11, %v4506_v10  ;;  %v4778_v15 = vld [vmem:[%s8551_s5 + $0x540] sm:$0xf] }
  0xc4   : > { %2560 = vmatpush.bf16.msrb.mxu1 %v4283_v40  ;;  %v5681_v40 = vld [vmem:[%s8551_s5 + $0x5ac] sm:$0xf0]  ;;  %v4699_v41 = vor.u32 %v5649_v38, %v4698_v36  ;;  %v4922_v18 = vld [vmem:[%s8551_s5 + $0x660] sm:$0xf] }
  0xc5   : > { %2578 = vmatpush.bf16.msrb.mxu2 %v4411_v52  ;;  %v4827_v42 = vor.u32 %v5681_v40, %v4826_v39  ;;  %v5677_v52 = vld [vmem:[%s8551_s5 + $0x58c] sm:$0xf0]  ;;  %v4923_v21 = vor.u32 %v5705_v19, %v4922_v18  ;;  %v4490_v26 = vld [vmem:[%s8551_s5 + $0x300] sm:$0xf] }
  0xc6   : > { %v4762_v32 = vld [vmem:[%s8551_s5 + $0x520] sm:$0xf]  ;;  %v5665_v36 = vld [vmem:[%s8551_s5 + $0x52c] sm:$0xf0] }
  0xc7   : > { %2543 = vmatpush.bf16.msra.mxu0 %v4139_v47  ;;  %v5609_v47 = vld [vmem:[%s8551_s5 + $0x36c] sm:$0xf0]  ;;  %v5082_v19 = vld [vmem:[%s8551_s5 + $0x7a0] sm:$0xf] }
  0xc8   : > { %4094 = vmatmul.msk.bf16.vlgmr.msrb.gmra.mxu3 %vm773_vm3, %v6128_v53  ;;  %2561 = vmatpush.bf16.msrb.mxu1 %v4267_v49  ;;  %v4539_v49 = vor.u32 %v5609_v47, %v4538_v46  ;;  %v5701_v38 = vld [vmem:[%s8551_s5 + $0x64c] sm:$0xf0] }
  0xc9   : > { %2592 = vmatpush.bf16.msrb.mxu3 %v4603_v0  ;;  %v5673_v0 = vld [vmem:[%s8551_s5 + $0x56c] sm:$0xf0] }
  0xca   : > { %v5753_v46 = vld [vmem:[%s8551_s5 + $0x7ec] sm:$0xf0] }
  0xcc   : > { %2562 = vmatpush.bf16.msrb.mxu1 %v4251_v56 }
  0xcd   : > { %2593 = vmatpush.bf16.msrb.mxu3 %v4587_v12  ;;  %v4650_v12 = vld [vmem:[%s8551_s5 + $0x440] sm:$0xf] }
  0xd0   : > { %2563 = vmatpush.bf16.msrb.mxu1 %v4235_v5  ;;  %v4938_v5 = vld [vmem:[%s8551_s5 + $0x680] sm:$0xf] }
  0xd1   : > { %2594 = vmatpush.bf16.msrb.mxu3 %v4571_v25  ;;  %v4939_v9 = vor.u32 %v5709_v6, %v4938_v5  ;;  %v6479_v25 = vperm.slane %v6420_v58, 2  ;;  %v5559_v5 = vld [vmem:[%s8551_s5 + $0x1e4] sm:$0xf] }
  0xd2   : > { %4097 = vmatmul.msk.bf16.gmra.mxu0 %vm773_vm3, %v6137_v59  ;;  %4098 = vmatmul.msk.bf16.vlgmr.msra.gmra.mxu1 %vm773_vm3, %v6128_v53 }
  0xd3   : > { %4100 = vmatmul.msk.bf16.vlgmr.msra.gmra.mxu2 %vm773_vm3, %v6128_v53 }
  0xd4   : > { %2628 = vmatpush.bf16.msra.mxu1 %v4859_v17  ;;  %v5669_v17 = vld [vmem:[%s8551_s5 + $0x54c] sm:$0xf0] }
  0xd5   : > { %2595 = vmatpush.bf16.msrb.mxu3 %v4555_v37  ;;  %v4906_v37 = vld [vmem:[%s8551_s5 + $0x640] sm:$0xf] }
  0xd8   : > { %4095 = vmatmul.msk.bf16.gmra.mxu3 %vm773_vm3, %v6137_v59  ;;  %2629 = vmatpush.bf16.msra.mxu1 %v4843_v30  ;;  %v4634_v30 = vld [vmem:[%s8551_s5 + $0x420] sm:$0xf] }
  0xd9   : > { %2596 = vmatpush.bf16.msrb.mxu3 %v4539_v49  ;;  %v4635_v35 = vor.u32 %v5633_v31, %v4634_v30  ;;  %v4332_v30 = vld [vmem:[%s8551_s5 + $0x1d0] sm:$0xf0]  ;;  %v5591_v31 = vld [vmem:[%s8551_s5 + $0x2e4] sm:$0xf] }
  0xdc   : > { %2630 = vmatpush.bf16.msra.mxu1 %v4827_v42  ;;  %v4907_v42 = vor.u32 %v5701_v38, %v4906_v37  ;;  %v5066_v37 = vld [vmem:[%s8551_s5 + $0x780] sm:$0xf] }
  0xe2   : > { %4099 = vmatmul.msk.bf16.gmra.mxu1 %vm773_vm3, %v6137_v59 }
  0xe3   : > { %4101 = vmatmul.msk.bf16.gmra.mxu2 %vm773_vm3, %v6137_v59 }
  0xe8   : > { %4102 = vmatmul.msk.bf16.vlgmr.msra.gmra.mxu3 %vm773_vm3, %v6128_v53  ;;  %v4122_v53 = vld [vmem:[%s8551_s5 + $0x20] sm:$0xf] }
  0xe9   : > { %v4123_v57 = vor.u32 %v5505_v54, %v4122_v53  ;;  %v4683_v53 = vor.u32 %v5645_v50, %v4682_v48  ;;  %v4811_v54 = vor.u32 %v5677_v52, %v4810_v51  ;;  %v4618_v50 = vld [vmem:[%s8551_s5 + $0x400] sm:$0xf]  ;;  %v5629_v51 = vld [vmem:[%s8551_s5 + $0x40c] sm:$0xf0] }
  0xeb   : > { %2544 = vmatpush.bf16.msra.mxu0 %v4123_v57  ;;  %v5713_v57 = vld [vmem:[%s8551_s5 + $0x6ac] sm:$0xf0]  ;;  %2631 = vmatpush.bf16.msra.mxu1 %v4811_v54  ;;  %v4746_v54 = vld [vmem:[%s8551_s5 + $0x500] sm:$0xf] }
  0xec   : > { %v4955_v56 = vor.u32 %v5713_v57, %v4954_v55  ;;  %v5661_v55 = vld [vmem:[%s8551_s5 + $0x50c] sm:$0xf0]  ;;  %v4890_v57 = vld [vmem:[%s8551_s5 + $0x620] sm:$0xf] }
  0xef   : > { %2545 = vmatpush.bf16.msra.mxu0 %v4107_v4  ;;  %v4795_v4 = vor.u32 %v5673_v0, %v4794_v23  ;;  %v5098_v23 = vld [vmem:[%s8551_s5 + $0x7c0] sm:$0xf]  ;;  %v5749_v0 = vld [vmem:[%s8551_s5 + $0x7cc] sm:$0xf0] }
  0xf1   : > { %2632 = vmatpush.bf16.msra.mxu1 %v4795_v4  ;;  %v4220_v4 = vld [vmem:[%s8551_s5 + $0xf0] sm:$0xf0] }
  0xf3   : > { %2610 = vmatpush.bf16.msrb.mxu0 %v4731_v16  ;;  %v4651_v16 = vor.u32 %v5637_v14, %v4650_v12  ;;  %v4348_v12 = vld [vmem:[%s8551_s5 + $0x1f0] sm:$0xf0]  ;;  %v5693_v14 = vld [vmem:[%s8551_s5 + $0x60c] sm:$0xf0] }
  0xf7   : > { %2611 = vmatpush.bf16.msrb.mxu0 %v4715_v29  ;;  %v4491_v29 = vor.u32 %v5597_v27, %v4490_v26 }
  0xf8   : > { %4103 = vmatmul.msk.bf16.gmra.mxu3 %vm773_vm3, %v6137_v59  ;;  %v4394_v59 = vld [vmem:[%s8551_s5 + $0x240] sm:$0xf] }
  0xf9   : > { %v4395_v61 = vor.u32 %v5573_v60, %v4394_v59  ;;  %v4522_v59 = vld [vmem:[%s8551_s5 + $0x340] sm:$0xf]  ;;  %v5605_v60 = vld [vmem:[%s8551_s5 + $0x34c] sm:$0xf0] }
  0xfa   : > { %v4523_v62 = vor.u32 %v5605_v60, %v4522_v59  ;;  %v4747_v60 = vor.u32 %v5661_v55, %v4746_v54 }
  0xfb   : > { %2579 = vmatpush.bf16.msrb.mxu2 %v4395_v61  ;;  %2612 = vmatpush.bf16.msrb.mxu0 %v4699_v41  ;;  %v4666_v61 = vld [vmem:[%s8551_s5 + $0x460] sm:$0xf]  ;;  %v4763_v41 = vor.u32 %v5665_v36, %v4762_v32 }
  0xfc   : > { %v4667_v3 = vor.u32 %v5641_v63, %v4666_v61  ;;  %2597 = vmatpush.bf16.msrb.mxu3 %v4523_v62  ;;  %v5697_v61 = vld [vmem:[%s8551_s5 + $0x62c] sm:$0xf0] }
  0xfd   : > { %v4891_v63 = vor.u32 %v5697_v61, %v4890_v57  ;;  %v5515_v57 = vld [vmem:[%s8551_s5 + $0x84] sm:$0xf] }
  0xff   : > { %2580 = vmatpush.bf16.msrb.mxu2 %v4379_v8  ;;  %2613 = vmatpush.bf16.msrb.mxu0 %v4683_v53  ;;  %v6450_v8 = vperm.slane %v6420_v58, 1  ;;  %v4619_v53 = vor.u32 %v5629_v51, %v4618_v50 }
 0x100   : > { %2598 = vmatpush.bf16.msrb.mxu3 %v4507_v13  ;;  %v4874_v13 = vld [vmem:[%s8551_s5 + $0x600] sm:$0xf] }
 0x101   : > { %v4875_v18 = vor.u32 %v5693_v14, %v4874_v13  ;;  %v6660_v13 = vperm.slane %v6420_v58, 3 }
 0x103   : > { %2581 = vmatpush.bf16.msrb.mxu2 %v4363_v20  ;;  %2614 = vmatpush.bf16.msrb.mxu0 %v4667_v3  ;;  %v4779_v20 = vor.u32 %v5669_v17, %v4778_v15  ;;  %v5099_v3 = vor.u32 %v5749_v0, %v5098_v23  ;;  %v4351_v15 = vor.u32 %v5559_v5, %v4348_v12 }
 0x104   : > { %2599 = vmatpush.bf16.msrb.mxu3 %v4491_v29  ;;  %v5555_v29 = vld [vmem:[%s8551_s5 + $0x1c4] sm:$0xf] }
 0x105   : > { %2633 = vmatpush.bf16.msra.mxu1 %v4779_v20  ;;  %v5745_v20 = vld [vmem:[%s8551_s5 + $0x7ac] sm:$0xf0] }
 0x107   : > { %2646 = vmatpush.bf16.msra.mxu2 %v4987_v33  ;;  %2615 = vmatpush.bf16.msrb.mxu0 %v4651_v16 }
 0x109   : > { %2634 = vmatpush.bf16.msra.mxu1 %v4763_v41  ;;  %v5551_v41 = vld [vmem:[%s8551_s5 + $0x1a4] sm:$0xf] }
 0x10b   : > { %2647 = vmatpush.bf16.msra.mxu2 %v4971_v45  ;;  %2616 = vmatpush.bf16.msrb.mxu0 %v4635_v35  ;;  %v5114_v45 = vld [vmem:[%s8551_s5 + $0x7e0] sm:$0xf]  ;;  %v4476_v35 = vld [vmem:[%s8551_s5 + $0x2f0] sm:$0xf0] }
 0x10c   : > { %v5115_v49 = vor.u32 %v5753_v46, %v5114_v45  ;;  %v4479_v36 = vor.u32 %v5591_v31, %v4476_v35  ;;  %v5729_v31 = vld [vmem:[%s8551_s5 + $0x72c] sm:$0xf0]  ;;  %v5539_v35 = vld [vmem:[%s8551_s5 + $0x144] sm:$0xf] }
 0x10d   : > { %2635 = vmatpush.bf16.msra.mxu1 %v4747_v60  ;;  %v4172_v60 = vld [vmem:[%s8551_s5 + $0x90] sm:$0xf0] }
 0x10e   : > { %2664 = vmatpush.bf16.msra.mxu3 %v5115_v49 }
 0x10f   : > { %2648 = vmatpush.bf16.msra.mxu2 %v4955_v56  ;;  %2617 = vmatpush.bf16.msrb.mxu0 %v4619_v53  ;;  %v5737_v53 = vld [vmem:[%s8551_s5 + $0x76c] sm:$0xf0] }
 0x112   : > { %2665 = vmatpush.bf16.msra.mxu3 %v5099_v3  ;;  %v5583_v3 = vld [vmem:[%s8551_s5 + $0x2a4] sm:$0xf] }
 0x113   : > { %2649 = vmatpush.bf16.msra.mxu2 %v4939_v9 }
 0x117   : > { %2650 = vmatpush.bf16.msra.mxu2 %v4923_v21  ;;  %v5083_v21 = vor.u32 %v5745_v20, %v5082_v19 }
 0x119   : > { %2666 = vmatpush.bf16.msra.mxu3 %v5083_v21  ;;  %v4284_v21 = vld [vmem:[%s8551_s5 + $0x170] sm:$0xf0] }
 0x11b   : > { %2651 = vmatpush.bf16.msra.mxu2 %v4907_v42  ;;  %v4316_v42 = vld [vmem:[%s8551_s5 + $0x1b0] sm:$0xf0] }
 0x11c   : > { %v4319_v46 = vor.u32 %v5551_v41, %v4316_v42  ;;  %v5575_v41 = vld [vmem:[%s8551_s5 + $0x264] sm:$0xf]  ;;  %v4412_v42 = vld [vmem:[%s8551_s5 + $0x270] sm:$0xf0] }
 0x11f   : > { %2652 = vmatpush.bf16.msra.mxu2 %v4891_v63  ;;  %v5547_v63 = vld [vmem:[%s8551_s5 + $0x184] sm:$0xf] }
 0x123   : > { %2653 = vmatpush.bf16.msra.mxu2 %v4875_v18 }
 0x12f   : > { %v817_v1 = vpop.f32.mrf.mxu0  ;;  %v835_v2 = vpop.f32.mrf.mxu1 }
 0x130   : > { %v818_v22 = vadd.f32 %v817_v1, %v6447_v7  ;;  %v836_v24 = vadd.f32 %v835_v2, %v6450_v8  ;;  %v5527_v1 = vld [vmem:[%s8551_s5 + $0xe4] sm:$0xf] }
 0x131   : > { %v4223_v11 = vor.u32 %v5527_v1, %v4220_v4  ;;  %v6642_v1 = vperm.slane %v6420_v58, 4  ;;  %v4444_v4 = vld [vmem:[%s8551_s5 + $0x2b0] sm:$0xf0] }
 0x132   : > { %v952_v43 = vmax.f32 %v818_v22, 0.0  ;;  %v953_v44 = vmax.f32 %v836_v24, 0.0  ;;  %v5523_v22 = vld [vmem:[%s8551_s5 + $0xc4] sm:$0xf]  ;;  %v4204_v24 = vld [vmem:[%s8551_s5 + $0xd0] sm:$0xf0]  ;;  %v4447_v5 = vor.u32 %v5583_v3, %v4444_v4 }
 0x136   : > { %v853_v28 = vpop.f32.mrf.mxu2 }
 0x137   : > { %v819_v33 = vpop.f32.mrf.mxu0  ;;  %v837_v34 = vpop.f32.mrf.mxu1  ;;  %v854_v62 = vadd.f32 %v853_v28, %v6479_v25  ;;  %v4207_v28 = vor.u32 %v5523_v22, %v4204_v24  ;;  %v5579_v22 = vld [vmem:[%s8551_s5 + $0x284] sm:$0xf]  ;;  %v4428_v24 = vld [vmem:[%s8551_s5 + $0x290] sm:$0xf0] }
 0x138   : > { %v820_v39 = vadd.f32 %v819_v33, %v6447_v7  ;;  %v838_v40 = vadd.f32 %v837_v34, %v6450_v8  ;;  %v4335_v34 = vor.u32 %v5555_v29, %v4332_v30  ;;  %v4431_v29 = vor.u32 %v5579_v22, %v4428_v24  ;;  %v5018_v30 = vld [vmem:[%s8551_s5 + $0x720] sm:$0xf]  ;;  %v5531_v22 = vld [vmem:[%s8551_s5 + $0x104] sm:$0xf]  ;;  %v4236_v24 = vld [vmem:[%s8551_s5 + $0x110] sm:$0xf0] }
 0x139   : > { %v954_v16 = vmax.f32 %v854_v62, 0.0  ;;  %v4175_v62 = vor.u32 %v5515_v57, %v4172_v60 }
 0x13a   : > { %v960_v47 = vmax.f32 %v820_v39, 0.0  ;;  %v961_v48 = vmax.f32 %v838_v40, 0.0  ;;  %v4188_v40 = vld [vmem:[%s8551_s5 + $0xb0] sm:$0xf0] }
 0x13b   : > { %v822_v52 = vpop.f32.mrf.mxu3 }
 0x13c   : > { %v6528_v56 = vpack.c.bf16 %v960_v47, %v952_v43  ;;  %v6530_v59 = vpack.c.bf16 %v961_v48, %v953_v44  ;;  %v823_v32 = vadd.f32 %v822_v52, %v6447_v7  ;;  %v5741_v7 = vld [vmem:[%s8551_s5 + $0x78c] sm:$0xf0]  ;;  %v5587_v47 = vld [vmem:[%s8551_s5 + $0x2c4] sm:$0xf]  ;;  %v4460_v48 = vld [vmem:[%s8551_s5 + $0x2d0] sm:$0xf0] }
 0x13d   : > { %v5067_v39 = vor.u32 %v5741_v7, %v5066_v37  ;;  %v4463_v51 = vor.u32 %v5587_v47, %v4460_v48  ;;  %v5050_v52 = vld [vmem:[%s8551_s5 + $0x760] sm:$0xf]  ;;  %v6701_v37 = vperm.slane %v6420_v58, 5  ;;  %v5725_v48 = vld [vmem:[%s8551_s5 + $0x70c] sm:$0xf0] }
 0x13e   : > { %v855_v2 = vpop.f32.mrf.mxu2  ;;  %2546 = vmatmul.bf16.vlgmr.msra.gmra.mxu0 %v6528_v56  ;;  %2564 = vmatmul.bf16.vlgmr.msrb.gmra.mxu1 %v6530_v59  ;;  %v968_v49 = vmax.f32 %v823_v32, 0.0  ;;  %v5051_v55 = vor.u32 %v5737_v53, %v5050_v52  ;;  %v5019_v32 = vor.u32 %v5729_v31, %v5018_v30  ;;  %v5002_v47 = vld [vmem:[%s8551_s5 + $0x700] sm:$0xf]  ;;  %v4239_v30 = vor.u32 %v5531_v22, %v4236_v24  ;;  %v4380_v31 = vld [vmem:[%s8551_s5 + $0x230] sm:$0xf0] }
 0x13f   : > { %v856_v6 = vadd.f32 %v855_v2, %v6479_v25  ;;  %v840_v9 = vpop.f32.mrf.mxu1  ;;  %v6554_v10 = vpop.f32.mrf.mxu0  ;;  %2682 = vmatpush.bf16.msra.mxu0 %v4223_v11  ;;  %2700 = vmatpush.bf16.msrb.mxu1 %v4351_v15  ;;  %v5511_v11 = vld [vmem:[%s8551_s5 + $0x64] sm:$0xf]  ;;  %v5003_v53 = vor.u32 %v5725_v48, %v5002_v47  ;;  %v4972_v24 = vld [vmem:[%s8551_s5 + $0x6d0] sm:$0xf0] }
 0x140   : > { %v841_v33 = vadd.f32 %v840_v9, %v6450_v8  ;;  %v5519_v8 = vld [vmem:[%s8551_s5 + $0xa4] sm:$0xf]  ;;  %2667 = vmatpush.bf16.msra.mxu3 %v5067_v39  ;;  %v6637_v23 = vpack.c.bf16 %v968_v49, %v968_v49  ;;  %v5733_v9 = vld [vmem:[%s8551_s5 + $0x74c] sm:$0xf0] }
 0x141   : > { %v962_v17 = vmax.f32 %v856_v6, 0.0  ;;  %v4191_v45 = vor.u32 %v5519_v8, %v4188_v40  ;;  %v5034_v6 = vld [vmem:[%s8551_s5 + $0x740] sm:$0xf]  ;;  %v4268_v8 = vld [vmem:[%s8551_s5 + $0x150] sm:$0xf0] }
 0x142   : > { %v969_v50 = vmax.f32 %v841_v33, 0.0  ;;  %v5035_v15 = vor.u32 %v5733_v9, %v5034_v6  ;;  %v5507_v33 = vld [vmem:[%s8551_s5 + $0x44] sm:$0xf]  ;;  %v4271_v40 = vor.u32 %v5539_v35, %v4268_v8  ;;  %v6748_v9 = vperm.slane %v6420_v58, 6  ;;  %v4588_v35 = vld [vmem:[%s8551_s5 + $0x3d0] sm:$0xf0] }
 0x143   : > { %v6577_v26 = vpack.c.bf16 %v962_v17, %v954_v16  ;;  %v824_v27 = vpop.f32.mrf.mxu3  ;;  %2683 = vmatpush.bf16.msra.mxu0 %v4207_v28  ;;  %2701 = vmatpush.bf16.msrb.mxu1 %v4335_v34  ;;  %v4156_v16 = vld [vmem:[%s8551_s5 + $0x70] sm:$0xf0]  ;;  %v5543_v17 = vld [vmem:[%s8551_s5 + $0x164] sm:$0xf] }
 0x144   : > { %v6639_v0 = vpack.c.bf16 %v969_v50, %v969_v50  ;;  %2668 = vmatpush.bf16.msra.mxu3 %v5051_v55  ;;  %v4159_v20 = vor.u32 %v5511_v11, %v4156_v16  ;;  %v4287_v28 = vor.u32 %v5543_v17, %v4284_v21  ;;  %v4140_v34 = vld [vmem:[%s8551_s5 + $0x50] sm:$0xf0]  ;;  %v5503_v49 = vld [vmem:[%s8551_s5 + $0x24] sm:$0xf] }
 0x145   : > { %2582 = vmatmul.bf16.vlgmr.msrb.gmra.mxu2 %v6577_v26  ;;  %v4143_v7 = vor.u32 %v5507_v33, %v4140_v34  ;;  %v5535_v55 = vld [vmem:[%s8551_s5 + $0x124] sm:$0xf] }
 0x146   : > { %v858_v38 = vpop.f32.mrf.mxu2  ;;  %2718 = vmatpush.bf16.msrb.mxu2 %v4479_v36  ;;  %v5623_v11 = vld [vmem:[%s8551_s5 + $0x3e4] sm:$0xf] }
 0x147   : > { %v842_v43 = vpop.f32.mrf.mxu1  ;;  %v891_v44 = vpop.f32.mrf.mxu0  ;;  %2684 = vmatpush.bf16.msra.mxu0 %v4191_v45  ;;  %v859_v54 = vadd.f32 %v858_v38, %v6479_v25  ;;  %2702 = vmatpush.bf16.msrb.mxu1 %v4319_v46  ;;  %v4300_v25 = vld [vmem:[%s8551_s5 + $0x190] sm:$0xf0]  ;;  %v4415_v45 = vor.u32 %v5575_v41, %v4412_v42  ;;  %v890_v46 = vadd.f32 %v6554_v10, %v6642_v1  ;;  %v5499_v17 = vld [vmem:[%s8551_s5 + $0x4] sm:$0xf] }
 0x148   : > { %v4303_v2 = vor.u32 %v5547_v63, %v4300_v25  ;;  %v6682_v27 = vadd.f32 %v891_v44, %v6642_v1  ;;  %2669 = vmatpush.bf16.msra.mxu3 %v5035_v15  ;;  %v5571_v63 = vld [vmem:[%s8551_s5 + $0x244] sm:$0xf]  ;;  %v4396_v25 = vld [vmem:[%s8551_s5 + $0x250] sm:$0xf0] }
 0x149   : > { %v970_v12 = vmax.f32 %v859_v54, 0.0  ;;  %v4124_v54 = vld [vmem:[%s8551_s5 + $0x30] sm:$0xf0]  ;;  %v956_v6 = vmax.f32 %v890_v46, 0.0  ;;  %v5619_v34 = vld [vmem:[%s8551_s5 + $0x3c4] sm:$0xf] }
 0x14a   : > { %2719 = vmatpush.bf16.msrb.mxu2 %v4463_v51  ;;  %v964_v43 = vmax.f32 %v6682_v27, 0.0  ;;  %v5567_v27 = vld [vmem:[%s8551_s5 + $0x224] sm:$0xf]  ;;  %v4591_v8 = vor.u32 %v5619_v34, %v4588_v35  ;;  %v4364_v46 = vld [vmem:[%s8551_s5 + $0x210] sm:$0xf0] }
 0x14b   : > { %v871_v61 = vpop.f32.mrf.mxu3  ;;  %2685 = vmatpush.bf16.msra.mxu0 %v4175_v62  ;;  %2703 = vmatpush.bf16.msrb.mxu1 %v4303_v2  ;;  %v6706_v38 = vpack.c.bf16 %v970_v12, %v970_v12  ;;  %v4252_v62 = vld [vmem:[%s8551_s5 + $0x130] sm:$0xf0]  ;;  %v4383_v33 = vor.u32 %v5567_v27, %v4380_v31  ;;  %v5715_v22 = vld [vmem:[%s8551_s5 + $0x6c4] sm:$0xf] }
 0x14c   : > { %v872_v36 = vadd.f32 %v871_v61, %v6660_v13  ;;  %2670 = vmatpush.bf16.msra.mxu3 %v5019_v32  ;;  %v4127_v61 = vor.u32 %v5503_v49, %v4124_v54  ;;  %v4255_v4 = vor.u32 %v5535_v55, %v4252_v62  ;;  %v4604_v12 = vld [vmem:[%s8551_s5 + $0x3f0] sm:$0xf0]  ;;  %v5651_v54 = vld [vmem:[%s8551_s5 + $0x4c4] sm:$0xf] }
 0x14d   : > { %v4607_v16 = vor.u32 %v5623_v11, %v4604_v12  ;;  %v5611_v12 = vld [vmem:[%s8551_s5 + $0x384] sm:$0xf]  ;;  %v4540_v34 = vld [vmem:[%s8551_s5 + $0x370] sm:$0xf0] }
 0x14e   : > { %v860_v14 = vpop.f32.mrf.mxu2  ;;  %2551 = vmatmul.bf16.gmra.mxu0 %v6637_v23  ;;  %2569 = vmatmul.bf16.gmra.mxu1 %v6639_v0  ;;  %v955_v50 = vmax.f32 %v872_v36, 0.0  ;;  %v5655_v36 = vld [vmem:[%s8551_s5 + $0x4e4] sm:$0xf] }
 0x14f   : > { %v6670_v18 = vpop.f32.mrf.mxu0  ;;  %v907_v19 = vpop.f32.mrf.mxu1  ;;  %2720 = vmatpush.bf16.msrb.mxu2 %v4447_v5  ;;  %2686 = vmatpush.bf16.msra.mxu0 %v4159_v20  ;;  %v4399_v5 = vor.u32 %v5571_v63, %v4396_v25  ;;  %v5719_v25 = vld [vmem:[%s8551_s5 + $0x6e4] sm:$0xf] }
 0x150   : > { %2704 = vmatpush.bf16.msrb.mxu1 %v4287_v28  ;;  %v908_v51 = vadd.f32 %v907_v19, %v6701_v37  ;;  %2671 = vmatpush.bf16.msra.mxu3 %v5003_v53  ;;  %v4108_v19 = vld [vmem:[%s8551_s5 + $0x10] sm:$0xf0]  ;;  %v6772_v28 = vpack.c.bf16 %v964_v43, %v956_v6 }
 0x151   : > { %v4111_v21 = vor.u32 %v5499_v17, %v4108_v19  ;;  %v4828_v17 = vld [vmem:[%s8551_s5 + $0x5b0] sm:$0xf0] }
 0x152   : > { %v957_v14 = vmax.f32 %v908_v51, 0.0  ;;  %v4572_v51 = vld [vmem:[%s8551_s5 + $0x3b0] sm:$0xf0] }
 0x153   : > { %v873_v39 = vpop.f32.mrf.mxu3  ;;  %2721 = vmatpush.bf16.msrb.mxu2 %v4431_v29  ;;  %2687 = vmatpush.bf16.msra.mxu0 %v4143_v7 }
 0x154   : > { %v874_v44 = vadd.f32 %v873_v39, %v6660_v13  ;;  %2705 = vmatpush.bf16.msrb.mxu1 %v4271_v40  ;;  %v4732_v39 = vld [vmem:[%s8551_s5 + $0x4f0] sm:$0xf0]  ;;  %v5687_v40 = vld [vmem:[%s8551_s5 + $0x5e4] sm:$0xf] }
 0x155   : > { %2587 = vmatmul.bf16.gmra.mxu2 %v6706_v38  ;;  %v4735_v43 = vor.u32 %v5655_v36, %v4732_v39  ;;  %v5675_v39 = vld [vmem:[%s8551_s5 + $0x584] sm:$0xf] }
 0x156   : > { %v963_v52 = vmax.f32 %v874_v44, 0.0  ;;  %v925_v10 = vpop.f32.mrf.mxu2  ;;  %v4860_v44 = vld [vmem:[%s8551_s5 + $0x5f0] sm:$0xf0] }
 0x157   : > { %v896_v57 = vpop.f32.mrf.mxu0  ;;  %v909_v60 = vpop.f32.mrf.mxu1  ;;  %2722 = vmatpush.bf16.msrb.mxu2 %v4415_v45  ;;  %2688 = vmatpush.bf16.msra.mxu0 %v4127_v61  ;;  %v926_v32 = vadd.f32 %v925_v10, %v6748_v9  ;;  %v5563_v45 = vld [vmem:[%s8551_s5 + $0x204] sm:$0xf]  ;;  %v4863_v48 = vor.u32 %v5687_v40, %v4860_v44 }
 0x158   : > { %v6744_v2 = vpack.c.bf16 %v963_v52, %v955_v50  ;;  %v910_v3 = vadd.f32 %v909_v60, %v6701_v37  ;;  %2706 = vmatpush.bf16.msrb.mxu1 %v4255_v4  ;;  %v4367_v49 = vor.u32 %v5563_v45, %v4364_v46  ;;  %v5615_v50 = vld [vmem:[%s8551_s5 + $0x3a4] sm:$0xf]  ;;  %v4844_v60 = vld [vmem:[%s8551_s5 + $0x5d0] sm:$0xf0]  ;;  %v895_v4 = vadd.f32 %v6670_v18, %v6642_v1 }
 0x159   : > { %v958_v52 = vmax.f32 %v926_v32, 0.0  ;;  %v4575_v53 = vor.u32 %v5615_v50, %v4572_v51  ;;  %v5683_v57 = vld [vmem:[%s8551_s5 + $0x5c4] sm:$0xf]  ;;  %v4975_v32 = vor.u32 %v5715_v22, %v4972_v24  ;;  %v4492_v22 = vld [vmem:[%s8551_s5 + $0x310] sm:$0xf0] }
 0x15a   : > { %v965_v15 = vmax.f32 %v910_v3, 0.0  ;;  %2600 = vmatmul.bf16.vlgmr.msrb.gmra.mxu3 %v6744_v2  ;;  %v4847_v63 = vor.u32 %v5683_v57, %v4844_v60  ;;  %v4988_v3 = vld [vmem:[%s8551_s5 + $0x6f0] sm:$0xf0]  ;;  %v5647_v1 = vld [vmem:[%s8551_s5 + $0x4a4] sm:$0xf]  ;;  %v972_v27 = vmax.f32 %v895_v4, 0.0 }
 0x15b   : > { %v876_v20 = vpop.f32.mrf.mxu3  ;;  %2723 = vmatpush.bf16.msrb.mxu2 %v4399_v5  ;;  %2736 = vmatpush.bf16.msrb.mxu3 %v4607_v16  ;;  %v4991_v11 = vor.u32 %v5719_v25, %v4988_v3  ;;  %v5679_v16 = vld [vmem:[%s8551_s5 + $0x5a4] sm:$0xf]  ;;  %v4940_v60 = vld [vmem:[%s8551_s5 + $0x690] sm:$0xf0] }
 0x15c   : > { %v6774_v29 = vpack.c.bf16 %v965_v15, %v957_v14  ;;  %2689 = vmatpush.bf16.msra.mxu0 %v4111_v21  ;;  %2707 = vmatpush.bf16.msrb.mxu1 %v4239_v30  ;;  %v877_v47 = vadd.f32 %v876_v20, %v6660_v13  ;;  %v4716_v13 = vld [vmem:[%s8551_s5 + $0x4d0] sm:$0xf0]  ;;  %v4831_v21 = vor.u32 %v5679_v16, %v4828_v17  ;;  %v5639_v50 = vld [vmem:[%s8551_s5 + $0x464] sm:$0xf] }
 0x15d   : > { %v4719_v55 = vor.u32 %v5651_v54, %v4716_v13  ;;  %v4556_v14 = vld [vmem:[%s8551_s5 + $0x390] sm:$0xf0]  ;;  %v6890_v44 = vpack.c.bf16 %v972_v27, %v972_v27  ;;  %v5671_v13 = vld [vmem:[%s8551_s5 + $0x564] sm:$0xf] }
 0x15e   : > { %v927_v7 = vpop.f32.mrf.mxu2  ;;  %2618 = vmatmul.bf16.vlgmr.msrb.gmra.mxu0 %v6772_v28  ;;  %2636 = vmatmul.bf16.vlgmr.msra.gmra.mxu1 %v6774_v29  ;;  %v971_v5 = vmax.f32 %v877_v47, 0.0  ;;  %v4700_v15 = vld [vmem:[%s8551_s5 + $0x4b0] sm:$0xf0]  ;;  %v5707_v57 = vld [vmem:[%s8551_s5 + $0x684] sm:$0xf] }
 0x15f   : > { %v928_v41 = vadd.f32 %v927_v7, %v6748_v9  ;;  %v912_v42 = vpop.f32.mrf.mxu1  ;;  %2724 = vmatpush.bf16.msrb.mxu2 %v4383_v33  ;;  %2737 = vmatpush.bf16.msrb.mxu3 %v4591_v8  ;;  %v4703_v20 = vor.u32 %v5647_v1, %v4700_v15  ;;  %v5607_v33 = vld [vmem:[%s8551_s5 + $0x364] sm:$0xf]  ;;  %v4684_v8 = vld [vmem:[%s8551_s5 + $0x490] sm:$0xf0] }
 0x160   : > { %2754 = vmatpush.bf16.msrb.mxu0 %v4735_v43  ;;  %2772 = vmatpush.bf16.msra.mxu1 %v4863_v48  ;;  %v913_v6 = vadd.f32 %v912_v42, %v6701_v37  ;;  %v4559_v37 = vor.u32 %v5611_v12, %v4556_v14  ;;  %v6862_v30 = vpack.c.bf16 %v971_v5, %v971_v5  ;;  %v5643_v7 = vld [vmem:[%s8551_s5 + $0x484] sm:$0xf]  ;;  %v4956_v43 = vld [vmem:[%s8551_s5 + $0x6b0] sm:$0xf0] }
 0x161   : > { %v966_v10 = vmax.f32 %v928_v41, 0.0  ;;  %v4543_v36 = vor.u32 %v5607_v33, %v4540_v34  ;;  %v4687_v41 = vor.u32 %v5643_v7, %v4684_v8  ;;  %v5711_v42 = vld [vmem:[%s8551_s5 + $0x6a4] sm:$0xf]  ;;  %v4668_v54 = vld [vmem:[%s8551_s5 + $0x470] sm:$0xf0] }
 0x162   : > { %v973_v31 = vmax.f32 %v913_v6, 0.0  ;;  %v4959_v47 = vor.u32 %v5711_v42, %v4956_v43  ;;  %v5603_v48 = vld [vmem:[%s8551_s5 + $0x344] sm:$0xf]  ;;  %v4508_v3 = vld [vmem:[%s8551_s5 + $0x330] sm:$0xf0] }
 0x163   : > { %v6826_v61 = vpack.c.bf16 %v966_v10, %v958_v52  ;;  %v878_v62 = vpop.f32.mrf.mxu3  ;;  %2725 = vmatpush.bf16.msrb.mxu2 %v4367_v49  ;;  %2738 = vmatpush.bf16.msrb.mxu3 %v4575_v53  ;;  %v4524_v49 = vld [vmem:[%s8551_s5 + $0x350] sm:$0xf0]  ;;  %v6904_v52 = vperm.slane %v6420_v58, 7  ;;  %v5599_v25 = vld [vmem:[%s8551_s5 + $0x324] sm:$0xf] }
 0x164   : > { %2755 = vmatpush.bf16.msrb.mxu0 %v4719_v55  ;;  %2773 = vmatpush.bf16.msra.mxu1 %v4847_v63  ;;  %v6892_v45 = vpack.c.bf16 %v973_v31, %v973_v31  ;;  %v4527_v53 = vor.u32 %v5603_v48, %v4524_v49  ;;  %v4671_v55 = vor.u32 %v5639_v50, %v4668_v54  ;;  %v4796_v58 = vld [vmem:[%s8551_s5 + $0x570] sm:$0xf0]  ;;  %v5635_v4 = vld [vmem:[%s8551_s5 + $0x444] sm:$0xf] }
 0x165   : > { %2654 = vmatmul.bf16.vlgmr.msra.gmra.mxu2 %v6826_v61  ;;  %v4799_v62 = vor.u32 %v5671_v13, %v4796_v58  ;;  %v4943_v63 = vor.u32 %v5707_v57, %v4940_v60  ;;  %v4511_v5 = vor.u32 %v5599_v25, %v4508_v3  ;;  %v4652_v6 = vld [vmem:[%s8551_s5 + $0x450] sm:$0xf0]  ;;  %v5703_v16 = vld [vmem:[%s8551_s5 + $0x664] sm:$0xf]  ;;  %v4226_v57 = vld [vmem:[%s8551_s5 + $0xe8] sm:$0xf] }
 0x166   : > { %v930_v18 = vpop.f32.mrf.mxu2  ;;  %v4780_v12 = vld [vmem:[%s8551_s5 + $0x550] sm:$0xf0]  ;;  %v4655_v1 = vor.u32 %v5635_v4, %v4652_v6  ;;  %v5631_v24 = vld [vmem:[%s8551_s5 + $0x424] sm:$0xf]  ;;  %v5562_v3 = vld [vmem:[%s8551_s5 + $0x1f4] sm:$0xf0] }
 0x167   : > { %2790 = vmatpush.bf16.msra.mxu2 %v4991_v11  ;;  %v914_v19 = vpop.f32.mrf.mxu1  ;;  %2739 = vmatpush.bf16.msrb.mxu3 %v4559_v37  ;;  %v931_v35 = vadd.f32 %v930_v18, %v6748_v9  ;;  %v4812_v9 = vld [vmem:[%s8551_s5 + $0x590] sm:$0xf0]  ;;  %v5667_v11 = vld [vmem:[%s8551_s5 + $0x544] sm:$0xf] }
 0x168   : > { %2756 = vmatpush.bf16.msrb.mxu0 %v4703_v20  ;;  %2774 = vmatpush.bf16.msra.mxu1 %v4831_v21  ;;  %v4815_v46 = vor.u32 %v5675_v39, %v4812_v9  ;;  %v4783_v15 = vor.u32 %v5667_v11, %v4780_v12  ;;  %v4924_v17 = vld [vmem:[%s8551_s5 + $0x670] sm:$0xf0]  ;;  %v5595_v21 = vld [vmem:[%s8551_s5 + $0x304] sm:$0xf] }
 0x169   : > { %v974_v51 = vmax.f32 %v931_v35, 0.0  ;;  %v4927_v20 = vor.u32 %v5703_v16, %v4924_v17  ;;  %v4636_v33 = vld [vmem:[%s8551_s5 + $0x430] sm:$0xf0]  ;;  %v5663_v34 = vld [vmem:[%s8551_s5 + $0x524] sm:$0xf] }
 0x16a   : > { %2605 = vmatmul.bf16.gmra.mxu3 %v6862_v30  ;;  %v4639_v35 = vor.u32 %v5631_v24, %v4636_v33  ;;  %v5699_v7 = vld [vmem:[%s8551_s5 + $0x644] sm:$0xf]  ;;  %v4908_v8 = vld [vmem:[%s8551_s5 + $0x650] sm:$0xf0]  ;;  %v4338_v16 = vld [vmem:[%s8551_s5 + $0x1c8] sm:$0xf] }
 0x16b   : > { %v943_v40 = vpop.f32.mrf.mxu3  ;;  %2791 = vmatpush.bf16.msra.mxu2 %v4975_v32  ;;  %2740 = vmatpush.bf16.msrb.mxu3 %v4543_v36  ;;  %v6942_v18 = vpack.c.bf16 %v974_v51, %v974_v51  ;;  %v4495_v32 = vor.u32 %v5595_v21, %v4492_v22  ;;  %v4764_v36 = vld [vmem:[%s8551_s5 + $0x530] sm:$0xf0]  ;;  %v5751_v9 = vld [vmem:[%s8551_s5 + $0x7e4] sm:$0xf]  ;;  %v5558_v17 = vld [vmem:[%s8551_s5 + $0x1d4] sm:$0xf0] }
 0x16c   : > { %2757 = vmatpush.bf16.msrb.mxu0 %v4687_v41  ;;  %2775 = vmatpush.bf16.msra.mxu1 %v4815_v46  ;;  %v944_v14 = vadd.f32 %v943_v40, %v6904_v52  ;;  %v4767_v40 = vor.u32 %v5663_v34, %v4764_v36  ;;  %v4911_v41 = vor.u32 %v5699_v7, %v4908_v8  ;;  %v5116_v42 = vld [vmem:[%s8551_s5 + $0x7f0] sm:$0xf0]  ;;  %v5627_v43 = vld [vmem:[%s8551_s5 + $0x404] sm:$0xf]  ;;  %v4482_v22 = vld [vmem:[%s8551_s5 + $0x2e8] sm:$0xf] }
 0x16d   : > { %v5119_v46 = vor.u32 %v5751_v9, %v5116_v42  ;;  %v5659_v48 = vld [vmem:[%s8551_s5 + $0x504] sm:$0xf]  ;;  %v4748_v49 = vld [vmem:[%s8551_s5 + $0x510] sm:$0xf0]  ;;  %v5594_v24 = vld [vmem:[%s8551_s5 + $0x2f4] sm:$0xf0] }
 0x16e   : > { %v932_v10 = vpop.f32.mrf.mxu2  ;;  %2623 = vmatmul.bf16.gmra.mxu0 %v6890_v44  ;;  %2641 = vmatmul.bf16.gmra.mxu1 %v6892_v45  ;;  %v959_v27 = vmax.f32 %v944_v14, 0.0  ;;  %v4892_v54 = vld [vmem:[%s8551_s5 + $0x630] sm:$0xf0]  ;;  %v5691_v4 = vld [vmem:[%s8551_s5 + $0x604] sm:$0xf] }
 0x16f   : > { %2792 = vmatpush.bf16.msra.mxu2 %v4959_v47  ;;  %2741 = vmatpush.bf16.msrb.mxu3 %v4527_v53  ;;  %v4620_v47 = vld [vmem:[%s8551_s5 + $0x410] sm:$0xf0]  ;;  %v4751_v10 = vor.u32 %v5659_v48, %v4748_v49  ;;  %v5695_v53 = vld [vmem:[%s8551_s5 + $0x624] sm:$0xf]  ;;  %v4194_v34 = vld [vmem:[%s8551_s5 + $0xa8] sm:$0xf] }
 0x170   : > { %2758 = vmatpush.bf16.msrb.mxu0 %v4671_v55  ;;  %2776 = vmatpush.bf16.msra.mxu1 %v4799_v62  ;;  %v4623_v51 = vor.u32 %v5627_v43, %v4620_v47  ;;  %v4895_v13 = vor.u32 %v5695_v53, %v4892_v54  ;;  %v5747_v55 = vld [vmem:[%s8551_s5 + $0x7c4] sm:$0xf]  ;;  %v5100_v58 = vld [vmem:[%s8551_s5 + $0x7d0] sm:$0xf0]  ;;  %v5530_v62 = vld [vmem:[%s8551_s5 + $0xf4] sm:$0xf0] }
 0x171   : > { %v5103_v60 = vor.u32 %v5747_v55, %v5100_v58  ;;  %v4227_v25 = vor.u32 %v5530_v62, %v4226_v57  ;;  %v5743_v14 = vld [vmem:[%s8551_s5 + $0x7a4] sm:$0xf]  ;;  %v5068_v33 = vld [vmem:[%s8551_s5 + $0x790] sm:$0xf0]  ;;  %v5522_v36 = vld [vmem:[%s8551_s5 + $0xb4] sm:$0xf0] }
 0x172   : > { %v4322_v7 = vld [vmem:[%s8551_s5 + $0x1a8] sm:$0xf]  ;;  %v5554_v8 = vld [vmem:[%s8551_s5 + $0x1b4] sm:$0xf0]  ;;  %v5735_v47 = vld [vmem:[%s8551_s5 + $0x764] sm:$0xf] }
 0x173   : > { %v945_v37 = vpop.f32.mrf.mxu3  ;;  %2793 = vmatpush.bf16.msra.mxu2 %v4943_v63  ;;  %2742 = vmatpush.bf16.msrb.mxu3 %v4511_v5  ;;  %v4354_v63 = vld [vmem:[%s8551_s5 + $0x1e8] sm:$0xf]  ;;  %v4876_v5 = vld [vmem:[%s8551_s5 + $0x610] sm:$0xf0]  ;;  %v5590_v42 = vld [vmem:[%s8551_s5 + $0x2d4] sm:$0xf0] }
 0x174   : > { %v946_v19 = vadd.f32 %v945_v37, %v6904_v52  ;;  %2759 = vmatpush.bf16.msrb.mxu0 %v4655_v1  ;;  %2777 = vmatpush.bf16.msra.mxu1 %v4783_v15  ;;  %v4355_v11 = vor.u32 %v5562_v3, %v4354_v63  ;;  %v4879_v12 = vor.u32 %v5691_v4, %v4876_v5  ;;  %v5084_v1 = vld [vmem:[%s8551_s5 + $0x7b0] sm:$0xf0]  ;;  %v4210_v37 = vld [vmem:[%s8551_s5 + $0xc8] sm:$0xf]  ;;  %v5550_v53 = vld [vmem:[%s8551_s5 + $0x194] sm:$0xf0] }
 0x175   : > { %2659 = vmatmul.bf16.gmra.mxu2 %v6942_v18  ;;  %v5087_v15 = vor.u32 %v5743_v14, %v5084_v1  ;;  %v4466_v9 = vld [vmem:[%s8551_s5 + $0x2c8] sm:$0xf]  ;;  %v5052_v48 = vld [vmem:[%s8551_s5 + $0x770] sm:$0xf0]  ;;  %v5586_v58 = vld [vmem:[%s8551_s5 + $0x2b4] sm:$0xf0] }
 0x176   : > { %v967_v31 = vmax.f32 %v946_v19, 0.0  ;;  %v4178_v49 = vld [vmem:[%s8551_s5 + $0x88] sm:$0xf]  ;;  %v5036_v62 = vld [vmem:[%s8551_s5 + $0x750] sm:$0xf0] }
 0x177   : > { %2794 = vmatpush.bf16.msra.mxu2 %v4927_v20  ;;  %2743 = vmatpush.bf16.msrb.mxu3 %v4495_v32  ;;  %v4339_v20 = vor.u32 %v5558_v17, %v4338_v16  ;;  %v5739_v32 = vld [vmem:[%s8551_s5 + $0x784] sm:$0xf]  ;;  %v4450_v55 = vld [vmem:[%s8551_s5 + $0x2a8] sm:$0xf]  ;;  %v5514_v3 = vld [vmem:[%s8551_s5 + $0x74] sm:$0xf0] }
 0x178   : > { %v6976_v39 = vpack.c.bf16 %v967_v31, %v959_v27  ;;  %2760 = vmatpush.bf16.msrb.mxu0 %v4639_v35  ;;  %2778 = vmatpush.bf16.msra.mxu1 %v4767_v40  ;;  %v4483_v31 = vor.u32 %v5594_v24, %v4482_v22  ;;  %v5071_v35 = vor.u32 %v5739_v32, %v5068_v33  ;;  %v4162_v63 = vld [vmem:[%s8551_s5 + $0x68] sm:$0xf]  ;;  %v5546_v5 = vld [vmem:[%s8551_s5 + $0x174] sm:$0xf0]  ;;  %v5727_v1 = vld [vmem:[%s8551_s5 + $0x724] sm:$0xf] }
 0x179   : > { %v4195_v40 = vor.u32 %v5522_v36, %v4194_v34  ;;  %v4451_v57 = vor.u32 %v5586_v58, %v4450_v55  ;;  %v4290_v4 = vld [vmem:[%s8551_s5 + $0x168] sm:$0xf]  ;;  %v5582_v14 = vld [vmem:[%s8551_s5 + $0x294] sm:$0xf0]  ;;  %v5723_v32 = vld [vmem:[%s8551_s5 + $0x704] sm:$0xf] }
 0x17a   : > { %2672 = vmatmul.bf16.vlgmr.msra.gmra.mxu3 %v6976_v39  ;;  %v5510_v16 = vld [vmem:[%s8551_s5 + $0x54] sm:$0xf0]  ;;  %v4418_v24 = vld [vmem:[%s8551_s5 + $0x268] sm:$0xf]  ;;  %v5004_v33 = vld [vmem:[%s8551_s5 + $0x710] sm:$0xf0] }
 0x17b   : > { %v948_v50 = vpop.f32.mrf.mxu3  ;;  %2795 = vmatpush.bf16.msra.mxu2 %v4911_v41  ;;  %2808 = vmatpush.bf16.msra.mxu3 %v5119_v46  ;;  %v4323_v41 = vor.u32 %v5554_v8, %v4322_v7  ;;  %v4467_v46 = vor.u32 %v5590_v42, %v4466_v9  ;;  %v4130_v34 = vld [vmem:[%s8551_s5 + $0x28] sm:$0xf]  ;;  %v5506_v36 = vld [vmem:[%s8551_s5 + $0x34] sm:$0xf0] }
 0x17c   : > { %2761 = vmatpush.bf16.msrb.mxu0 %v4623_v51  ;;  %2779 = vmatpush.bf16.msra.mxu1 %v4751_v10  ;;  %v949_v6 = vadd.f32 %v948_v50, %v6904_v52  ;;  %v5526_v52 = vld [vmem:[%s8551_s5 + $0xd4] sm:$0xf0]  ;;  %v5055_v50 = vor.u32 %v5735_v47, %v5052_v48  ;;  %v4306_v10 = vld [vmem:[%s8551_s5 + $0x188] sm:$0xf] }
 0x17d   : > { %v4211_v19 = vor.u32 %v5526_v52, %v4210_v37  ;;  %v5518_v51 = vld [vmem:[%s8551_s5 + $0x94] sm:$0xf0]  ;;  %v4146_v52 = vld [vmem:[%s8551_s5 + $0x48] sm:$0xf] }
 0x17e   : > { %2690 = vmatmul.bf16.vlgmr.msra.gmra.mxu0 %v6528_v56  ;;  %2708 = vmatmul.bf16.vlgmr.msrb.gmra.mxu1 %v6530_v59  ;;  %v975_v27 = vmax.f32 %v949_v6, 0.0  ;;  %v4179_v54 = vor.u32 %v5518_v51, %v4178_v49  ;;  %v4163_v6 = vor.u32 %v5514_v3, %v4162_v63  ;;  %v4258_v7 = vld [vmem:[%s8551_s5 + $0x128] sm:$0xf]  ;;  %v5538_v8 = vld [vmem:[%s8551_s5 + $0x134] sm:$0xf0] }
 0x17f   : > { %2796 = vmatpush.bf16.msra.mxu2 %v4895_v13  ;;  %2809 = vmatpush.bf16.msra.mxu3 %v5103_v60  ;;  %v4307_v13 = vor.u32 %v5550_v53, %v4306_v10  ;;  %v5731_v60 = vld [vmem:[%s8551_s5 + $0x744] sm:$0xf]  ;;  %v4402_v9 = vld [vmem:[%s8551_s5 + $0x248] sm:$0xf]  ;;  %v5574_v42 = vld [vmem:[%s8551_s5 + $0x254] sm:$0xf0] }
 0x180   : > { %2826 = vmatpush.bf16.msra.mxu0 %v4227_v25  ;;  %2844 = vmatpush.bf16.msrb.mxu1 %v4355_v11  ;;  %v7079_v43 = vpack.c.bf16 %v975_v27, %v975_v27  ;;  %v5039_v25 = vor.u32 %v5731_v60, %v5036_v62  ;;  %v4291_v11 = vor.u32 %v5546_v5, %v4290_v4  ;;  %v5578_v27 = vld [vmem:[%s8551_s5 + $0x274] sm:$0xf0]  ;;  %v4610_v47 = vld [vmem:[%s8551_s5 + $0x3e8] sm:$0xf] }
 0x181   : > { %v5626_v48 = vld [vmem:[%s8551_s5 + $0x3f4] sm:$0xf0]  ;;  %v4114_v49 = vld [vmem:[%s8551_s5 + $0x8] sm:$0xf] }
 0x182   : > { %v5502_v51 = vld [vmem:[%s8551_s5 + $0x14] sm:$0xf0]  ;;  %v4242_v10 = vld [vmem:[%s8551_s5 + $0x108] sm:$0xf] }
 0x183   : > { %v950_v21 = vpop.f32.mrf.mxu3  ;;  %2797 = vmatpush.bf16.msra.mxu2 %v4879_v12  ;;  %2810 = vmatpush.bf16.msra.mxu3 %v5087_v15  ;;  %v4434_v12 = vld [vmem:[%s8551_s5 + $0x288] sm:$0xf]  ;;  %v5020_v15 = vld [vmem:[%s8551_s5 + $0x730] sm:$0xf0]  ;;  %v4115_v53 = vor.u32 %v5502_v51, %v4114_v49  ;;  %v5570_v58 = vld [vmem:[%s8551_s5 + $0x234] sm:$0xf0] }
 0x184   : > { %2827 = vmatpush.bf16.msra.mxu0 %v4211_v19  ;;  %2845 = vmatpush.bf16.msrb.mxu1 %v4339_v20  ;;  %v4435_v37 = vor.u32 %v5582_v14, %v4434_v12  ;;  %v5023_v17 = vor.u32 %v5727_v1, %v5020_v15  ;;  %v4147_v19 = vor.u32 %v5510_v16, %v4146_v52  ;;  %v4274_v20 = vld [vmem:[%s8551_s5 + $0x148] sm:$0xf]  ;;  %v5542_v21 = vld [vmem:[%s8551_s5 + $0x154] sm:$0xf0] }
 0x185   : > { %2726 = vmatmul.bf16.vlgmr.msrb.gmra.mxu2 %v6577_v26  ;;  %v4275_v22 = vor.u32 %v5542_v21, %v4274_v20  ;;  %v4594_v60 = vld [vmem:[%s8551_s5 + $0x3c8] sm:$0xf]  ;;  %v5622_v62 = vld [vmem:[%s8551_s5 + $0x3d4] sm:$0xf0] }
 0x186   : > { %v4738_v63 = vld [vmem:[%s8551_s5 + $0x4e8] sm:$0xf]  ;;  %v5658_v3 = vld [vmem:[%s8551_s5 + $0x4f4] sm:$0xf0] }
 0x187   : > { %2862 = vmatpush.bf16.msrb.mxu2 %v4483_v31  ;;  %2811 = vmatpush.bf16.msra.mxu3 %v5071_v35  ;;  %v4419_v31 = vor.u32 %v5578_v27, %v4418_v24  ;;  %v5007_v35 = vor.u32 %v5723_v32, %v5004_v33  ;;  %v4866_v4 = vld [vmem:[%s8551_s5 + $0x5e8] sm:$0xf]  ;;  %v5690_v5 = vld [vmem:[%s8551_s5 + $0x5f4] sm:$0xf0] }
 0x188   : > { %2828 = vmatpush.bf16.msra.mxu0 %v4195_v40  ;;  %2846 = vmatpush.bf16.msrb.mxu1 %v4323_v41  ;;  %v4131_v40 = vor.u32 %v5506_v36, %v4130_v34  ;;  %v4259_v41 = vor.u32 %v5538_v8, %v4258_v7  ;;  %v4370_v12 = vld [vmem:[%s8551_s5 + $0x208] sm:$0xf]  ;;  %v5566_v14 = vld [vmem:[%s8551_s5 + $0x214] sm:$0xf0] }
 0x189   : > { %v4578_v1 = vld [vmem:[%s8551_s5 + $0x3a8] sm:$0xf]  ;;  %v5618_v15 = vld [vmem:[%s8551_s5 + $0x3b4] sm:$0xf0] }
 0x18a   : > { %2677 = vmatmul.bf16.gmra.mxu3 %v7079_v43  ;;  %v4579_v52 = vor.u32 %v5618_v15, %v4578_v1  ;;  %v4722_v16 = vld [vmem:[%s8551_s5 + $0x4c8] sm:$0xf]  ;;  %v5686_v21 = vld [vmem:[%s8551_s5 + $0x5d4] sm:$0xf0] }
 0x18b   : > { %2863 = vmatpush.bf16.msrb.mxu2 %v4467_v46  ;;  %2812 = vmatpush.bf16.msra.mxu3 %v5055_v50  ;;  %v4403_v46 = vor.u32 %v5574_v42, %v4402_v9  ;;  %v4611_v50 = vor.u32 %v5626_v48, %v4610_v47  ;;  %v4994_v24 = vld [vmem:[%s8551_s5 + $0x6e8] sm:$0xf]  ;;  %v5722_v27 = vld [vmem:[%s8551_s5 + $0x6f4] sm:$0xf0] }
 0x18c   : > { %2829 = vmatpush.bf16.msra.mxu0 %v4179_v54  ;;  %2847 = vmatpush.bf16.msrb.mxu1 %v4307_v13  ;;  %v5534_v54 = vld [vmem:[%s8551_s5 + $0x114] sm:$0xf0]  ;;  %v4386_v13 = vld [vmem:[%s8551_s5 + $0x228] sm:$0xf] }
 0x18d   : > { %v4243_v55 = vor.u32 %v5534_v54, %v4242_v10  ;;  %v4562_v32 = vld [vmem:[%s8551_s5 + $0x388] sm:$0xf]  ;;  %v5614_v33 = vld [vmem:[%s8551_s5 + $0x394] sm:$0xf0] }
 0x18e   : > { %2695 = vmatmul.bf16.gmra.mxu0 %v6637_v23  ;;  %2713 = vmatmul.bf16.gmra.mxu1 %v6639_v0  ;;  %v4706_v34 = vld [vmem:[%s8551_s5 + $0x4a8] sm:$0xf]  ;;  %v5650_v36 = vld [vmem:[%s8551_s5 + $0x4b4] sm:$0xf0] }
 0x18f   : > { %2864 = vmatpush.bf16.msrb.mxu2 %v4451_v57  ;;  %2813 = vmatpush.bf16.msra.mxu3 %v5039_v25  ;;  %v4387_v57 = vor.u32 %v5570_v58, %v4386_v13  ;;  %v4595_v25 = vor.u32 %v5622_v62, %v4594_v60  ;;  %v4834_v7 = vld [vmem:[%s8551_s5 + $0x5a8] sm:$0xf]  ;;  %v5682_v8 = vld [vmem:[%s8551_s5 + $0x5b4] sm:$0xf0] }
 0x190   : > { %2830 = vmatpush.bf16.msra.mxu0 %v4163_v6  ;;  %2848 = vmatpush.bf16.msrb.mxu1 %v4291_v11  ;;  %v4739_v6 = vor.u32 %v5658_v3, %v4738_v63  ;;  %v4867_v11 = vor.u32 %v5690_v5, %v4866_v4  ;;  %v4978_v9 = vld [vmem:[%s8551_s5 + $0x6c8] sm:$0xf]  ;;  %v5718_v42 = vld [vmem:[%s8551_s5 + $0x6d4] sm:$0xf0] }
 0x191   : > { %v4546_v47 = vld [vmem:[%s8551_s5 + $0x368] sm:$0xf]  ;;  %v5610_v48 = vld [vmem:[%s8551_s5 + $0x374] sm:$0xf0] }
 0x192   : > { %v4690_v49 = vld [vmem:[%s8551_s5 + $0x488] sm:$0xf]  ;;  %v5646_v51 = vld [vmem:[%s8551_s5 + $0x494] sm:$0xf0] }
 0x193   : > { %2865 = vmatpush.bf16.msrb.mxu2 %v4435_v37  ;;  %2814 = vmatpush.bf16.msra.mxu3 %v5023_v17  ;;  %v4371_v37 = vor.u32 %v5566_v14, %v4370_v12  ;;  %v5654_v17 = vld [vmem:[%s8551_s5 + $0x4d4] sm:$0xf0]  ;;  %v4818_v10 = vld [vmem:[%s8551_s5 + $0x588] sm:$0xf]  ;;  %v4691_v54 = vor.u32 %v5646_v51, %v4690_v49 }
 0x194   : > { %2831 = vmatpush.bf16.msra.mxu0 %v4147_v19  ;;  %2849 = vmatpush.bf16.msrb.mxu1 %v4275_v22  ;;  %v4850_v19 = vld [vmem:[%s8551_s5 + $0x5c8] sm:$0xf]  ;;  %v4723_v20 = vor.u32 %v5654_v17, %v4722_v16  ;;  %v5714_v58 = vld [vmem:[%s8551_s5 + $0x6b4] sm:$0xf0] }
 0x195   : > { %2731 = vmatmul.bf16.gmra.mxu2 %v6706_v38  ;;  %v4851_v22 = vor.u32 %v5686_v21, %v4850_v19  ;;  %v4530_v60 = vld [vmem:[%s8551_s5 + $0x348] sm:$0xf]  ;;  %v5606_v62 = vld [vmem:[%s8551_s5 + $0x354] sm:$0xf0] }
 0x196   : > { %v4674_v63 = vld [vmem:[%s8551_s5 + $0x468] sm:$0xf]  ;;  %v5642_v3 = vld [vmem:[%s8551_s5 + $0x474] sm:$0xf0] }
 0x197   : > { %2866 = vmatpush.bf16.msrb.mxu2 %v4419_v31  ;;  %2815 = vmatpush.bf16.msra.mxu3 %v5007_v35  ;;  %v4995_v31 = vor.u32 %v5722_v27, %v4994_v24  ;;  %v4563_v35 = vor.u32 %v5614_v33, %v4562_v32  ;;  %v4802_v4 = vld [vmem:[%s8551_s5 + $0x568] sm:$0xf]  ;;  %v5674_v5 = vld [vmem:[%s8551_s5 + $0x574] sm:$0xf0] }
 0x198   : > { %2832 = vmatpush.bf16.msra.mxu0 %v4131_v40  ;;  %2850 = vmatpush.bf16.msrb.mxu1 %v4259_v41  ;;  %v4707_v40 = vor.u32 %v5650_v36, %v4706_v34  ;;  %v4835_v41 = vor.u32 %v5682_v8, %v4834_v7  ;;  %v4946_v12 = vld [vmem:[%s8551_s5 + $0x688] sm:$0xf]  ;;  %v5710_v14 = vld [vmem:[%s8551_s5 + $0x694] sm:$0xf0] }
 0x199   : > { %v4947_v1 = vor.u32 %v5710_v14, %v4946_v12  ;;  %v5602_v15 = vld [vmem:[%s8551_s5 + $0x334] sm:$0xf0]  ;;  %v4786_v19 = vld [vmem:[%s8551_s5 + $0x548] sm:$0xf]  ;;  %v4228_v14 = vld [vmem:[%s8551_s5 + $0xf8] sm:$0xf0] }
 0x19a   : > { %2744 = vmatmul.bf16.vlgmr.msrb.gmra.mxu3 %v6744_v2  ;;  %v5638_v17 = vld [vmem:[%s8551_s5 + $0x454] sm:$0xf0]  ;;  %v4930_v24 = vld [vmem:[%s8551_s5 + $0x668] sm:$0xf] }
 0x19b   : > { %2867 = vmatpush.bf16.msrb.mxu2 %v4403_v46  ;;  %2880 = vmatpush.bf16.msrb.mxu3 %v4611_v50  ;;  %v4979_v46 = vor.u32 %v5718_v42, %v4978_v9  ;;  %v4547_v50 = vor.u32 %v5610_v48, %v4546_v47  ;;  %v5706_v27 = vld [vmem:[%s8551_s5 + $0x674] sm:$0xf0]  ;;  %v4498_v33 = vld [vmem:[%s8551_s5 + $0x308] sm:$0xf] }
 0x19c   : > { %2833 = vmatpush.bf16.msra.mxu0 %v4115_v53  ;;  %2851 = vmatpush.bf16.msrb.mxu1 %v4243_v55  ;;  %v5678_v53 = vld [vmem:[%s8551_s5 + $0x594] sm:$0xf0]  ;;  %v4962_v55 = vld [vmem:[%s8551_s5 + $0x6a8] sm:$0xf]  ;;  %v4931_v32 = vor.u32 %v5706_v27, %v4930_v24  ;;  %v5524_v24 = vld [vmem:[%s8551_s5 + $0xcc] sm:$0xf] }
 0x19d   : > { %v4819_v13 = vor.u32 %v5678_v53, %v4818_v10  ;;  %v5598_v34 = vld [vmem:[%s8551_s5 + $0x314] sm:$0xf0]  ;;  %v4770_v8 = vld [vmem:[%s8551_s5 + $0x528] sm:$0xf]  ;;  %v4212_v27 = vld [vmem:[%s8551_s5 + $0xd8] sm:$0xf0] }
 0x19e   : > { %2762 = vmatmul.bf16.vlgmr.msrb.gmra.mxu0 %v6772_v28  ;;  %2780 = vmatmul.bf16.vlgmr.msra.gmra.mxu1 %v6774_v29  ;;  %v4499_v36 = vor.u32 %v5598_v34, %v4498_v33  ;;  %v5634_v7 = vld [vmem:[%s8551_s5 + $0x434] sm:$0xf0]  ;;  %v4914_v42 = vld [vmem:[%s8551_s5 + $0x648] sm:$0xf]  ;;  %v4340_v33 = vld [vmem:[%s8551_s5 + $0x1d8] sm:$0xf0] }
 0x19f   : > { %2868 = vmatpush.bf16.msrb.mxu2 %v4387_v57  ;;  %2881 = vmatpush.bf16.msrb.mxu3 %v4595_v25  ;;  %v4963_v57 = vor.u32 %v5714_v58, %v4962_v55  ;;  %v4531_v25 = vor.u32 %v5606_v62, %v4530_v60  ;;  %v5122_v49 = vld [vmem:[%s8551_s5 + $0x7e8] sm:$0xf]  ;;  %v5630_v53 = vld [vmem:[%s8551_s5 + $0x414] sm:$0xf0] }
 0x1a0   : > { %2898 = vmatpush.bf16.msrb.mxu0 %v4739_v6  ;;  %2916 = vmatpush.bf16.msra.mxu1 %v4867_v11  ;;  %v4675_v6 = vor.u32 %v5642_v3, %v4674_v63  ;;  %v4803_v11 = vor.u32 %v5674_v5, %v4802_v4  ;;  %v4626_v51 = vld [vmem:[%s8551_s5 + $0x408] sm:$0xf]  ;;  %v5698_v63 = vld [vmem:[%s8551_s5 + $0x634] sm:$0xf0] }
 0x1a1   : > { %v4898_v62 = vld [vmem:[%s8551_s5 + $0x628] sm:$0xf]  ;;  %v5750_v5 = vld [vmem:[%s8551_s5 + $0x7d4] sm:$0xf0] }
 0x1a2   : > { %v4899_v3 = vor.u32 %v5698_v63, %v4898_v62  ;;  %v5106_v4 = vld [vmem:[%s8551_s5 + $0x7c8] sm:$0xf]  ;;  %v5738_v63 = vld [vmem:[%s8551_s5 + $0x774] sm:$0xf0] }
 0x1a3   : > { %2869 = vmatpush.bf16.msrb.mxu2 %v4371_v37  ;;  %2882 = vmatpush.bf16.msrb.mxu3 %v4579_v52  ;;  %v4514_v37 = vld [vmem:[%s8551_s5 + $0x328] sm:$0xf]  ;;  %v5107_v12 = vor.u32 %v5750_v5, %v5106_v4  ;;  %v4180_v4 = vld [vmem:[%s8551_s5 + $0x98] sm:$0xf0]  ;;  %v5548_v5 = vld [vmem:[%s8551_s5 + $0x18c] sm:$0xf] }
 0x1a4   : > { %2899 = vmatpush.bf16.msrb.mxu0 %v4723_v20  ;;  %2917 = vmatpush.bf16.msra.mxu1 %v4851_v22  ;;  %v4658_v52 = vld [vmem:[%s8551_s5 + $0x448] sm:$0xf]  ;;  %v4515_v16 = vor.u32 %v5602_v15, %v4514_v37  ;;  %v5670_v20 = vld [vmem:[%s8551_s5 + $0x554] sm:$0xf0]  ;;  %v4356_v37 = vld [vmem:[%s8551_s5 + $0x1f8] sm:$0xf0] }
 0x1a5   : > { %2798 = vmatmul.bf16.vlgmr.msra.gmra.mxu2 %v6826_v61  ;;  %v4659_v21 = vor.u32 %v5638_v17, %v4658_v52  ;;  %v4787_v22 = vor.u32 %v5670_v20, %v4786_v19  ;;  %v5694_v17 = vld [vmem:[%s8551_s5 + $0x614] sm:$0xf0]  ;;  %v5090_v20 = vld [vmem:[%s8551_s5 + $0x7a8] sm:$0xf] }
 0x1a6   : > { %v5058_v62 = vld [vmem:[%s8551_s5 + $0x768] sm:$0xf] }
 0x1a7   : > { %2934 = vmatpush.bf16.msra.mxu2 %v4995_v31  ;;  %2883 = vmatpush.bf16.msrb.mxu3 %v4563_v35  ;;  %v1248_v31 = vld [vmem:[%s8552_s6] sm:$0xf]  ;;  %v4642_v35 = vld [vmem:[%s8551_s5 + $0x428] sm:$0xf] }
 0x1a8   : > { %2900 = vmatpush.bf16.msrb.mxu0 %v4707_v40  ;;  %2918 = vmatpush.bf16.msra.mxu1 %v4835_v41  ;;  %v5666_v40 = vld [vmem:[%s8551_s5 + $0x534] sm:$0xf0]  ;;  %v4643_v41 = vor.u32 %v5634_v7, %v4642_v35  ;;  %v7384_v47 = vperm.slane %v1248_v31, 0  ;;  %v5556_v31 = vld [vmem:[%s8551_s5 + $0x1cc] sm:$0xf] }
 0x1a9   : > { %v4771_v9 = vor.u32 %v5666_v40, %v4770_v8  ;;  %v5592_v7 = vld [vmem:[%s8551_s5 + $0x2ec] sm:$0xf]  ;;  %v4484_v8 = vld [vmem:[%s8551_s5 + $0x2f8] sm:$0xf0] }
 0x1aa   : > { %2749 = vmatmul.bf16.gmra.mxu3 %v6862_v30 }
 0x1ab   : > { %2935 = vmatpush.bf16.msra.mxu2 %v4979_v46  ;;  %2884 = vmatpush.bf16.msrb.mxu3 %v4547_v50  ;;  %v5702_v46 = vld [vmem:[%s8551_s5 + $0x654] sm:$0xf0] }
 0x1ac   : > { %2901 = vmatpush.bf16.msrb.mxu0 %v4691_v54  ;;  %2919 = vmatpush.bf16.msra.mxu1 %v4819_v13  ;;  %v4915_v48 = vor.u32 %v5702_v46, %v4914_v42  ;;  %v5754_v50 = vld [vmem:[%s8551_s5 + $0x7f4] sm:$0xf0]  ;;  %v4754_v54 = vld [vmem:[%s8551_s5 + $0x508] sm:$0xf]  ;;  %v5520_v46 = vld [vmem:[%s8551_s5 + $0xac] sm:$0xf] }
 0x1ad   : > { %v5123_v10 = vor.u32 %v5754_v50, %v5122_v49  ;;  %v5662_v13 = vld [vmem:[%s8551_s5 + $0x514] sm:$0xf0]  ;;  %v4196_v50 = vld [vmem:[%s8551_s5 + $0xb8] sm:$0xf0] }
 0x1ae   : > { %2767 = vmatmul.bf16.gmra.mxu0 %v6890_v44  ;;  %2785 = vmatmul.bf16.gmra.mxu1 %v6892_v45  ;;  %v4755_v60 = vor.u32 %v5662_v13, %v4754_v54  ;;  %v5742_v42 = vld [vmem:[%s8551_s5 + $0x794] sm:$0xf0]  ;;  %v5588_v13 = vld [vmem:[%s8551_s5 + $0x2cc] sm:$0xf] }
 0x1af   : > { %2936 = vmatpush.bf16.msra.mxu2 %v4963_v57  ;;  %2885 = vmatpush.bf16.msrb.mxu3 %v4531_v25  ;;  %v4627_v57 = vor.u32 %v5630_v53, %v4626_v51  ;;  %v5552_v51 = vld [vmem:[%s8551_s5 + $0x1ac] sm:$0xf]  ;;  %v4199_v53 = vor.u32 %v5520_v46, %v4196_v50 }
 0x1b0   : > { %2902 = vmatpush.bf16.msrb.mxu0 %v4675_v6  ;;  %2920 = vmatpush.bf16.msra.mxu1 %v4803_v11  ;;  %v5528_v6 = vld [vmem:[%s8551_s5 + $0xec] sm:$0xf] }
 0x1b1   : > { %v4231_v15 = vor.u32 %v5528_v6, %v4228_v14  ;;  %v4308_v6 = vld [vmem:[%s8551_s5 + $0x198] sm:$0xf0]  ;;  %v5540_v46 = vld [vmem:[%s8551_s5 + $0x14c] sm:$0xf] }
 0x1b3   : > { %2937 = vmatpush.bf16.msra.mxu2 %v4947_v1  ;;  %2886 = vmatpush.bf16.msrb.mxu3 %v4515_v16  ;;  %v5560_v1 = vld [vmem:[%s8551_s5 + $0x1ec] sm:$0xf]  ;;  %v4882_v16 = vld [vmem:[%s8551_s5 + $0x608] sm:$0xf] }
 0x1b4   : > { %2903 = vmatpush.bf16.msrb.mxu0 %v4659_v21  ;;  %2921 = vmatpush.bf16.msra.mxu1 %v4787_v22  ;;  %v4359_v52 = vor.u32 %v5560_v1, %v4356_v37  ;;  %v4883_v19 = vor.u32 %v5694_v17, %v4882_v16  ;;  %v5746_v21 = vld [vmem:[%s8551_s5 + $0x7b4] sm:$0xf0]  ;;  %v4311_v1 = vor.u32 %v5548_v5, %v4308_v6  ;;  %v5584_v37 = vld [vmem:[%s8551_s5 + $0x2ac] sm:$0xf]  ;;  %v5042_v17 = vld [vmem:[%s8551_s5 + $0x748] sm:$0xf] }
 0x1b5   : > { %2803 = vmatmul.bf16.gmra.mxu2 %v6942_v18  ;;  %v5091_v22 = vor.u32 %v5746_v21, %v5090_v20  ;;  %v5512_v20 = vld [vmem:[%s8551_s5 + $0x6c] sm:$0xf] }
 0x1b6   : > { %v5572_v6 = vld [vmem:[%s8551_s5 + $0x24c] sm:$0xf] }
 0x1b7   : > { %2938 = vmatpush.bf16.msra.mxu2 %v4931_v32  ;;  %2887 = vmatpush.bf16.msrb.mxu3 %v4499_v36  ;;  %v4215_v32 = vor.u32 %v5524_v24, %v4212_v27  ;;  %v4343_v36 = vor.u32 %v5556_v31, %v4340_v33  ;;  %v5544_v24 = vld [vmem:[%s8551_s5 + $0x16c] sm:$0xf]  ;;  %v4292_v27 = vld [vmem:[%s8551_s5 + $0x178] sm:$0xf0] }
 0x1b8   : > { %2904 = vmatpush.bf16.msrb.mxu0 %v4643_v41  ;;  %2922 = vmatpush.bf16.msra.mxu1 %v4771_v9  ;;  %v4487_v41 = vor.u32 %v5592_v7, %v4484_v8  ;;  %v5074_v9 = vld [vmem:[%s8551_s5 + $0x788] sm:$0xf]  ;;  %v5580_v33 = vld [vmem:[%s8551_s5 + $0x28c] sm:$0xf] }
 0x1b9   : > { %v5075_v49 = vor.u32 %v5742_v42, %v5074_v9  ;;  %v5026_v8 = vld [vmem:[%s8551_s5 + $0x728] sm:$0xf]  ;;  %v4148_v42 = vld [vmem:[%s8551_s5 + $0x58] sm:$0xf0] }
 0x1ba   : > { %2816 = vmatmul.bf16.vlgmr.msra.gmra.mxu3 %v6976_v39 }
 0x1bb   : > { %v2547_v55 = vpop.f32.mrf.mxu0  ;;  %v2565_v58 = vpop.f32.mrf.mxu1  ;;  %2939 = vmatpush.bf16.msra.mxu2 %v4915_v48  ;;  %2952 = vmatpush.bf16.msra.mxu3 %v5123_v10  ;;  %v4324_v10 = vld [vmem:[%s8551_s5 + $0x1b8] sm:$0xf0] }
 0x1bc   : > { %v2548_v25 = vadd.f32 %v2547_v55, %v7384_v47  ;;  %2905 = vmatpush.bf16.msrb.mxu0 %v4627_v57  ;;  %2923 = vmatpush.bf16.msra.mxu1 %v4755_v60  ;;  %v4327_v54 = vor.u32 %v5552_v51, %v4324_v10  ;;  %v4468_v55 = vld [vmem:[%s8551_s5 + $0x2d8] sm:$0xf0] }
 0x1bd   : > { %v4471_v57 = vor.u32 %v5588_v13, %v4468_v55  ;;  %v5010_v55 = vld [vmem:[%s8551_s5 + $0x708] sm:$0xf] }
 0x1be   : > { %v2566_v11 = vadd.f32 %v2565_v58, %v2548_v25  ;;  %2834 = vmatmul.bf16.vlgmr.msra.gmra.mxu0 %v6528_v56  ;;  %2852 = vmatmul.bf16.vlgmr.msrb.gmra.mxu1 %v6530_v59  ;;  %v5516_v25 = vld [vmem:[%s8551_s5 + $0x8c] sm:$0xf] }
 0x1bf   : > { %2940 = vmatpush.bf16.msra.mxu2 %v4899_v3  ;;  %2953 = vmatpush.bf16.msra.mxu3 %v5107_v12  ;;  %v5059_v3 = vor.u32 %v5738_v63, %v5058_v62  ;;  %v4183_v14 = vor.u32 %v5516_v25, %v4180_v4  ;;  %v4132_v63 = vld [vmem:[%s8551_s5 + $0x38] sm:$0xf0]  ;;  %v5536_v25 = vld [vmem:[%s8551_s5 + $0x12c] sm:$0xf] }
 0x1c0   : > { %2970 = vmatpush.bf16.msra.mxu0 %v4231_v15  ;;  %2988 = vmatpush.bf16.msrb.mxu1 %v4359_v52  ;;  %v4452_v15 = vld [vmem:[%s8551_s5 + $0x2b8] sm:$0xf0] }
 0x1c1   : > { %v4455_v16 = vor.u32 %v5584_v37, %v4452_v15  ;;  %v5624_v37 = vld [vmem:[%s8551_s5 + $0x3ec] sm:$0xf]  ;;  %v4612_v15 = vld [vmem:[%s8551_s5 + $0x3f8] sm:$0xf0] }
 0x1c3   : > { %v2549_v34 = vpop.f32.mrf.mxu0  ;;  %v2567_v35 = vpop.f32.mrf.mxu1  ;;  %2941 = vmatpush.bf16.msra.mxu2 %v4883_v19  ;;  %2954 = vmatpush.bf16.msra.mxu3 %v5091_v22  ;;  %v5734_v19 = vld [vmem:[%s8551_s5 + $0x754] sm:$0xf0]  ;;  %v4164_v22 = vld [vmem:[%s8551_s5 + $0x78] sm:$0xf0] }
 0x1c4   : > { %v2550_v40 = vadd.f32 %v2549_v34, %v7384_v47  ;;  %2971 = vmatpush.bf16.msra.mxu0 %v4215_v32  ;;  %2989 = vmatpush.bf16.msrb.mxu1 %v4343_v36  ;;  %v4167_v31 = vor.u32 %v5512_v20, %v4164_v22  ;;  %v4295_v32 = vor.u32 %v5544_v24, %v4292_v27  ;;  %v4436_v34 = vld [vmem:[%s8551_s5 + $0x298] sm:$0xf0]  ;;  %v5568_v24 = vld [vmem:[%s8551_s5 + $0x22c] sm:$0xf] }
 0x1c5   : > { %2870 = vmatmul.bf16.vlgmr.msrb.gmra.mxu2 %v6577_v26  ;;  %v4439_v36 = vor.u32 %v5580_v33, %v4436_v34  ;;  %v4244_v22 = vld [vmem:[%s8551_s5 + $0x118] sm:$0xf0]  ;;  %v5620_v34 = vld [vmem:[%s8551_s5 + $0x3cc] sm:$0xf] }
 0x1c6   : > { %v2568_v48 = vadd.f32 %v2567_v35, %v2550_v40  ;;  %v5730_v40 = vld [vmem:[%s8551_s5 + $0x734] sm:$0xf0]  ;;  %v4388_v27 = vld [vmem:[%s8551_s5 + $0x238] sm:$0xf0] }
 0x1c7   : > { %3006 = vmatpush.bf16.msrb.mxu2 %v4487_v41  ;;  %2955 = vmatpush.bf16.msra.mxu3 %v5075_v49  ;;  %v5508_v41 = vld [vmem:[%s8551_s5 + $0x4c] sm:$0xf]  ;;  %v5027_v9 = vor.u32 %v5730_v40, %v5026_v8 }
 0x1c8   : > { %v2583_v58 = vpop.f32.mrf.mxu2  ;;  %2972 = vmatpush.bf16.msra.mxu0 %v4199_v53  ;;  %2990 = vmatpush.bf16.msrb.mxu1 %v4327_v54  ;;  %v4151_v51 = vor.u32 %v5508_v41, %v4148_v42  ;;  %v5576_v53 = vld [vmem:[%s8551_s5 + $0x26c] sm:$0xf]  ;;  %v4420_v54 = vld [vmem:[%s8551_s5 + $0x278] sm:$0xf0] }
 0x1c9   : > { %v7488_v60 = vadd.f32 %v2583_v58, %v2566_v11  ;;  %v4423_v13 = vor.u32 %v5576_v53, %v4420_v54  ;;  %v5726_v58 = vld [vmem:[%s8551_s5 + $0x714] sm:$0xf0]  ;;  %v4740_v41 = vld [vmem:[%s8551_s5 + $0x4f8] sm:$0xf0]  ;;  %v5616_v53 = vld [vmem:[%s8551_s5 + $0x3ac] sm:$0xf] }
 0x1ca   : > { %2821 = vmatmul.bf16.gmra.mxu3 %v7079_v43  ;;  %v5011_v62 = vor.u32 %v5726_v58, %v5010_v55  ;;  %v4868_v42 = vld [vmem:[%s8551_s5 + $0x5f8] sm:$0xf0]  ;;  %v5652_v55 = vld [vmem:[%s8551_s5 + $0x4cc] sm:$0xf] }
 0x1cb   : > { %v2552_v11 = vpop.f32.mrf.mxu0  ;;  %v2570_v12 = vpop.f32.mrf.mxu1  ;;  %3007 = vmatpush.bf16.msrb.mxu2 %v4471_v57  ;;  %2956 = vmatpush.bf16.msra.mxu3 %v5059_v3  ;;  %v5504_v57 = vld [vmem:[%s8551_s5 + $0x2c] sm:$0xf]  ;;  %v4260_v3 = vld [vmem:[%s8551_s5 + $0x138] sm:$0xf0] }
 0x1cc   : > { %v2553_v52 = vadd.f32 %v2552_v11, %v7384_v47  ;;  %2973 = vmatpush.bf16.msra.mxu0 %v4183_v14  ;;  %v5043_v47 = vor.u32 %v5734_v19, %v5042_v17  ;;  %2991 = vmatpush.bf16.msrb.mxu1 %v4311_v1  ;;  %v4135_v4 = vor.u32 %v5504_v57, %v4132_v63  ;;  %v4404_v11 = vld [vmem:[%s8551_s5 + $0x258] sm:$0xf0]  ;;  %v5532_v19 = vld [vmem:[%s8551_s5 + $0x10c] sm:$0xf] }
 0x1cd   : > { %v4263_v5 = vor.u32 %v5536_v25, %v4260_v3  ;;  %v4407_v14 = vor.u32 %v5572_v6, %v4404_v11  ;;  %v4116_v17 = vld [vmem:[%s8551_s5 + $0x18] sm:$0xf0]  ;;  %v5684_v57 = vld [vmem:[%s8551_s5 + $0x5cc] sm:$0xf] }
 0x1ce   : > { %v2571_v21 = vadd.f32 %v2570_v12, %v2553_v52  ;;  %2839 = vmatmul.bf16.gmra.mxu0 %v6637_v23  ;;  %2857 = vmatmul.bf16.gmra.mxu1 %v6639_v0  ;;  %v5500_v52 = vld [vmem:[%s8551_s5 + $0xc] sm:$0xf]  ;;  %v4580_v54 = vld [vmem:[%s8551_s5 + $0x3b8] sm:$0xf0] }
 0x1cf   : > { %3008 = vmatpush.bf16.msrb.mxu2 %v4455_v16  ;;  %2957 = vmatpush.bf16.msra.mxu3 %v5043_v47  ;;  %v4615_v16 = vor.u32 %v5624_v37, %v4612_v15  ;;  %v4119_v47 = vor.u32 %v5500_v52, %v4116_v17  ;;  %v4724_v58 = vld [vmem:[%s8551_s5 + $0x4d8] sm:$0xf0]  ;;  %v5720_v6 = vld [vmem:[%s8551_s5 + $0x6ec] sm:$0xf] }
 0x1d0   : > { %v2585_v35 = vpop.f32.mrf.mxu2  ;;  %2974 = vmatpush.bf16.msra.mxu0 %v4167_v31  ;;  %2992 = vmatpush.bf16.msrb.mxu1 %v4295_v32  ;;  %v4247_v31 = vor.u32 %v5532_v19, %v4244_v22  ;;  %v4391_v32 = vor.u32 %v5568_v24, %v4388_v27  ;;  %v4727_v63 = vor.u32 %v5652_v55, %v4724_v58  ;;  %v4852_v25 = vld [vmem:[%s8551_s5 + $0x5d8] sm:$0xf0]  ;;  %v5612_v37 = vld [vmem:[%s8551_s5 + $0x38c] sm:$0xf] }
 0x1d1   : > { %v7542_v7 = vadd.f32 %v2585_v35, %v2568_v48  ;;  %v4276_v48 = vld [vmem:[%s8551_s5 + $0x158] sm:$0xf0]  ;;  %v5648_v52 = vld [vmem:[%s8551_s5 + $0x4ac] sm:$0xf] }
 0x1d2   : > { %v4279_v10 = vor.u32 %v5540_v46, %v4276_v48  ;;  %v4596_v35 = vld [vmem:[%s8551_s5 + $0x3d8] sm:$0xf0]  ;;  %v5564_v48 = vld [vmem:[%s8551_s5 + $0x20c] sm:$0xf] }
 0x1d3   : > { %v2554_v49 = vpop.f32.mrf.mxu0  ;;  %v2572_v50 = vpop.f32.mrf.mxu1  ;;  %3009 = vmatpush.bf16.msrb.mxu2 %v4439_v36  ;;  %2958 = vmatpush.bf16.msra.mxu3 %v5027_v9  ;;  %v5656_v36 = vld [vmem:[%s8551_s5 + $0x4ec] sm:$0xf]  ;;  %v4599_v40 = vor.u32 %v5620_v34, %v4596_v35  ;;  %v4996_v11 = vld [vmem:[%s8551_s5 + $0x6f8] sm:$0xf0] }
 0x1d4   : > { %2975 = vmatpush.bf16.msra.mxu0 %v4151_v51  ;;  %2993 = vmatpush.bf16.msrb.mxu1 %v4279_v10  ;;  %v5688_v9 = vld [vmem:[%s8551_s5 + $0x5ec] sm:$0xf]  ;;  %v4372_v49 = vld [vmem:[%s8551_s5 + $0x218] sm:$0xf0] }
 0x1d5   : > { %2875 = vmatmul.bf16.gmra.mxu2 %v6706_v38  ;;  %v4871_v46 = vor.u32 %v5688_v9, %v4868_v42  ;;  %v4375_v10 = vor.u32 %v5564_v48, %v4372_v49  ;;  %v4564_v15 = vld [vmem:[%s8551_s5 + $0x398] sm:$0xf0]  ;;  %v5608_v34 = vld [vmem:[%s8551_s5 + $0x36c] sm:$0xf] }
 0x1d6   : > { %v4567_v17 = vor.u32 %v5612_v37, %v4564_v15  ;;  %v4708_v19 = vld [vmem:[%s8551_s5 + $0x4b8] sm:$0xf0]  ;;  %v5676_v9 = vld [vmem:[%s8551_s5 + $0x58c] sm:$0xf] }
 0x1d7   : > { %3010 = vmatpush.bf16.msrb.mxu2 %v4423_v13  ;;  %2959 = vmatpush.bf16.msra.mxu3 %v5011_v62  ;;  %v4583_v13 = vor.u32 %v5616_v53, %v4580_v54  ;;  %v4980_v24 = vld [vmem:[%s8551_s5 + $0x6d8] sm:$0xf0]  ;;  %v5604_v54 = vld [vmem:[%s8551_s5 + $0x34c] sm:$0xf] }
 0x1d8   : > { %v2588_v12 = vpop.f32.mrf.mxu2  ;;  %2976 = vmatpush.bf16.msra.mxu0 %v4135_v4  ;;  %2994 = vmatpush.bf16.msrb.mxu1 %v4263_v5  ;;  %v4855_v5 = vor.u32 %v5684_v57, %v4852_v25  ;;  %v4548_v35 = vld [vmem:[%s8551_s5 + $0x378] sm:$0xf0]  ;;  %v5640_v55 = vld [vmem:[%s8551_s5 + $0x46c] sm:$0xf] }
 0x1d9   : > { %v7593_v1 = vadd.f32 %v2588_v12, %v2571_v21  ;;  %v4999_v12 = vor.u32 %v5720_v6, %v4996_v11  ;;  %v4820_v42 = vld [vmem:[%s8551_s5 + $0x598] sm:$0xf0]  ;;  %v5600_v37 = vld [vmem:[%s8551_s5 + $0x32c] sm:$0xf] }
 0x1da   : > { %2888 = vmatmul.bf16.vlgmr.msrb.gmra.mxu3 %v6744_v2  ;;  %v4823_v49 = vor.u32 %v5676_v9, %v4820_v42  ;;  %v4804_v25 = vld [vmem:[%s8551_s5 + $0x578] sm:$0xf0]  ;;  %v5664_v9 = vld [vmem:[%s8551_s5 + $0x52c] sm:$0xf] }
 0x1db   : > { %v2619_v20 = vpop.f32.mrf.mxu0  ;;  %v2637_v21 = vpop.f32.mrf.mxu1  ;;  %3011 = vmatpush.bf16.msrb.mxu2 %v4407_v14  ;;  %3024 = vmatpush.bf16.msrb.mxu3 %v4615_v16  ;;  %v4516_v15 = vld [vmem:[%s8551_s5 + $0x338] sm:$0xf0] }
 0x1dc   : > { %2977 = vmatpush.bf16.msra.mxu0 %v4119_v47  ;;  %2995 = vmatpush.bf16.msrb.mxu1 %v4247_v31  ;;  %v4711_v47 = vor.u32 %v5648_v52, %v4708_v19  ;;  %v5636_v52 = vld [vmem:[%s8551_s5 + $0x44c] sm:$0xf]  ;;  %v4660_v19 = vld [vmem:[%s8551_s5 + $0x458] sm:$0xf0] }
 0x1dd   : > { %v2601_v33 = vpop.f32.mrf.mxu3  ;;  %v4772_v42 = vld [vmem:[%s8551_s5 + $0x538] sm:$0xf0] }
 0x1de   : > { %v2602_v8 = vadd.f32 %v2601_v33, %v7488_v60  ;;  %2906 = vmatmul.bf16.vlgmr.msrb.gmra.mxu0 %v6772_v28  ;;  %2924 = vmatmul.bf16.vlgmr.msra.gmra.mxu1 %v6774_v29  ;;  %v4743_v60 = vor.u32 %v5656_v36, %v4740_v41  ;;  %v5644_v36 = vld [vmem:[%s8551_s5 + $0x48c] sm:$0xf]  ;;  %v4692_v41 = vld [vmem:[%s8551_s5 + $0x498] sm:$0xf0] }
 0x1df   : > { %3012 = vmatpush.bf16.msrb.mxu2 %v4391_v32  ;;  %3025 = vmatpush.bf16.msrb.mxu3 %v4599_v40  ;;  %v4551_v40 = vor.u32 %v5608_v34, %v4548_v35  ;;  %v4695_v48 = vor.u32 %v5644_v36, %v4692_v41  ;;  %v5596_v35 = vld [vmem:[%s8551_s5 + $0x30c] sm:$0xf]  ;;  %v4500_v36 = vld [vmem:[%s8551_s5 + $0x318] sm:$0xf0] }
 0x1e0   : > { %v2620_v50 = vadd.f32 %v2619_v20, %v2602_v8  ;;  %v2590_v51 = vpop.f32.mrf.mxu2  ;;  %3042 = vmatpush.bf16.msrb.mxu0 %v4743_v60  ;;  %3060 = vmatpush.bf16.msra.mxu1 %v4871_v46  ;;  %v5680_v20 = vld [vmem:[%s8551_s5 + $0x5ac] sm:$0xf]  ;;  %v4644_v41 = vld [vmem:[%s8551_s5 + $0x438] sm:$0xf0] }
 0x1e1   : > { %v4964_v51 = vld [vmem:[%s8551_s5 + $0x6b8] sm:$0xf0] }
 0x1e2   : > { %v2638_v62 = vadd.f32 %v2637_v21, %v2620_v50  ;;  %v4836_v21 = vld [vmem:[%s8551_s5 + $0x5b8] sm:$0xf0]  ;;  %v5712_v50 = vld [vmem:[%s8551_s5 + $0x6ac] sm:$0xf] }
 0x1e3   : > { %v2621_v3 = vpop.f32.mrf.mxu0  ;;  %v2639_v4 = vpop.f32.mrf.mxu1  ;;  %3013 = vmatpush.bf16.msrb.mxu2 %v4375_v10  ;;  %3026 = vmatpush.bf16.msrb.mxu3 %v4583_v13  ;;  %v4839_v22 = vor.u32 %v5680_v20, %v4836_v21  ;;  %v4967_v10 = vor.u32 %v5712_v50, %v4964_v51  ;;  %v4532_v13 = vld [vmem:[%s8551_s5 + $0x358] sm:$0xf0]  ;;  %v5668_v20 = vld [vmem:[%s8551_s5 + $0x54c] sm:$0xf] }
 0x1e4   : > { %3043 = vmatpush.bf16.msrb.mxu0 %v4727_v63  ;;  %3061 = vmatpush.bf16.msra.mxu1 %v4855_v5  ;;  %v4535_v57 = vor.u32 %v5604_v54, %v4532_v13  ;;  %v5672_v63 = vld [vmem:[%s8551_s5 + $0x56c] sm:$0xf]  ;;  %v4948_v5 = vld [vmem:[%s8551_s5 + $0x698] sm:$0xf0] }
 0x1e5   : > { %2942 = vmatmul.bf16.vlgmr.msra.gmra.mxu2 %v6826_v61  ;;  %v2603_v14 = vpop.f32.mrf.mxu3  ;;  %v4788_v21 = vld [vmem:[%s8551_s5 + $0x558] sm:$0xf0]  ;;  %v5628_v13 = vld [vmem:[%s8551_s5 + $0x40c] sm:$0xf] }
 0x1e6   : > { %v2604_v16 = vadd.f32 %v2603_v14, %v7542_v7  ;;  %v5716_v7 = vld [vmem:[%s8551_s5 + $0x6cc] sm:$0xf]  ;;  %v5124_v54 = vld [vmem:[%s8551_s5 + $0x7f8] sm:$0xf0] }
 0x1e7   : > { %3078 = vmatpush.bf16.msra.mxu2 %v4999_v12  ;;  %3027 = vmatpush.bf16.msrb.mxu3 %v4567_v17  ;;  %v4983_v32 = vor.u32 %v5716_v7, %v4980_v24  ;;  %v4519_v17 = vor.u32 %v5600_v37, %v4516_v15  ;;  %v4663_v7 = vor.u32 %v5636_v52, %v4660_v19  ;;  %v5108_v37 = vld [vmem:[%s8551_s5 + $0x7d8] sm:$0xf0]  ;;  %v5186_v15 = vld [vmem:[%s8553_s7 + $0x70] sm:$0xf]  ;;  %v5692_v19 = vld [vmem:[%s8551_s5 + $0x60c] sm:$0xf] }
 0x1e8   : > { %v2622_v27 = vadd.f32 %v2621_v3, %v2604_v16  ;;  %v2655_v31 = vpop.f32.mrf.mxu2  ;;  %3044 = vmatpush.bf16.msrb.mxu0 %v4711_v47  ;;  %3062 = vmatpush.bf16.msra.mxu1 %v4839_v22  ;;  %v4807_v3 = vor.u32 %v5672_v63, %v4804_v25  ;;  %v4791_v24 = vor.u32 %v5668_v20, %v4788_v21  ;;  %v4884_v20 = vld [vmem:[%s8551_s5 + $0x618] sm:$0xf0] }
 0x1e9   : > { %v7697_v33 = vadd.f32 %v2655_v31, %v2638_v62  ;;  %v4676_v62 = vld [vmem:[%s8551_s5 + $0x478] sm:$0xf0] }
 0x1ea   : > { %2893 = vmatmul.bf16.gmra.mxu3 %v6862_v30  ;;  %v2640_v8 = vadd.f32 %v2639_v4, %v2622_v27  ;;  %v5708_v4 = vld [vmem:[%s8551_s5 + $0x68c] sm:$0xf]  ;;  %v4932_v31 = vld [vmem:[%s8551_s5 + $0x678] sm:$0xf0] }
 0x1eb   : > { %v2624_v60 = vpop.f32.mrf.mxu0  ;;  %v2642_v46 = vpop.f32.mrf.mxu1  ;;  %3079 = vmatpush.bf16.msra.mxu2 %v4983_v32  ;;  %3028 = vmatpush.bf16.msrb.mxu3 %v4551_v40  ;;  %v4951_v12 = vor.u32 %v5708_v4, %v4948_v5  ;;  %v5704_v27 = vld [vmem:[%s8551_s5 + $0x66c] sm:$0xf]  ;;  %v4503_v40 = vor.u32 %v5596_v35, %v4500_v36  ;;  %v4900_v5 = vld [vmem:[%s8551_s5 + $0x638] sm:$0xf0] }
 0x1ec   : > { %3045 = vmatpush.bf16.msrb.mxu0 %v4695_v48  ;;  %3063 = vmatpush.bf16.msra.mxu1 %v4823_v49  ;;  %v4935_v32 = vor.u32 %v5704_v27, %v4932_v31  ;;  %v5700_v48 = vld [vmem:[%s8551_s5 + $0x64c] sm:$0xf]  ;;  %v4916_v49 = vld [vmem:[%s8551_s5 + $0x658] sm:$0xf0] }
 0x1ed   : > { %v2606_v53 = vpop.f32.mrf.mxu3  ;;  %v4919_v51 = vor.u32 %v5700_v48, %v4916_v49  ;;  %v5696_v4 = vld [vmem:[%s8551_s5 + $0x62c] sm:$0xf]  ;;  %v5162_v49 = vld [vmem:[%s8553_s7 + $0x40] sm:$0xf] }
 0x1ee   : > { %v2607_v58 = vadd.f32 %v2606_v53, %v7593_v1  ;;  %2911 = vmatmul.bf16.gmra.mxu0 %v6890_v44  ;;  %2929 = vmatmul.bf16.gmra.mxu1 %v6892_v45  ;;  %v4679_v1 = vor.u32 %v5640_v55, %v4676_v62  ;;  %v5752_v53 = vld [vmem:[%s8551_s5 + $0x7ec] sm:$0xf]  ;;  %v4756_v62 = vld [vmem:[%s8551_s5 + $0x518] sm:$0xf0] }
 0x1ef   : > { %3080 = vmatpush.bf16.msra.mxu2 %v4967_v10  ;;  %3029 = vmatpush.bf16.msrb.mxu3 %v4535_v57  ;;  %v5127_v55 = vor.u32 %v5752_v53, %v5124_v54  ;;  %v5660_v57 = vld [vmem:[%s8551_s5 + $0x50c] sm:$0xf]  ;;  %v5764_v53 = vld [vmem:[%s8553_s7 + $0x44] sm:$0xf0] }
 0x1f0   : > { %v2625_v6 = vadd.f32 %v2624_v60, %v2607_v58  ;;  %v2657_v11 = vpop.f32.mrf.mxu2  ;;  %3046 = vmatpush.bf16.msrb.mxu0 %v4679_v1  ;;  %3064 = vmatpush.bf16.msra.mxu1 %v4807_v3  ;;  %v4628_v58 = vld [vmem:[%s8551_s5 + $0x418] sm:$0xf0]  ;;  %v4759_v3 = vor.u32 %v5660_v57, %v4756_v62  ;;  %v5740_v36 = vld [vmem:[%s8551_s5 + $0x78c] sm:$0xf]  ;;  %v5786_v57 = vld [vmem:[%s8553_s7 + $0xf4] sm:$0xf0] }
 0x1f1   : > { %v7751_v14 = vadd.f32 %v2657_v11, %v2640_v8  ;;  %v5632_v8 = vld [vmem:[%s8551_s5 + $0x42c] sm:$0xf]  ;;  %v4631_v1 = vor.u32 %v5628_v13, %v4628_v58  ;;  %v5250_v58 = vld [vmem:[%s8553_s7 + $0xf0] sm:$0xf] }
 0x1f2   : > { %v2643_v16 = vadd.f32 %v2642_v46, %v2625_v6  ;;  %v4647_v60 = vor.u32 %v5632_v8, %v4644_v41  ;;  %v4775_v46 = vor.u32 %v5664_v9, %v4772_v42  ;;  %v4903_v6 = vor.u32 %v5696_v4, %v4900_v5  ;;  %v5076_v8 = vld [vmem:[%s8551_s5 + $0x798] sm:$0xf0]  ;;  %v5736_v48 = vld [vmem:[%s8551_s5 + $0x76c] sm:$0xf]  ;;  %v5154_v5 = vld [vmem:[%s8553_s7 + $0x30] sm:$0xf] }
 0x1f3   : > { %v2626_v47 = vpop.f32.mrf.mxu0  ;;  %v2644_v22 = vpop.f32.mrf.mxu1  ;;  %3081 = vmatpush.bf16.msra.mxu2 %v4951_v12  ;;  %3030 = vmatpush.bf16.msrb.mxu3 %v4519_v17  ;;  %v5748_v12 = vld [vmem:[%s8551_s5 + $0x7cc] sm:$0xf]  ;;  %v5251_v62 = vor.u32 %v5786_v57, %v5250_v58  ;;  %v5044_v4 = vld [vmem:[%s8551_s5 + $0x758] sm:$0xf0] }
 0x1f4   : > { %3047 = vmatpush.bf16.msrb.mxu0 %v4663_v7  ;;  %3065 = vmatpush.bf16.msra.mxu1 %v4791_v24  ;;  %v5111_v52 = vor.u32 %v5748_v12, %v5108_v37  ;;  %v5092_v47 = vld [vmem:[%s8551_s5 + $0x7b8] sm:$0xf0]  ;;  %v5178_v7 = vld [vmem:[%s8553_s7 + $0x60] sm:$0xf]  ;;  %v5768_v24 = vld [vmem:[%s8553_s7 + $0x64] sm:$0xf0] }
 0x1f5   : > { %2947 = vmatmul.bf16.gmra.mxu2 %v6942_v18  ;;  %v2608_v34 = vpop.f32.mrf.mxu3  ;;  %v5179_v27 = vor.u32 %v5768_v24, %v5178_v7  ;;  %v5242_v37 = vld [vmem:[%s8553_s7 + $0xe0] sm:$0xf]  ;;  %v5188_v58 = vld [vmem:[%s8553_s7 + $0x78] sm:$0xf0] }
 0x1f7   : > { %3082 = vmatpush.bf16.msra.mxu2 %v4935_v32  ;;  %3031 = vmatpush.bf16.msrb.mxu3 %v4503_v40  ;;  %v5170_v40 = vld [vmem:[%s8553_s7 + $0x50] sm:$0xf] }
 0x1f8   : > { %v2660_v50 = vpop.f32.mrf.mxu2  ;;  %3048 = vmatpush.bf16.msrb.mxu0 %v4647_v60  ;;  %3066 = vmatpush.bf16.msra.mxu1 %v4775_v46 }
 0x1f9   : > { %v7802_v10 = vadd.f32 %v2660_v50, %v2643_v16  ;;  %v5770_v16 = vld [vmem:[%s8553_s7 + $0x74] sm:$0xf0] }
 0x1fa   : > { %2960 = vmatmul.bf16.vlgmr.msra.gmra.mxu3 %v6976_v39  ;;  %v5187_v17 = vor.u32 %v5770_v16, %v5186_v15  ;;  %v5784_v15 = vld [vmem:[%s8553_s7 + $0xe4] sm:$0xf0]  ;;  %v5028_v16 = vld [vmem:[%s8551_s5 + $0x738] sm:$0xf0] }
 0x1fb   : > { %v7823_v63 = vpop.f32.mrf.mxu0  ;;  %v7825_v25 = vpop.f32.mrf.mxu1  ;;  %3083 = vmatpush.bf16.msra.mxu2 %v4919_v51  ;;  %3096 = vmatpush.bf16.msra.mxu3 %v5127_v55  ;;  %v5163_v55 = vor.u32 %v5764_v53, %v5162_v49  ;;  %v5218_v49 = vld [vmem:[%s8553_s7 + $0xb0] sm:$0xf] }
 0x1fc   : > { %3049 = vmatpush.bf16.msrb.mxu0 %v4631_v1  ;;  %3067 = vmatpush.bf16.msra.mxu1 %v4759_v3  ;;  %v5732_v3 = vld [vmem:[%s8551_s5 + $0x74c] sm:$0xf] }
 0x1fd   : > { %v2673_v11 = vpop.f32.mrf.mxu3 }
 0x1fe   : > { %2978 = vmatmul.bf16.vlgmr.msra.gmra.mxu0 %v6528_v56  ;;  %2996 = vmatmul.bf16.vlgmr.msrb.gmra.mxu1 %v6530_v59  ;;  %v4887_v56 = vor.u32 %v5692_v19, %v4884_v20  ;;  %v5744_v59 = vld [vmem:[%s8551_s5 + $0x7ac] sm:$0xf]  ;;  %v2674_v34 = vadd.f32 %v2673_v11, %v7697_v33  ;;  %v5079_v33 = vor.u32 %v5740_v36, %v5076_v8  ;;  %v5762_v11 = vld [vmem:[%s8553_s7 + $0x34] sm:$0xf0]  ;;  %v5760_v20 = vld [vmem:[%s8553_s7 + $0x24] sm:$0xf0] }
 0x1ff   : > { %3084 = vmatpush.bf16.msra.mxu2 %v4903_v6  ;;  %3097 = vmatpush.bf16.msra.mxu3 %v5111_v52  ;;  %v5095_v22 = vor.u32 %v5744_v59, %v5092_v47  ;;  %v5047_v6 = vor.u32 %v5732_v3, %v5044_v4  ;;  %v5155_v12 = vor.u32 %v5762_v11, %v5154_v5  ;;  %v5234_v47 = vld [vmem:[%s8553_s7 + $0xd0] sm:$0xf]  ;;  %v5758_v8 = vld [vmem:[%s8553_s7 + $0x14] sm:$0xf0]  ;;  %v5776_v3 = vld [vmem:[%s8553_s7 + $0xa4] sm:$0xf0] }
 0x200   : > { %v2662_v21 = vpop.f32.mrf.mxu2  ;;  %3524 = vmatpush.bf16.msra.mxu0 %v5187_v17  ;;  %v3114_v42 = vmax.f32 %v2674_v34, 0.0  ;;  %3542 = vmatpush.bf16.msrb.mxu1 %v5251_v62  ;;  %v5146_v17 = vld [vmem:[%s8553_s7 + $0x20] sm:$0xf]  ;;  %v5012_v34 = vld [vmem:[%s8551_s5 + $0x718] sm:$0xf0] }
 0x201   : > { %v5147_v59 = vor.u32 %v5760_v20, %v5146_v17  ;;  %v5210_v62 = vld [vmem:[%s8553_s7 + $0xa0] sm:$0xf]  ;;  %v5172_v17 = vld [vmem:[%s8553_s7 + $0x58] sm:$0xf0] }
 0x202   : > { %v5211_v5 = vor.u32 %v5776_v3, %v5210_v62  ;;  %v5194_v20 = vld [vmem:[%s8553_s7 + $0x80] sm:$0xf] }
 0x203   : > { %v7865_v31 = vpop.f32.mrf.mxu0  ;;  %v7867_v32 = vpop.f32.mrf.mxu1  ;;  %3085 = vmatpush.bf16.msra.mxu2 %v4887_v56  ;;  %3098 = vmatpush.bf16.msra.mxu3 %v5095_v22  ;;  %v5782_v22 = vld [vmem:[%s8553_s7 + $0xd4] sm:$0xf0] }
 0x204   : > { %3525 = vmatpush.bf16.msra.mxu0 %v5179_v27  ;;  %v5235_v7 = vor.u32 %v5782_v22, %v5234_v47  ;;  %v5724_v27 = vld [vmem:[%s8551_s5 + $0x70c] sm:$0xf] }
 0x205   : > { %3014 = vmatmul.bf16.vlgmr.msrb.gmra.mxu2 %v6577_v26  ;;  %v2675_v35 = vpop.f32.mrf.mxu3  ;;  %v5766_v26 = vld [vmem:[%s8553_s7 + $0x54] sm:$0xf0]  ;;  %v5015_v36 = vor.u32 %v5724_v27, %v5012_v34  ;;  %v5164_v47 = vld [vmem:[%s8553_s7 + $0x48] sm:$0xf0]  ;;  %v5785_v27 = vld [vmem:[%s8553_s7 + $0xf4] sm:$0xf] }
 0x206   : > { %v2676_v41 = vadd.f32 %v2675_v35, %v7751_v14  ;;  %v5171_v9 = vor.u32 %v5766_v26, %v5170_v40  ;;  %v5060_v14 = vld [vmem:[%s8551_s5 + $0x778] sm:$0xf0]  ;;  %v5138_v35 = vld [vmem:[%s8553_s7 + $0x10] sm:$0xf]  ;;  %v5226_v40 = vld [vmem:[%s8553_s7 + $0xc0] sm:$0xf] }
 0x207   : > { %3099 = vmatpush.bf16.msra.mxu3 %v5079_v33  ;;  %v5063_v51 = vor.u32 %v5736_v48, %v5060_v14  ;;  %v5252_v34 = vld [vmem:[%s8553_s7 + $0xf8] sm:$0xf0] }
 0x208   : > { %v3118_v60 = vmax.f32 %v2676_v41, 0.0  ;;  %v7884_v46 = vpop.f32.mrf.mxu2  ;;  %3526 = vmatpush.bf16.msra.mxu0 %v5171_v9  ;;  %v5780_v41 = vld [vmem:[%s8553_s7 + $0xc4] sm:$0xf0]  ;;  %v5130_v9 = vld [vmem:[%s8553_s7] sm:$0xf] }
 0x209   : > { %v5227_v26 = vor.u32 %v5780_v41, %v5226_v40  ;;  %v5156_v40 = vld [vmem:[%s8553_s7 + $0x38] sm:$0xf0] }
 0x20a   : > { %v7895_v50 = vpack.c.bf16 %v3118_v60, %v3114_v42  ;;  %2965 = vmatmul.bf16.gmra.mxu3 %v7079_v43  ;;  %v5756_v42 = vld [vmem:[%s8553_s7 + $0x4] sm:$0xf0] }
 0x20b   : > { %v7901_v54 = vpop.f32.mrf.mxu0  ;;  %v7903_v13 = vpop.f32.mrf.mxu1  ;;  %3100 = vmatpush.bf16.msra.mxu3 %v5063_v51  ;;  %v5131_v60 = vor.u32 %v5756_v42, %v5130_v9  ;;  %v5778_v51 = vld [vmem:[%s8553_s7 + $0xb4] sm:$0xf0]  ;;  %v5244_v9 = vld [vmem:[%s8553_s7 + $0xe8] sm:$0xf0] }
 0x20c   : > { %3527 = vmatpush.bf16.msra.mxu0 %v5163_v55  ;;  %v5219_v53 = vor.u32 %v5778_v51, %v5218_v49 }
 0x20d   : > { %v7911_v1 = vpop.f32.mrf.mxu3 }
 0x20e   : > { %2983 = vmatmul.bf16.gmra.mxu0 %v6637_v23  ;;  %3001 = vmatmul.bf16.gmra.mxu1 %v6639_v0  ;;  %v5243_v23 = vor.u32 %v5784_v15, %v5242_v37  ;;  %v5728_v0 = vld [vmem:[%s8551_s5 + $0x72c] sm:$0xf]  ;;  %v5202_v37 = vld [vmem:[%s8553_s7 + $0x90] sm:$0xf]  ;;  %v5774_v15 = vld [vmem:[%s8553_s7 + $0x94] sm:$0xf0] }
 0x20f   : > { %3101 = vmatpush.bf16.msra.mxu3 %v5047_v6  ;;  %v5031_v19 = vor.u32 %v5728_v0, %v5028_v16  ;;  %v5767_v6 = vld [vmem:[%s8553_s7 + $0x64] sm:$0xf]  ;;  %v5765_v16 = vld [vmem:[%s8553_s7 + $0x54] sm:$0xf] }
 0x210   : > { %v7933_v52 = vpop.f32.mrf.mxu2  ;;  %3528 = vmatpush.bf16.msra.mxu0 %v5155_v12  ;;  %3543 = vmatpush.bf16.msrb.mxu1 %v5243_v23  ;;  %v5203_v23 = vor.u32 %v5774_v15, %v5202_v37 }
 0x213   : > { %v2698_v21 = vpop.f32.mrf.mxu0  ;;  %v2716_v56 = vpop.f32.mrf.mxu1  ;;  %3102 = vmatpush.bf16.msra.mxu3 %v5031_v19  ;;  %v5175_v19 = vor.u32 %v5765_v16, %v5172_v17  ;;  %v5132_v16 = vld [vmem:[%s8553_s7 + $0x8] sm:$0xf0] }
 0x214   : > { %3529 = vmatpush.bf16.msra.mxu0 %v5147_v59  ;;  %3544 = vmatpush.bf16.msrb.mxu1 %v5235_v7  ;;  %v5763_v59 = vld [vmem:[%s8553_s7 + $0x44] sm:$0xf] }
 0x215   : > { %3019 = vmatmul.bf16.gmra.mxu2 %v6706_v38  ;;  %v2680_v24 = vpop.f32.mrf.mxu3  ;;  %v5139_v38 = vor.u32 %v5758_v8, %v5138_v35  ;;  %v5167_v22 = vor.u32 %v5763_v59, %v5164_v47  ;;  %v8060_v35 = vld [vmem:[%s8552_s6] sm:$0xf] }
 0x217   : > { %3103 = vmatpush.bf16.msra.mxu3 %v5015_v36  ;;  %v5255_v36 = vor.u32 %v5785_v27, %v5252_v34  ;;  %v5212_v27 = vld [vmem:[%s8553_s7 + $0xa8] sm:$0xf0] }
 0x218   : > { %v7972_v33 = vpop.f32.mrf.mxu2  ;;  %3530 = vmatpush.bf16.msra.mxu0 %v5139_v38  ;;  %3545 = vmatpush.bf16.msrb.mxu1 %v5227_v26  ;;  %v5761_v38 = vld [vmem:[%s8553_s7 + $0x34] sm:$0xf]  ;;  %v5783_v26 = vld [vmem:[%s8553_s7 + $0xe4] sm:$0xf] }
 0x219   : > { %v5159_v41 = vor.u32 %v5761_v38, %v5156_v40  ;;  %v5247_v49 = vor.u32 %v5783_v26, %v5244_v9 }
 0x21a   : > { %3032 = vmatmul.bf16.vlgmr.msrb.gmra.mxu3 %v6744_v2  ;;  %v5769_v2 = vld [vmem:[%s8553_s7 + $0x74] sm:$0xf] }
 0x21b   : > { %v7981_v48 = vpop.f32.mrf.mxu0  ;;  %v7983_v14 = vpop.f32.mrf.mxu1  ;;  %v5191_v57 = vor.u32 %v5769_v2, %v5188_v58 }
 0x21c   : > { %3531 = vmatpush.bf16.msra.mxu0 %v5131_v60  ;;  %3546 = vmatpush.bf16.msrb.mxu1 %v5219_v53 }
 0x21d   : > { %v7991_v55 = vpop.f32.mrf.mxu3 }
 0x21e   : > { %3050 = vmatmul.bf16.vlgmr.msrb.gmra.mxu0 %v6772_v28  ;;  %3068 = vmatmul.bf16.vlgmr.msra.gmra.mxu1 %v6774_v29  ;;  %v5180_v28 = vld [vmem:[%s8553_s7 + $0x68] sm:$0xf0] }
 0x21f   : > { %v5183_v29 = vor.u32 %v5767_v6, %v5180_v28 }
 0x220   : > { %v2734_v4 = vpop.f32.mrf.mxu2  ;;  %3596 = vmatpush.bf16.msrb.mxu0 %v5191_v57  ;;  %3547 = vmatpush.bf16.msrb.mxu1 %v5211_v5  ;;  %v5236_v57 = vld [vmem:[%s8553_s7 + $0xd8] sm:$0xf0] }
 0x221   : > { %v5140_v5 = vld [vmem:[%s8553_s7 + $0x18] sm:$0xf0] }
 0x223   : > { %v8013_v11 = vpop.f32.mrf.mxu0  ;;  %v8015_v12 = vpop.f32.mrf.mxu1 }
 0x224   : > { %3597 = vmatpush.bf16.msrb.mxu0 %v5183_v29  ;;  %3548 = vmatpush.bf16.msrb.mxu1 %v5203_v23 }
 0x225   : > { %3086 = vmatmul.bf16.vlgmr.msra.gmra.mxu2 %v6826_v61  ;;  %v8024_v0 = vpop.f32.mrf.mxu3  ;;  %v5772_v61 = vld [vmem:[%s8553_s7 + $0x84] sm:$0xf0] }
 0x226   : > { %v5195_v56 = vor.u32 %v5772_v61, %v5194_v20  ;;  %v5777_v20 = vld [vmem:[%s8553_s7 + $0xb4] sm:$0xf]  ;;  %v5220_v61 = vld [vmem:[%s8553_s7 + $0xb8] sm:$0xf0] }
 0x228   : > { %v8038_v21 = vpop.f32.mrf.mxu2  ;;  %3598 = vmatpush.bf16.msrb.mxu0 %v5175_v19  ;;  %3549 = vmatpush.bf16.msrb.mxu1 %v5195_v56 }
 0x22a   : > { %3037 = vmatmul.bf16.gmra.mxu3 %v6862_v30  ;;  %v1251_v30 = vperm.slane %v8060_v35, 1 }
 0x22b   : > { %v8047_v7 = vpop.f32.mrf.mxu0  ;;  %v8049_v24 = vpop.f32.mrf.mxu1 }
 0x22c   : > { %3599 = vmatpush.bf16.msrb.mxu0 %v5167_v22  ;;  %3614 = vmatpush.bf16.msra.mxu1 %v5255_v36  ;;  %v2692_v42 = vadd.f32 %v7823_v63, %v1251_v30  ;;  %v2694_v51 = vadd.f32 %v7865_v31, %v1251_v30  ;;  %v5781_v63 = vld [vmem:[%s8553_s7 + $0xd4] sm:$0xf]  ;;  %v5775_v22 = vld [vmem:[%s8553_s7 + $0xa4] sm:$0xf] }
 0x22d   : > { %v8063_v8 = vpop.f32.mrf.mxu3  ;;  %v5239_v3 = vor.u32 %v5781_v63, %v5236_v57  ;;  %v5757_v31 = vld [vmem:[%s8553_s7 + $0x14] sm:$0xf]  ;;  %v5215_v36 = vor.u32 %v5775_v22, %v5212_v27  ;;  %v5314_v57 = vld [vmem:[%s8553_s7 + $0x170] sm:$0xf]  ;;  %v5274_v27 = vld [vmem:[%s8553_s7 + $0x120] sm:$0xf] }
 0x22e   : > { %3055 = vmatmul.bf16.gmra.mxu0 %v6890_v44  ;;  %3073 = vmatmul.bf16.gmra.mxu1 %v6892_v45  ;;  %v5759_v44 = vld [vmem:[%s8553_s7 + $0x24] sm:$0xf]  ;;  %v5148_v45 = vld [vmem:[%s8553_s7 + $0x28] sm:$0xf0]  ;;  %v2710_v62 = vadd.f32 %v7825_v25, %v2692_v42  ;;  %v2712_v6 = vadd.f32 %v7867_v32, %v2694_v51  ;;  %v5143_v29 = vor.u32 %v5757_v31, %v5140_v5  ;;  %v5306_v31 = vld [vmem:[%s8553_s7 + $0x160] sm:$0xf] }
 0x22f   : > { %v5151_v53 = vor.u32 %v5759_v44, %v5148_v45  ;;  %v5779_v25 = vld [vmem:[%s8553_s7 + $0xc4] sm:$0xf]  ;;  %v5196_v44 = vld [vmem:[%s8553_s7 + $0x88] sm:$0xf0]  ;;  %v5800_v5 = vld [vmem:[%s8553_s7 + $0x164] sm:$0xf0] }
 0x230   : > { %v8080_v60 = vpop.f32.mrf.mxu2  ;;  %3600 = vmatpush.bf16.msrb.mxu0 %v5159_v41  ;;  %3615 = vmatpush.bf16.msra.mxu1 %v5247_v49  ;;  %v2728_v28 = vadd.f32 %v7884_v46, %v2710_v62  ;;  %v2730_v37 = vadd.f32 %v7933_v52, %v2712_v6  ;;  %v5755_v46 = vld [vmem:[%s8553_s7 + $0x4] sm:$0xf]  ;;  %v5802_v62 = vld [vmem:[%s8553_s7 + $0x174] sm:$0xf0] }
 0x231   : > { %v5135_v19 = vor.u32 %v5755_v46, %v5132_v16  ;;  %v5771_v49 = vld [vmem:[%s8553_s7 + $0x84] sm:$0xf] }
 0x232   : > { %v2746_v15 = vadd.f32 %v7991_v55, %v2728_v28  ;;  %v2748_v17 = vadd.f32 %v8024_v0, %v2730_v37  ;;  %v5223_v0 = vor.u32 %v5777_v20, %v5220_v61 }
 0x233   : > { %v2770_v2 = vpop.f32.mrf.mxu0  ;;  %v2788_v58 = vpop.f32.mrf.mxu1 }
 0x234   : > { %3601 = vmatpush.bf16.msrb.mxu0 %v5151_v53  ;;  %3616 = vmatpush.bf16.msra.mxu1 %v5239_v3  ;;  %v2764_v56 = vadd.f32 %v7981_v48, %v2746_v15  ;;  %v2766_v47 = vadd.f32 %v8013_v11, %v2748_v17  ;;  %v5798_v15 = vld [vmem:[%s8553_s7 + $0x154] sm:$0xf0]  ;;  %v5796_v17 = vld [vmem:[%s8553_s7 + $0x144] sm:$0xf0] }
 0x235   : > { %3091 = vmatmul.bf16.gmra.mxu2 %v6942_v18  ;;  %v2752_v4 = vpop.f32.mrf.mxu3  ;;  %v5228_v18 = vld [vmem:[%s8553_s7 + $0xc8] sm:$0xf0] }
 0x236   : > { %v5231_v32 = vor.u32 %v5779_v25, %v5228_v18  ;;  %v2782_v48 = vadd.f32 %v7983_v14, %v2764_v56  ;;  %v2784_v11 = vadd.f32 %v8015_v12, %v2766_v47  ;;  %v5773_v14 = vld [vmem:[%s8553_s7 + $0x94] sm:$0xf] }
 0x238   : > { %v8113_v23 = vpop.f32.mrf.mxu2  ;;  %3602 = vmatpush.bf16.msrb.mxu0 %v5143_v29  ;;  %3617 = vmatpush.bf16.msra.mxu1 %v5231_v32  ;;  %v2802_v12 = vadd.f32 %v8080_v60, %v2784_v11  ;;  %v5199_v60 = vor.u32 %v5771_v49, %v5196_v44  ;;  %v5307_v29 = vor.u32 %v5800_v5, %v5306_v31  ;;  %v5266_v11 = vld [vmem:[%s8553_s7 + $0x110] sm:$0xf]  ;;  %v1252_v49 = vperm.slane %v8060_v35, 2 }
 0x23a   : > { %3104 = vmatmul.bf16.vlgmr.msra.gmra.mxu3 %v6976_v39  ;;  %v2697_v39 = vadd.f32 %v7901_v54, %v1251_v30  ;;  %v2800_v54 = vadd.f32 %v8038_v21, %v2782_v48  ;;  %v2679_v30 = vadd.f32 %v7911_v1, %v7802_v10  ;;  %v5792_v48 = vld [vmem:[%s8553_s7 + $0x124] sm:$0xf0] }
 0x23b   : > { %v8123_v52 = vpop.f32.mrf.mxu0  ;;  %v8125_v55 = vpop.f32.mrf.mxu1 }
 0x23c   : > { %3603 = vmatpush.bf16.msrb.mxu0 %v5135_v19  ;;  %3618 = vmatpush.bf16.msra.mxu1 %v5223_v0  ;;  %v2715_v38 = vadd.f32 %v7903_v13, %v2697_v39  ;;  %v5204_v13 = vld [vmem:[%s8553_s7 + $0x98] sm:$0xf0]  ;;  %v3122_v45 = vmax.f32 %v2679_v30, 0.0  ;;  %v5794_v39 = vld [vmem:[%s8553_s7 + $0x134] sm:$0xf0] }
 0x23d   : > { %v2817_v59 = vpop.f32.mrf.mxu3  ;;  %v5207_v9 = vor.u32 %v5773_v14, %v5204_v13  ;;  %v5258_v13 = vld [vmem:[%s8553_s7 + $0x100] sm:$0xf] }
 0x23e   : > { %3532 = vmatmul.bf16.vlgmr.msra.gmra.mxu0 %v7895_v50  ;;  %v2733_v21 = vadd.f32 %v7972_v33, %v2715_v38  ;;  %v2818_v26 = vadd.f32 %v2817_v59, %v2800_v54  ;;  %v3130_v3 = vpack.c.bf16 %v3122_v45, %v3122_v45  ;;  %v5282_v59 = vld [vmem:[%s8553_s7 + $0x130] sm:$0xf] }
 0x23f   : > { %v5283_v47 = vor.u32 %v5794_v39, %v5282_v59  ;;  %v5276_v59 = vld [vmem:[%s8553_s7 + $0x128] sm:$0xf0] }
 0x240   : > { %v2806_v34 = vpop.f32.mrf.mxu2  ;;  %3619 = vmatpush.bf16.msra.mxu1 %v5215_v36  ;;  %v2751_v1 = vadd.f32 %v8063_v8, %v2733_v21  ;;  %v3115_v51 = vmax.f32 %v2818_v26, 0.0  ;;  %v5275_v36 = vor.u32 %v5792_v48, %v5274_v27  ;;  %v5788_v21 = vld [vmem:[%s8553_s7 + $0x104] sm:$0xf0] }
 0x241   : > { %v5259_v26 = vor.u32 %v5788_v21, %v5258_v13  ;;  %v5260_v13 = vld [vmem:[%s8553_s7 + $0x108] sm:$0xf0] }
 0x242   : > { %v2769_v2 = vadd.f32 %v8047_v7, %v2751_v1  ;;  %v5315_v7 = vor.u32 %v5802_v62, %v5314_v57  ;;  %v5801_v1 = vld [vmem:[%s8553_s7 + $0x174] sm:$0xf] }
 0x243   : > { %v8149_v40 = vpop.f32.mrf.mxu0  ;;  %v8151_v41 = vpop.f32.mrf.mxu1 }
 0x244   : > { %3620 = vmatpush.bf16.msra.mxu1 %v5207_v9  ;;  %3560 = vmatpush.bf16.msrb.mxu2 %v5315_v7  ;;  %v2838_v62 = vadd.f32 %v8149_v40, %v1252_v49  ;;  %v5795_v40 = vld [vmem:[%s8553_s7 + $0x144] sm:$0xf] }
 0x245   : > { %v2819_v10 = vpop.f32.mrf.mxu3 }
 0x246   : > { %v2820_v42 = vadd.f32 %v2819_v10, %v2802_v12 }
 0x248   : > { %v3119_v33 = vmax.f32 %v2820_v42, 0.0  ;;  %v8168_v53 = vpop.f32.mrf.mxu2  ;;  %3621 = vmatpush.bf16.msra.mxu1 %v5199_v60  ;;  %3561 = vmatpush.bf16.msrb.mxu2 %v5307_v29  ;;  %v5316_v42 = vld [vmem:[%s8553_s7 + $0x178] sm:$0xf0]  ;;  %v2836_v60 = vadd.f32 %v8123_v52, %v1252_v49  ;;  %v2856_v52 = vadd.f32 %v8151_v41, %v2838_v62  ;;  %v5292_v29 = vld [vmem:[%s8553_s7 + $0x148] sm:$0xf0] }
 0x249   : > { %v5319_v44 = vor.u32 %v5801_v1, %v5316_v42 }
 0x24a   : > { %v8171_v58 = vpack.c.bf16 %v3119_v33, %v3115_v51  ;;  %3109 = vmatmul.bf16.gmra.mxu3 %v7079_v43  ;;  %v2787_v43 = vadd.f32 %v8049_v24, %v2769_v2  ;;  %v5298_v24 = vld [vmem:[%s8553_s7 + $0x150] sm:$0xf]  ;;  %v5799_v51 = vld [vmem:[%s8553_s7 + $0x164] sm:$0xf]  ;;  %v5308_v33 = vld [vmem:[%s8553_s7 + $0x168] sm:$0xf0] }
 0x24b   : > { %v8174_v8 = vpop.f32.mrf.mxu0  ;;  %v8176_v63 = vpop.f32.mrf.mxu1  ;;  %v5299_v32 = vor.u32 %v5798_v15, %v5298_v24  ;;  %v5311_v57 = vor.u32 %v5799_v51, %v5308_v33  ;;  %v5818_v51 = vld [vmem:[%s8553_s7 + $0x1f4] sm:$0xf0] }
 0x24c   : > { %3550 = vmatmul.bf16.vlgmr.msrb.gmra.mxu1 %v8171_v58  ;;  %v2805_v6 = vadd.f32 %v8113_v23, %v2787_v43  ;;  %v5290_v23 = vld [vmem:[%s8553_s7 + $0x140] sm:$0xf]  ;;  %v2854_v43 = vadd.f32 %v8125_v55, %v2836_v60  ;;  %v5295_v55 = vor.u32 %v5795_v40, %v5292_v29  ;;  %v5812_v29 = vld [vmem:[%s8553_s7 + $0x1c4] sm:$0xf0] }
 0x24d   : > { %v2822_v4 = vpop.f32.mrf.mxu3  ;;  %3562 = vmatpush.bf16.msrb.mxu2 %v5299_v32  ;;  %v5291_v20 = vor.u32 %v5796_v17, %v5290_v23  ;;  %v5284_v32 = vld [vmem:[%s8553_s7 + $0x138] sm:$0xf0]  ;;  %v2841_v23 = vadd.f32 %v8174_v8, %v1252_v49  ;;  %v5354_v40 = vld [vmem:[%s8553_s7 + $0x1c0] sm:$0xf] }
 0x24e   : > { %3537 = vmatmul.bf16.gmra.mxu0 %v3130_v3  ;;  %v2823_v25 = vadd.f32 %v2822_v4, %v2805_v6  ;;  %v5300_v4 = vld [vmem:[%s8553_s7 + $0x158] sm:$0xf0]  ;;  %v2872_v6 = vadd.f32 %v8168_v53, %v2854_v43  ;;  %v5793_v53 = vld [vmem:[%s8553_s7 + $0x134] sm:$0xf] }
 0x250   : > { %v8193_v28 = vpop.f32.mrf.mxu2  ;;  %v3123_v16 = vmax.f32 %v2823_v25, 0.0 }
 0x251   : > { %3563 = vmatpush.bf16.msrb.mxu2 %v5291_v20  ;;  %v2874_v25 = vadd.f32 %v8193_v28, %v2856_v52  ;;  %v5287_v28 = vor.u32 %v5793_v53, %v5284_v32  ;;  %v5791_v20 = vld [vmem:[%s8553_s7 + $0x124] sm:$0xf]  ;;  %v5346_v53 = vld [vmem:[%s8553_s7 + $0x1b0] sm:$0xf]  ;;  %v5810_v32 = vld [vmem:[%s8553_s7 + $0x1b4] sm:$0xf0] }
 0x252   : > { %v8209_v61 = vpack.c.bf16 %v3123_v16, %v3123_v16 }
 0x253   : > { %v2842_v18 = vpop.f32.mrf.mxu0  ;;  %v2860_v37 = vpop.f32.mrf.mxu1 }
 0x255   : > { %v2824_v46 = vpop.f32.mrf.mxu3  ;;  %3564 = vmatpush.bf16.msrb.mxu2 %v5283_v47 }
 0x258   : > { %v8207_v19 = vpop.f32.mrf.mxu2 }
 0x259   : > { %3565 = vmatpush.bf16.msrb.mxu2 %v5275_v36 }
 0x25b   : > { %v8211_v56 = vpop.f32.mrf.mxu0  ;;  %v8213_v0 = vpop.f32.mrf.mxu1 }
 0x25c   : > { %3555 = vmatmul.bf16.gmra.mxu1 %v8209_v61 }
 0x25d   : > { %v2889_v22 = vpop.f32.mrf.mxu3 }
 0x25e   : > { %3604 = vmatmul.bf16.vlgmr.msrb.gmra.mxu0 %v7895_v50  ;;  %v5790_v50 = vld [vmem:[%s8553_s7 + $0x114] sm:$0xf0]  ;;  %v2890_v18 = vadd.f32 %v2889_v22, %v2872_v6 }
 0x25f   : > { %v5267_v30 = vor.u32 %v5790_v50, %v5266_v11 }
 0x260   : > { %v2878_v34 = vpop.f32.mrf.mxu2  ;;  %v2908_v46 = vadd.f32 %v8211_v56, %v2890_v18  ;;  %v5279_v56 = vor.u32 %v5791_v20, %v5276_v59  ;;  %v5355_v18 = vor.u32 %v5812_v29, %v5354_v40 }
 0x261   : > { %3566 = vmatpush.bf16.msrb.mxu2 %v5267_v30  ;;  %v5789_v34 = vld [vmem:[%s8553_s7 + $0x114] sm:$0xf] }
 0x262   : > { %v2926_v39 = vadd.f32 %v8213_v0, %v2908_v46  ;;  %v5268_v0 = vld [vmem:[%s8553_s7 + $0x118] sm:$0xf0]  ;;  %v5347_v46 = vor.u32 %v5810_v32, %v5346_v53  ;;  %v3198_v32 = vld [vmem:[%s8554_s8] sm:$0x3] }
 0x263   : > { %v2909_v38 = vpop.f32.mrf.mxu0  ;;  %v8229_v54 = vpop.f32.mrf.mxu1  ;;  %v5271_v11 = vor.u32 %v5789_v34, %v5268_v0  ;;  %v5804_v34 = vld [vmem:[%s8553_s7 + $0x184] sm:$0xf0] }
 0x265   : > { %v2891_v14 = vpop.f32.mrf.mxu3  ;;  %3567 = vmatpush.bf16.msrb.mxu2 %v5259_v26 }
 0x266   : > { %v2892_v24 = vadd.f32 %v2891_v14, %v2874_v25  ;;  %v5787_v14 = vld [vmem:[%s8553_s7 + $0x104] sm:$0xf] }
 0x268   : > { %v2943_v12 = vpop.f32.mrf.mxu2  ;;  %v2910_v17 = vadd.f32 %v2909_v38, %v2892_v24 }
 0x269   : > { %3632 = vmatpush.bf16.msra.mxu2 %v5319_v44  ;;  %v2944_v22 = vadd.f32 %v2943_v12, %v2926_v39 }
 0x26a   : > { %v2928_v27 = vadd.f32 %v8229_v54, %v2910_v17 }
 0x26b   : > { %v8243_v9 = vpop.f32.mrf.mxu0  ;;  %v8245_v10 = vpop.f32.mrf.mxu1 }
 0x26c   : > { %3622 = vmatmul.bf16.vlgmr.msra.gmra.mxu1 %v8171_v58 }
 0x26d   : > { %v2894_v45 = vpop.f32.mrf.mxu3  ;;  %3633 = vmatpush.bf16.msra.mxu2 %v5311_v57  ;;  %v5816_v57 = vld [vmem:[%s8553_s7 + $0x1e4] sm:$0xf0] }
 0x26e   : > { %3609 = vmatmul.bf16.gmra.mxu0 %v3130_v3  ;;  %v5797_v3 = vld [vmem:[%s8553_s7 + $0x154] sm:$0xf] }
 0x26f   : > { %v5303_v31 = vor.u32 %v5797_v3, %v5300_v4 }
 0x270   : > { %v2945_v2 = vpop.f32.mrf.mxu2 }
 0x271   : > { %3634 = vmatpush.bf16.msra.mxu2 %v5303_v31  ;;  %v2946_v38 = vadd.f32 %v2945_v2, %v2928_v27  ;;  %v5814_v31 = vld [vmem:[%s8553_s7 + $0x1d4] sm:$0xf0]  ;;  %v5322_v27 = vld [vmem:[%s8553_s7 + $0x180] sm:$0xf] }
 0x273   : > { %v2914_v58 = vpop.f32.mrf.mxu0  ;;  %v2932_v7 = vpop.f32.mrf.mxu1 }
 0x275   : > { %v2896_v5 = vpop.f32.mrf.mxu3  ;;  %3635 = vmatpush.bf16.msra.mxu2 %v5295_v55 }
 0x278   : > { %v2948_v37 = vpop.f32.mrf.mxu2 }
 0x279   : > { %3636 = vmatpush.bf16.msra.mxu2 %v5287_v28 }
 0x27b   : > { %v8279_v15 = vpop.f32.mrf.mxu0  ;;  %v8281_v41 = vpop.f32.mrf.mxu1 }
 0x27c   : > { %3627 = vmatmul.bf16.gmra.mxu1 %v8209_v61  ;;  %v2859_v61 = vadd.f32 %v8176_v63, %v2841_v23  ;;  %v5808_v23 = vld [vmem:[%s8553_s7 + $0x1a4] sm:$0xf0] }
 0x27d   : > { %v2961_v16 = vpop.f32.mrf.mxu3  ;;  %3637 = vmatpush.bf16.msra.mxu2 %v5279_v56  ;;  %v5806_v56 = vld [vmem:[%s8553_s7 + $0x194] sm:$0xf0] }
 0x27e   : > { %v2877_v36 = vadd.f32 %v8207_v19, %v2859_v61  ;;  %v2962_v63 = vadd.f32 %v2961_v16, %v2944_v22  ;;  %v5263_v19 = vor.u32 %v5787_v14, %v5260_v13  ;;  %v5338_v16 = vld [vmem:[%s8553_s7 + $0x1a0] sm:$0xf]  ;;  %v5815_v13 = vld [vmem:[%s8553_s7 + $0x1e4] sm:$0xf] }
 0x27f   : > { %v5339_v20 = vor.u32 %v5808_v23, %v5338_v16  ;;  %v5805_v23 = vld [vmem:[%s8553_s7 + $0x194] sm:$0xf] }
 0x280   : > { %v2950_v47 = vpop.f32.mrf.mxu2  ;;  %v2895_v54 = vadd.f32 %v2894_v45, %v2877_v36  ;;  %v3116_v21 = vmax.f32 %v2962_v63, 0.0  ;;  %v5378_v45 = vld [vmem:[%s8553_s7 + $0x1f0] sm:$0xf]  ;;  %v5323_v36 = vor.u32 %v5804_v34, %v5322_v27 }
 0x281   : > { %3638 = vmatpush.bf16.msra.mxu2 %v5271_v11  ;;  %v5379_v33 = vor.u32 %v5818_v51, %v5378_v45  ;;  %v5330_v47 = vld [vmem:[%s8553_s7 + $0x190] sm:$0xf]  ;;  %v5817_v11 = vld [vmem:[%s8553_s7 + $0x1f4] sm:$0xf] }
 0x282   : > { %v2913_v1 = vadd.f32 %v8243_v9, %v2895_v54  ;;  %v5370_v9 = vld [vmem:[%s8553_s7 + $0x1e0] sm:$0xf]  ;;  %v5331_v61 = vor.u32 %v5806_v56, %v5330_v47  ;;  %v1253_v54 = vperm.slane %v8060_v35, 3  ;;  %v5813_v51 = vld [vmem:[%s8553_s7 + $0x1d4] sm:$0xf] }
 0x283   : > { %v8301_v8 = vpop.f32.mrf.mxu0  ;;  %v8303_v48 = vpop.f32.mrf.mxu1  ;;  %3578 = vmatpush.bf16.msrb.mxu3 %v5379_v33  ;;  %v5371_v7 = vor.u32 %v5816_v57, %v5370_v9  ;;  %v5364_v33 = vld [vmem:[%s8553_s7 + $0x1d8] sm:$0xf0] }
 0x284   : > { %v2931_v2 = vadd.f32 %v8245_v10, %v2913_v1  ;;  %v5362_v10 = vld [vmem:[%s8553_s7 + $0x1d0] sm:$0xf]  ;;  %v2982_v45 = vadd.f32 %v8301_v8, %v1253_v54  ;;  %v5356_v8 = vld [vmem:[%s8553_s7 + $0x1c8] sm:$0xf0] }
 0x285   : > { %v2963_v50 = vpop.f32.mrf.mxu3  ;;  %3639 = vmatpush.bf16.msra.mxu2 %v5263_v19  ;;  %v5363_v5 = vor.u32 %v5814_v31, %v5362_v10  ;;  %v5809_v31 = vld [vmem:[%s8553_s7 + $0x1b4] sm:$0xf] }
 0x286   : > { %v2964_v30 = vadd.f32 %v2963_v50, %v2946_v38  ;;  %v2949_v62 = vadd.f32 %v2948_v37, %v2931_v2  ;;  %v5380_v50 = vld [vmem:[%s8553_s7 + $0x1f8] sm:$0xf0]  ;;  %v5367_v2 = vor.u32 %v5813_v51, %v5364_v33  ;;  %v3000_v57 = vadd.f32 %v8303_v48, %v2982_v45 }
 0x287   : > { %3579 = vmatpush.bf16.msrb.mxu3 %v5371_v7 }
 0x288   : > { %v3120_v12 = vmax.f32 %v2964_v30, 0.0  ;;  %v8318_v26 = vpop.f32.mrf.mxu2  ;;  %v5383_v30 = vor.u32 %v5817_v11, %v5380_v50 }
 0x28a   : > { %v3128_v42 = vpack.c.bf16 %v3120_v12, %v3116_v21  ;;  %v5372_v21 = vld [vmem:[%s8553_s7 + $0x1e8] sm:$0xf0]  ;;  %v2980_v12 = vadd.f32 %v8279_v15, %v1253_v54  ;;  %v5811_v15 = vld [vmem:[%s8553_s7 + $0x1c4] sm:$0xf] }
 0x28b   : > { %v8321_v49 = vpop.f32.mrf.mxu0  ;;  %v8323_v44 = vpop.f32.mrf.mxu1  ;;  %3580 = vmatpush.bf16.msrb.mxu3 %v5363_v5  ;;  %v5375_v1 = vor.u32 %v5815_v13, %v5372_v21  ;;  %v5359_v7 = vor.u32 %v5811_v15, %v5356_v8  ;;  %v5348_v5 = vld [vmem:[%s8553_s7 + $0x1b8] sm:$0xf0] }
 0x28c   : > { %3568 = vmatmul.bf16.vlgmr.msrb.gmra.mxu2 %v3128_v42 }
 0x28d   : > { %v2966_v60 = vpop.f32.mrf.mxu3 }
 0x28e   : > { %v2967_v3 = vadd.f32 %v2966_v60, %v2949_v62  ;;  %v2998_v60 = vadd.f32 %v8281_v41, %v2980_v12 }
 0x28f   : > { %3581 = vmatpush.bf16.msrb.mxu3 %v5355_v18 }
 0x290   : > { %v8338_v58 = vpop.f32.mrf.mxu2  ;;  %v3124_v6 = vmax.f32 %v2967_v3, 0.0  ;;  %v3016_v62 = vadd.f32 %v8318_v26, %v2998_v60  ;;  %v5351_v26 = vor.u32 %v5809_v31, %v5348_v5 }
 0x291   : > { %v3018_v3 = vadd.f32 %v8338_v58, %v3000_v57  ;;  %v5807_v58 = vld [vmem:[%s8553_s7 + $0x1a4] sm:$0xf]  ;;  %v3201_v57 = vperm.slane %v3198_v32, 1 }
 0x292   : > { %v8354_v37 = vpack.c.bf16 %v3124_v6, %v3124_v6  ;;  %v2985_v6 = vadd.f32 %v8321_v49, %v1253_v54 }
 0x293   : > { %v2986_v4 = vpop.f32.mrf.mxu0  ;;  %v3004_v43 = vpop.f32.mrf.mxu1  ;;  %3582 = vmatpush.bf16.msrb.mxu3 %v5347_v46 }
 0x295   : > { %v2968_v52 = vpop.f32.mrf.mxu3 }
 0x296   : > { %v5340_v52 = vld [vmem:[%s8553_s7 + $0x1a8] sm:$0xf0] }
 0x297   : > { %3583 = vmatpush.bf16.msrb.mxu3 %v5339_v20  ;;  %v5343_v18 = vor.u32 %v5807_v58, %v5340_v52 }
 0x298   : > { %v8352_v25 = vpop.f32.mrf.mxu2 }
 0x29b   : > { %v3051_v55 = vpop.f32.mrf.mxu0  ;;  %v8356_v24 = vpop.f32.mrf.mxu1  ;;  %3584 = vmatpush.bf16.msrb.mxu3 %v5331_v61 }
 0x29c   : > { %3573 = vmatmul.bf16.gmra.mxu2 %v8354_v37 }
 0x29d   : > { %v3033_v28 = vpop.f32.mrf.mxu3 }
 0x29e   : > { %v3034_v4 = vadd.f32 %v3033_v28, %v3016_v62 }
 0x29f   : > { %3585 = vmatpush.bf16.msrb.mxu3 %v5323_v36 }
 0x2a0   : > { %v3022_v17 = vpop.f32.mrf.mxu2  ;;  %v3052_v48 = vadd.f32 %v3051_v55, %v3034_v4 }
 0x2a1   : > { %v3200_v17 = vperm.slane %v3198_v32, 0  ;;  %v5823_v32 = vld [vmem:[%s8555_s9 + $0x20] sm:$0xff] }
 0x2a2   : > { %v3070_v53 = vadd.f32 %v8356_v24, %v3052_v48  ;;  %v5332_v24 = vld [vmem:[%s8553_s7 + $0x198] sm:$0xf0] }
 0x2a3   : > { %v3053_v59 = vpop.f32.mrf.mxu0  ;;  %v8371_v39 = vpop.f32.mrf.mxu1  ;;  %3650 = vmatpush.bf16.msra.mxu3 %v5383_v30 }
 0x2a5   : > { %v3035_v22 = vpop.f32.mrf.mxu3 }
 0x2a6   : > { %v3036_v43 = vadd.f32 %v3035_v22, %v3018_v3 }
 0x2a7   : > { %3651 = vmatpush.bf16.msra.mxu3 %v5375_v1 }
 0x2a8   : > { %v3087_v0 = vpop.f32.mrf.mxu2  ;;  %v3054_v29 = vadd.f32 %v3053_v59, %v3036_v43  ;;  %v5335_v59 = vor.u32 %v5805_v23, %v5332_v24  ;;  %v5820_v23 = vld [vmem:[%s8555_s9 + $0x8] sm:$0xff] }
 0x2a9   : > { %v3088_v46 = vadd.f32 %v3087_v0, %v3070_v53  ;;  %v5825_v53 = vld [vmem:[%s8555_s9 + $0x30] sm:$0xff] }
 0x2aa   : > { %v3072_v28 = vadd.f32 %v8371_v39, %v3054_v29  ;;  %v5803_v39 = vld [vmem:[%s8553_s7 + $0x184] sm:$0xf] }
 0x2ab   : > { %v8385_v38 = vpop.f32.mrf.mxu0  ;;  %v8387_v63 = vpop.f32.mrf.mxu1  ;;  %3652 = vmatpush.bf16.msra.mxu3 %v5367_v2 }
 0x2ac   : > { %3640 = vmatmul.bf16.vlgmr.msra.gmra.mxu2 %v3128_v42 }
 0x2ad   : > { %v3038_v14 = vpop.f32.mrf.mxu3 }
 0x2af   : > { %3653 = vmatpush.bf16.msra.mxu3 %v5359_v7 }
 0x2b0   : > { %v3089_v19 = vpop.f32.mrf.mxu2 }
 0x2b3   : > { %v3058_v35 = vpop.f32.mrf.mxu0  ;;  %v3076_v42 = vpop.f32.mrf.mxu1  ;;  %3654 = vmatpush.bf16.msra.mxu3 %v5351_v26 }
 0x2b5   : > { %v3040_v9 = vpop.f32.mrf.mxu3 }
 0x2b7   : > { %3655 = vmatpush.bf16.msra.mxu3 %v5343_v18 }
 0x2b8   : > { %v3092_v41 = vpop.f32.mrf.mxu2 }
 0x2bb   : > { %v3533_v10 = vpop.f32.mrf.mxu0  ;;  %3656 = vmatpush.bf16.msra.mxu3 %v5335_v59 }
 0x2bc   : > { %3645 = vmatmul.bf16.gmra.mxu2 %v8354_v37  ;;  %v3003_v37 = vadd.f32 %v8323_v44, %v2985_v6  ;;  %v3090_v44 = vadd.f32 %v3089_v19, %v3072_v28  ;;  %v3534_v27 = vadd.f32 %v3533_v10, %v3200_v17 }
 0x2bd   : > { %v3105_v40 = vpop.f32.mrf.mxu3 }
 0x2be   : > { %v3021_v16 = vadd.f32 %v8352_v25, %v3003_v37  ;;  %v3106_v20 = vadd.f32 %v3105_v40, %v3088_v46  ;;  %v5324_v25 = vld [vmem:[%s8553_s7 + $0x188] sm:$0xf0]  ;;  %v5826_v40 = vld [vmem:[%s8555_s9 + $0x38] sm:$0xff] }
 0x2bf   : > { %v5327_v22 = vor.u32 %v5803_v39, %v5324_v25  ;;  %3810 = vmatpush.bf16.msra.mxu0 %v5826_v40  ;;  %v5822_v46 = vld [vmem:[%s8555_s9 + $0x18] sm:$0xff]  ;;  %v5833_v39 = vld [vmem:[%s8555_s9 + $0x70] sm:$0xff]  ;;  %v5832_v25 = vld [vmem:[%s8555_s9 + $0x68] sm:$0xff] }
 0x2c0   : > { %v3094_v55 = vpop.f32.mrf.mxu2  ;;  %v3039_v56 = vadd.f32 %v3038_v14, %v3021_v16  ;;  %v3117_v34 = vmax.f32 %v3106_v20, 0.0  ;;  %v5863_v40 = vld [vmem:[%s8556_s10] ss:$0 sm:$0xff] }
 0x2c1   : > { %3657 = vmatpush.bf16.msra.mxu3 %v5327_v22  ;;  %v5824_v55 = vld [vmem:[%s8555_s9 + $0x28] sm:$0xff] }
 0x2c2   : > { %v3057_v11 = vadd.f32 %v8385_v38, %v3039_v56  ;;  %v5831_v56 = vld [vmem:[%s8555_s9 + $0x60] sm:$0xff] }
 0x2c3   : > { %v3535_v49 = vpop.f32.mrf.mxu0  ;;  %3811 = vmatpush.bf16.msra.mxu0 %v5825_v53 }
 0x2c4   : > { %v3075_v21 = vadd.f32 %v8387_v63, %v3057_v11  ;;  %v3536_v19 = vadd.f32 %v3535_v49, %v3200_v17  ;;  %v5821_v49 = vld [vmem:[%s8555_s9 + $0x10] sm:$0xff] }
 0x2c5   : > { %v3107_v47 = vpop.f32.mrf.mxu3 }
 0x2c6   : > { %v3108_v61 = vadd.f32 %v3107_v47, %v3090_v44  ;;  %v3093_v12 = vadd.f32 %v3092_v41, %v3075_v21  ;;  %v5819_v44 = vld [vmem:[%s8555_s9] sm:$0xff] }
 0x2c7   : > { %3812 = vmatpush.bf16.msra.mxu0 %v5824_v55 }
 0x2c8   : > { %v3121_v0 = vmax.f32 %v3108_v61, 0.0  ;;  %v5830_v61 = vld [vmem:[%s8555_s9 + $0x58] sm:$0xff] }
 0x2c9   : > { %v3551_v36 = vpop.f32.mrf.mxu1 }
 0x2ca   : > { %v3129_v50 = vpack.c.bf16 %v3121_v0, %v3117_v34  ;;  %v3552_v54 = vadd.f32 %v3551_v36, %v3534_v27  ;;  %v5829_v27 = vld [vmem:[%s8555_s9 + $0x50] sm:$0xff]  ;;  %v5828_v34 = vld [vmem:[%s8555_s9 + $0x48] sm:$0xff] }
 0x2cb   : > { %v3538_v30 = vpop.f32.mrf.mxu0  ;;  %3813 = vmatpush.bf16.msra.mxu0 %v5823_v32 }
 0x2cc   : > { %3586 = vmatmul.bf16.vlgmr.msrb.gmra.mxu3 %v3129_v50  ;;  %v3539_v33 = vadd.f32 %v3538_v30, %v3200_v17  ;;  %v5834_v17 = vld [vmem:[%s8555_s9 + $0x78] sm:$0xff] }
 0x2cd   : > { %v3110_v13 = vpop.f32.mrf.mxu3  ;;  %3828 = vmatpush.bf16.msrb.mxu1 %v5834_v17 }
 0x2ce   : > { %v3111_v1 = vadd.f32 %v3110_v13, %v3093_v12  ;;  %v5827_v13 = vld [vmem:[%s8555_s9 + $0x40] sm:$0xff] }
 0x2cf   : > { %3814 = vmatpush.bf16.msra.mxu0 %v5822_v46 }
 0x2d0   : > { %v3125_v51 = vmax.f32 %v3111_v1, 0.0 }
 0x2d1   : > { %v3553_v14 = vpop.f32.mrf.mxu1  ;;  %3829 = vmatpush.bf16.msrb.mxu1 %v5833_v39 }
 0x2d2   : > { %v8455_v45 = vadd.f32 %v3553_v14, %v3536_v19  ;;  %v3133_v38 = vpack.c.bf16 %v3125_v51, %v3125_v51 }
 0x2d3   : > { %v3540_v35 = vpop.f32.mrf.mxu0  ;;  %3815 = vmatpush.bf16.msra.mxu0 %v5821_v49 }
 0x2d5   : > { %v3112_v42 = vpop.f32.mrf.mxu3  ;;  %3830 = vmatpush.bf16.msrb.mxu1 %v5832_v25 }
 0x2d7   : > { %3816 = vmatpush.bf16.msra.mxu0 %v5820_v23 }
 0x2d9   : > { %v3556_v60 = vpop.f32.mrf.mxu1  ;;  %3831 = vmatpush.bf16.msrb.mxu1 %v5831_v56 }
 0x2da   : > { %v3557_v2 = vadd.f32 %v3556_v60, %v3539_v33 }
 0x2db   : > { %v3605_v9 = vpop.f32.mrf.mxu0  ;;  %3817 = vmatpush.bf16.msra.mxu0 %v5819_v44 }
 0x2dc   : > { %3591 = vmatmul.bf16.gmra.mxu3 %v3133_v38  ;;  %v3606_v62 = vadd.f32 %v3605_v9, %v3201_v57 }
 0x2dd   : > { %3832 = vmatpush.bf16.msrb.mxu1 %v5830_v61 }
 0x2e1   : > { %v3558_v15 = vpop.f32.mrf.mxu1  ;;  %3833 = vmatpush.bf16.msrb.mxu1 %v5829_v27 }
 0x2e3   : > { %v3607_v8 = vpop.f32.mrf.mxu0 }
 0x2e4   : > { %v3608_v4 = vadd.f32 %v3607_v8, %v3201_v57 }
 0x2e5   : > { %3834 = vmatpush.bf16.msrb.mxu1 %v5828_v34 }
 0x2e9   : > { %v3623_v63 = vpop.f32.mrf.mxu1  ;;  %3835 = vmatpush.bf16.msrb.mxu1 %v5827_v13 }
 0x2ea   : > { %v3624_v7 = vadd.f32 %v3623_v63, %v3606_v62 }
 0x2eb   : > { %v3610_v3 = vpop.f32.mrf.mxu0 }
 0x2ec   : > { %3658 = vmatmul.bf16.vlgmr.msra.gmra.mxu3 %v3129_v50  ;;  %v3611_v31 = vadd.f32 %v3610_v3, %v3201_v57  ;;  %v5841_v3 = vld [vmem:[%s8557_s11 + $0x30] sm:$0xff] }
 0x2f1   : > { %v3625_v41 = vpop.f32.mrf.mxu1 }
 0x2f2   : > { %v8457_v43 = vadd.f32 %v3625_v41, %v3608_v4  ;;  %v5840_v4 = vld [vmem:[%s8557_s11 + $0x28] sm:$0xff]  ;;  %v5839_v41 = vld [vmem:[%s8557_s11 + $0x20] sm:$0xff] }
 0x2f3   : > { %v3612_v10 = vpop.f32.mrf.mxu0 }
 0x2f9   : > { %v3628_v5 = vpop.f32.mrf.mxu1 }
 0x2fa   : > { %v3629_v48 = vadd.f32 %v3628_v5, %v3611_v31  ;;  %v5837_v31 = vld [vmem:[%s8557_s11 + $0x10] sm:$0xff]  ;;  %v5836_v5 = vld [vmem:[%s8557_s11 + $0x8] sm:$0xff] }
 0x2fc   : > { %3663 = vmatmul.bf16.gmra.mxu3 %v3133_v38 }
 0x301   : > { %v3630_v26 = vpop.f32.mrf.mxu1 }
 0x302   : > { %v5835_v26 = vld [vmem:[%s8557_s11] sm:$0xff] }
 0x30f   : > { %v3569_v58 = vpop.f32.mrf.mxu2 }
 0x310   : > { %v3570_v52 = vadd.f32 %v3569_v58, %v3552_v54 }
 0x317   : > { %v3571_v6 = vpop.f32.mrf.mxu2 }
 0x318   : > { %v3572_v0 = vadd.f32 %v3571_v6, %v8455_v45 }
 0x31f   : > { %v3574_v29 = vpop.f32.mrf.mxu2 }
 0x320   : > { %v3575_v18 = vadd.f32 %v3574_v29, %v3557_v2 }
 0x327   : > { %v3576_v37 = vpop.f32.mrf.mxu2 }
 0x32f   : > { %v3641_v28 = vpop.f32.mrf.mxu2 }
 0x330   : > { %v3642_v16 = vadd.f32 %v3641_v28, %v3624_v7  ;;  %v5842_v7 = vld [vmem:[%s8557_s11 + $0x38] sm:$0xff] }
 0x331   : > { %3919 = vmatpush.bf16.msrb.mxu2 %v5842_v7 }
 0x335   : > { %3920 = vmatpush.bf16.msrb.mxu2 %v5841_v3 }
 0x337   : > { %v3643_v24 = vpop.f32.mrf.mxu2 }
 0x338   : > { %v3644_v42 = vadd.f32 %v3643_v24, %v8457_v43  ;;  %v5838_v43 = vld [vmem:[%s8557_s11 + $0x18] sm:$0xff] }
 0x339   : > { %3921 = vmatpush.bf16.msrb.mxu2 %v5840_v4 }
 0x33d   : > { %3922 = vmatpush.bf16.msrb.mxu2 %v5839_v41 }
 0x33f   : > { %v3646_v20 = vpop.f32.mrf.mxu2 }
 0x340   : > { %v3647_v59 = vadd.f32 %v3646_v20, %v3629_v48  ;;  %v5864_v20 = vld [vmem:[%s8558_s12] ss:$0 sm:$0xff] }
 0x341   : > { %3923 = vmatpush.bf16.msrb.mxu2 %v5838_v43 }
 0x345   : > { %3924 = vmatpush.bf16.msrb.mxu2 %v5837_v31 }
 0x347   : > { %v3648_v47 = vpop.f32.mrf.mxu2 }
 0x349   : > { %3925 = vmatpush.bf16.msrb.mxu2 %v5836_v5 }
 0x34d   : > { %3926 = vmatpush.bf16.msrb.mxu2 %v5835_v26 }
 0x34f   : > { %v3587_v22 = vpop.f32.mrf.mxu3 }
 0x350   : > { %v3588_v36 = vadd.f32 %v3587_v22, %v3570_v52 }
 0x352   : > { %v3668_v54 = vmax.f32 %v3588_v36, 0.0 }
 0x357   : > { %v3589_v11 = vpop.f32.mrf.mxu3 }
 0x358   : > { %v3590_v50 = vadd.f32 %v3589_v11, %v3572_v0 }
 0x35a   : > { %v3670_v30 = vmax.f32 %v3590_v50, 0.0 }
 0x35c   : > { %v3674_v21 = vpack.c.bf16 %v3670_v30, %v3668_v54 }
 0x35e   : > { %3818 = vmatmul.bf16.vlgmr.msra.gmra.mxu0 %v3674_v21 }
 0x35f   : > { %v3592_v12 = vpop.f32.mrf.mxu3 }
 0x360   : > { %v3593_v19 = vadd.f32 %v3592_v12, %v3575_v18 }
 0x362   : > { %v3672_v1 = vmax.f32 %v3593_v19, 0.0 }
 0x364   : > { %v3676_v35 = vpack.c.bf16 %v3672_v1, %v3672_v1 }
 0x367   : > { %v3594_v14 = vpop.f32.mrf.mxu3 }
 0x36e   : > { %3823 = vmatmul.bf16.gmra.mxu0 %v3676_v35 }
 0x36f   : > { %v3659_v45 = vpop.f32.mrf.mxu3 }
 0x370   : > { %v3660_v51 = vadd.f32 %v3659_v45, %v3642_v16 }
 0x372   : > { %v3669_v38 = vmax.f32 %v3660_v51, 0.0 }
 0x377   : > { %v3661_v33 = vpop.f32.mrf.mxu3 }
 0x378   : > { %v3662_v60 = vadd.f32 %v3661_v33, %v3644_v42 }
 0x37a   : > { %v3671_v2 = vmax.f32 %v3662_v60, 0.0 }
 0x37c   : > { %v3675_v9 = vpack.c.bf16 %v3671_v2, %v3669_v38 }
 0x37e   : > { %3836 = vmatmul.bf16.vlgmr.msrb.gmra.mxu1 %v3675_v9 }
 0x37f   : > { %v3664_v15 = vpop.f32.mrf.mxu3 }
 0x380   : > { %v3665_v8 = vadd.f32 %v3664_v15, %v3647_v59 }
 0x382   : > { %v3673_v62 = vmax.f32 %v3665_v8, 0.0 }
 0x384   : > { %v3677_v63 = vpack.c.bf16 %v3673_v62, %v3673_v62 }
 0x387   : > { %v3666_v57 = vpop.f32.mrf.mxu3 }
 0x38e   : > { %3841 = vmatmul.bf16.gmra.mxu1 %v3677_v63 }
 0x3db   : > { %v3819_v10 = vpop.f32.mrf.mxu0 }
 0x3dc   : > { %v3820_v29 = vadd.f32 %v5863_v40, %v3819_v10 }
 0x3e3   : > { %v3821_v48 = vpop.f32.mrf.mxu0 }
 0x3e4   : > { %v3822_v18 = vadd.f32 %v5863_v40, %v3821_v48 }
 0x3eb   : > { %v3824_v58 = vpop.f32.mrf.mxu0 }
 0x3ec   : > { %v3825_v49 = vadd.f32 %v5863_v40, %v3824_v58 }
 0x3f3   : > { %v3826_v52 = vpop.f32.mrf.mxu0 }
 0x3fb   : > { %v3837_v6 = vpop.f32.mrf.mxu1 }
 0x3fc   : > { %v3838_v53 = vadd.f32 %v3837_v6, %v3820_v29 }
 0x3fe   : > { %v3846_v32 = vmax.f32 %v3838_v53, 0.0 }
 0x403   : > { %v3839_v55 = vpop.f32.mrf.mxu1 }
 0x404   : > { %v3840_v37 = vadd.f32 %v3839_v55, %v3822_v18 }
 0x406   : > { %v3847_v46 = vmax.f32 %v3840_v37, 0.0 }
 0x408   : > { %v3849_v28 = vpack.c.bf16 %v3847_v46, %v3846_v32 }
 0x40a   : > { %3927 = vmatmul.bf16.vlgmr.msrb.gmra.mxu2 %v3849_v28 }
 0x40b   : > { %v3842_v16 = vpop.f32.mrf.mxu1 }
 0x40c   : > { %v3843_v23 = vadd.f32 %v3842_v16, %v3825_v49 }
 0x40e   : > { %v3848_v44 = vmax.f32 %v3843_v23, 0.0 }
 0x410   : > { %v3850_v17 = vpack.c.bf16 %v3848_v44, %v3848_v44 }
 0x413   : > { %v3844_v24 = vpop.f32.mrf.mxu1 }
 0x41a   : > { %3932 = vmatmul.bf16.gmra.mxu2 %v3850_v17 }
 0x48d   : > { %v3928_v59 = vpop.f32.mrf.mxu2 }
 0x48e   : > { %v3929_v39 = vadd.f32 %v5864_v20, %v3928_v59 }
 0x490   : > { %3937 = vst [vmem:[%s440_s19] sm:$0xff] %v3929_v39 }
 0x495   : > { %v3930_v25 = vpop.f32.mrf.mxu2 }
 0x496   : > { %v3931_v47 = vadd.f32 %v5864_v20, %v3930_v25 }
 0x498   : > { %3938 = vst [vmem:[%s440_s19 + $0x8] sm:$0xff] %v3931_v47 }
 0x49d   : > { %v3933_v56 = vpop.f32.mrf.mxu2 }
 0x49e   : > { %v3934_v61 = vadd.f32 %v5864_v20, %v3933_v56 }
 0x4a0   : > { %3939 = vst [vmem:[%s440_s19 + $0x10] sm:$0xf] %v3934_v61 }
 0x4a5   : > { %v3935_v22 = vpop.f32.mrf.mxu2 }
 0x4a6 PF: > { %s23_s25 = sadd.s32 1, %s5872_s25  }
 0x4a7   : > { %p20_p4 = scmp.ge.s32.totalorder %s23_s25, 8  }
 0x4a9   :  { %22 = sbr.rel (!%p20_p4) target bundleno = 1 (0x1), region = 105 }

</bundles_post_ra>
